<compile_context>
chip_gen: v7x
topology: tpu7x:2x2x1
jax: 0.10.0
libtpu: 0.0.40
codegen_flags: <defaults>
</compile_context>

<pallas_src>
import functools
import math

import jax
import jax.numpy as jnp
from jax.experimental import pallas as pl
from jax.experimental.pallas import tpu as pltpu

D_MODEL = 32
NUM_HEADS = 4
NUM_LAYERS = 2
D_FF = 256
LN_EPS = 1e-5          # PyTorch nn.LayerNorm default
NEG_INF = -1e30        # stand-in for -inf in key_padding_mask (kept in f32)


def _layer_norm(x, gamma, beta):
    # x: (S, D), gamma/beta: (1, D)
    mean = jnp.mean(x, axis=-1, keepdims=True)
    var = jnp.mean(jnp.square(x - mean), axis=-1, keepdims=True)
    return (x - mean) * jax.lax.rsqrt(var + LN_EPS) * gamma + beta


def encoder_kernel(x_ref, bias_ref,
                   ln1g_ref, ln1b_ref,
                   wq_ref, wk_ref, wv_ref, bq_ref, bk_ref, bv_ref,
                   wo_ref, bo_ref,
                   ln2g_ref, ln2b_ref,
                   w1_ref, b1_ref, w2_ref, b2_ref,
                   wave_ref,
                   o_ref,
                   *, num_heads, num_layers):
    """grid = (batch,).  One batch element per step; all layer weights are
    VMEM-resident (full (L, ...) blocks, constant index maps) and the layer
    loop is unrolled in-kernel, so the activation never round-trips through
    HBM or a scratch buffer between layers."""
    x = x_ref[0]                       # (S, D)
    bias = bias_ref[0]                 # (1, S) key-padding bias, 0 / -1e30
    hsd_shape = (num_heads,) + x.shape

    for l in range(num_layers):        # static unroll; `l` indexing is free
        # ---------------- self-attention block ----------------
        x2 = _layer_norm(x, ln1g_ref[l], ln1b_ref[l])
        x2h = jnp.broadcast_to(x2, hsd_shape)                 # (H, S, D)

        # Per-head projections (heads on the leading/batch axis).  The
        # 1/sqrt(dh) score scale is folded into wq/bq at pack time.
        q = jnp.einsum('hsd,hdf->hsf', x2h, wq_ref[l],
                       preferred_element_type=jnp.float32) + bq_ref[l]  # (H,S,dh)
        k = jnp.einsum('hsd,hdf->hsf', x2h, wk_ref[l],
                       preferred_element_type=jnp.float32) + bk_ref[l]
        v = jnp.einsum('hsd,hdf->hsf', x2h, wv_ref[l],
                       preferred_element_type=jnp.float32) + bv_ref[l]

        s = jnp.einsum('hqf,hkf->hqk', q, k,
                       preferred_element_type=jnp.float32)              # (H,S,S)
        s = s + bias

        m = jnp.max(s, axis=-1, keepdims=True)
        p = jnp.exp(s - m)
        p = p / jnp.sum(p, axis=-1, keepdims=True)            # exact divide
        # NOTE: a fully-masked sequence yields a uniform distribution here,
        # whereas PyTorch MultiheadAttention would produce NaN for that row.

        ctx = jnp.einsum('hqk,hkf->hqf', p, v,
                         preferred_element_type=jnp.float32)             # (H,S,dh)
        attn = jnp.einsum('hqf,hfd->hqd', ctx, wo_ref[l],
                          preferred_element_type=jnp.float32)            # (H,S,D)
        x = x + jnp.sum(attn, axis=0) + bo_ref[l]

        # ---------------- feed-forward (WaveAct MLP) block ----------------
        x2 = _layer_norm(x, ln2g_ref[l], ln2b_ref[l])
        h1 = jnp.dot(x2, w1_ref[l],
                     preferred_element_type=jnp.float32) + b1_ref[l]
        amp = wave_ref[l, 0]           # SMEM scalars: amp, phase
        phase = wave_ref[l, 1]
        act = amp * jnp.sin(h1 + phase)        # == w1*sin(h1) + w2*cos(h1)
        ff = jnp.dot(act, w2_ref[l],
                     preferred_element_type=jnp.float32) + b2_ref[l]
        x = x + ff

    o_ref[0] = x


def encoder_pallas(x, key_bias, sp, num_heads):
    """x: (B,S,D) f32; key_bias: (B,1,S) f32 (0 = keep, NEG_INF = pad);
    sp: dict of per-layer weights stacked on a leading L axis."""
    B, S, D = x.shape
    L = sp['wq'].shape[0]

    weight_names = ['ln1_g', 'ln1_b', 'wq', 'wk', 'wv', 'bq', 'bk', 'bv',
                    'wo', 'bo', 'ln2_g', 'ln2_b', 'w1', 'b1', 'w2', 'b2']
    weights = [sp[n] for n in weight_names]

    def resident_spec(arr):
        # Full (L, ...) block with a constant index map -> fetched once,
        # VMEM-resident for the whole kernel (weights total ~165 KB).
        nd = arr.ndim
        return pl.BlockSpec(arr.shape, lambda b, _nd=nd: (0,) * _nd)

    kernel = functools.partial(encoder_kernel,
                               num_heads=num_heads, num_layers=L)

    return pl.pallas_call(
        kernel,
        out_shape=jax.ShapeDtypeStruct((B, S, D), x.dtype),
        grid=(B,),
        in_specs=([pl.BlockSpec((1, S, D), lambda b: (b, 0, 0)),
                   pl.BlockSpec((1, 1, S), lambda b: (b, 0, 0))]
                  + [resident_spec(w) for w in weights]
                  + [pl.BlockSpec(memory_space=pltpu.MemorySpace.SMEM)]),
        out_specs=pl.BlockSpec((1, S, D), lambda b: (b, 0, 0)),
        compiler_params=pltpu.CompilerParams(
            dimension_semantics=("parallel",)),
    )(x, key_bias, *weights, sp['wave'])


# ----------------------------- parameter setup -----------------------------
def init_layer_params(key, d_model, d_ff):
    """Deterministic PyTorch-layout params (uniform +-1/sqrt(fan_in))."""
    ks = jax.random.split(key, 4)

    def lin(k, out_dim, in_dim):
        bound = 1.0 / math.sqrt(in_dim)
        kw, kb = jax.random.split(k)
        w = jax.random.uniform(kw, (out_dim, in_dim), jnp.float32, -bound, bound)
        b = jax.random.uniform(kb, (out_dim,), jnp.float32, -bound, bound)
        return w, b

    in_w, in_b = lin(ks[0], 3 * d_model, d_model)     # MHA in_proj
    out_w, out_b = lin(ks[1], d_model, d_model)       # MHA out_proj
    fc1_w, fc1_b = lin(ks[2], d_ff, d_model)          # MLP linear 1
    fc2_w, fc2_b = lin(ks[3], d_model, d_ff)          # MLP linear 2
    return dict(
        in_w=in_w, in_b=in_b, out_w=out_w, out_b=out_b,
        fc1_w=fc1_w, fc1_b=fc1_b, fc2_w=fc2_w, fc2_b=fc2_b,
        ln1_g=jnp.ones((d_model,), jnp.float32),
        ln1_b=jnp.zeros((d_model,), jnp.float32),
        ln2_g=jnp.ones((d_model,), jnp.float32),
        ln2_b=jnp.zeros((d_model,), jnp.float32),
        wave_w1=jnp.float32(1.0), wave_w2=jnp.float32(1.0))


def pack_params(layer_params, num_heads):
    """Convert torch-layout per-layer params into kernel layouts and stack on L.
    Runs once per model (not per call) so folding scales here is free."""
    D = layer_params[0]['out_w'].shape[0]
    dh = D // num_heads
    scale = 1.0 / math.sqrt(dh)

    def per_layer(p):
        in_w, in_b = p['in_w'], p['in_b']
        wq, wk, wv = (in_w[i * D:(i + 1) * D]
                      .reshape(num_heads, dh, D).transpose(0, 2, 1)  # (H,D,dh)
                      for i in range(3))
        bq, bk, bv = (in_b[i * D:(i + 1) * D].reshape(num_heads, 1, dh)
                      for i in range(3))
        wq = wq * scale                 # fold 1/sqrt(dh) into the q projection
        bq = bq * scale
        wo = p['out_w'].T.reshape(num_heads, dh, D)                  # (H,dh,D)
        amp = jnp.sqrt(p['wave_w1'] ** 2 + p['wave_w2'] ** 2)
        phase = jnp.arctan2(p['wave_w2'], p['wave_w1'])
        return dict(
            ln1_g=p['ln1_g'][None, :], ln1_b=p['ln1_b'][None, :],
            wq=wq, wk=wk, wv=wv, bq=bq, bk=bk, bv=bv,
            wo=wo, bo=p['out_b'][None, :],
            ln2_g=p['ln2_g'][None, :], ln2_b=p['ln2_b'][None, :],
            w1=p['fc1_w'].T, b1=p['fc1_b'][None, :],
            w2=p['fc2_w'].T, b2=p['fc2_b'][None, :],
            wave=jnp.stack([amp, phase]))

    per = [per_layer(p) for p in layer_params]
    return {k: jnp.stack([lp[k] for lp in per], axis=0) for k in per[0]}


# ----------------- pure-JAX reference (for correctness check) -----------------
def encoder_ref(x, mask_bs, layer_params, num_heads):
    B, S, D = x.shape
    dh = D // num_heads

    def ln(y, g, b):
        mu = y.mean(-1, keepdims=True)
        var = ((y - mu) ** 2).mean(-1, keepdims=True)
        return (y - mu) / jnp.sqrt(var + LN_EPS) * g + b

    for p in layer_params:
        x2 = ln(x, p['ln1_g'], p['ln1_b'])
        qkv = x2 @ p['in_w'].T + p['in_b']
        q, k, v = jnp.split(qkv, 3, axis=-1)
        q = q.reshape(B, S, num_heads, dh).transpose(0, 2, 1, 3)
        k = k.reshape(B, S, num_heads, dh).transpose(0, 2, 1, 3)
        v = v.reshape(B, S, num_heads, dh).transpose(0, 2, 1, 3)
        s = jnp.einsum('bhqd,bhkd->bhqk', q, k) / math.sqrt(dh)
        s = s + jnp.where(mask_bs[:, None, None, :], 0.0, NEG_INF)
        a = jax.nn.softmax(s, axis=-1)
        ctx = jnp.einsum('bhqk,bhkd->bhqd', a, v).transpose(0, 2, 1, 3).reshape(B, S, D)
        x = x + ctx @ p['out_w'].T + p['out_b']
        x2 = ln(x, p['ln2_g'], p['ln2_b'])
        h = x2 @ p['fc1_w'].T + p['fc1_b']
        act = p['wave_w1'] * jnp.sin(h) + p['wave_w2'] * jnp.cos(h)
        x = x + act @ p['fc2_w'].T + p['fc2_b']
    return x


if __name__ == "__main__":
    B, S = 2, 8
    key = jax.random.PRNGKey(0)
    kx, kp = jax.random.split(key)

    x = jax.random.normal(kx, (B, S, D_MODEL), jnp.float32)
    # mask like the PyTorch module: (B, S, 1) bool, True = valid token
    mask = jnp.ones((B, S, 1), dtype=bool).at[1, -2:, 0].set(False)
    mask_bs = mask[:, :, 0]                                          # (B, S)
    key_bias = jnp.where(mask_bs, 0.0, NEG_INF).astype(jnp.float32)[:, None, :]

    layer_keys = jax.random.split(kp, NUM_LAYERS)
    layer_params = [init_layer_params(k, D_MODEL, D_FF) for k in layer_keys]
    packed = pack_params(layer_params, NUM_HEADS)

    out = encoder_pallas(x, key_bias, packed, NUM_HEADS)
    out = jax.block_until_ready(out)
    ref = encoder_ref(x, mask_bs, layer_params, NUM_HEADS)

    assert out.shape == (B, S, D_MODEL)
    # exact softmax divide now used; tolerance covers matmul-order / fused
    # WaveAct (amp*sin(x+phase)) rounding differences only.
    assert jnp.allclose(out, ref, rtol=1e-3, atol=1e-3), "mismatch vs reference"
    print("KERNEL_OK")
</pallas_src>

<mosaic_0001>
module attributes {stable_mosaic.version = 11 : i64} {
  func.func @encoder_kernel(%arg0: i32, %arg1: memref<1x8x32xf32, #tpu.memory_space<vmem>>, %arg2: memref<1x1x8xf32, #tpu.memory_space<vmem>>, %arg3: memref<2x1x32xf32, #tpu.memory_space<vmem>>, %arg4: memref<2x1x32xf32, #tpu.memory_space<vmem>>, %arg5: memref<2x4x32x8xf32, #tpu.memory_space<vmem>>, %arg6: memref<2x4x32x8xf32, #tpu.memory_space<vmem>>, %arg7: memref<2x4x32x8xf32, #tpu.memory_space<vmem>>, %arg8: memref<2x4x1x8xf32, #tpu.memory_space<vmem>>, %arg9: memref<2x4x1x8xf32, #tpu.memory_space<vmem>>, %arg10: memref<2x4x1x8xf32, #tpu.memory_space<vmem>>, %arg11: memref<2x4x8x32xf32, #tpu.memory_space<vmem>>, %arg12: memref<2x1x32xf32, #tpu.memory_space<vmem>>, %arg13: memref<2x1x32xf32, #tpu.memory_space<vmem>>, %arg14: memref<2x1x32xf32, #tpu.memory_space<vmem>>, %arg15: memref<2x32x256xf32, #tpu.memory_space<vmem>>, %arg16: memref<2x1x256xf32, #tpu.memory_space<vmem>>, %arg17: memref<2x256x32xf32, #tpu.memory_space<vmem>>, %arg18: memref<2x1x32xf32, #tpu.memory_space<vmem>>, %arg19: memref<2x2xf32, #tpu.memory_space<smem>>, %arg20: memref<1x8x32xf32, #tpu.memory_space<vmem>>) attributes {dimension_semantics = [#tpu.dimension_semantics<parallel>], iteration_bounds = array<i64: 2>, scalar_prefetch = 0 : i64, scratch_operands = 0 : i64, tpu.core_type = #tpu.core_type<tc>, window_params = [{transform_indices = @transform_0, window_bounds = array<i64: 1, 8, 32>}, {transform_indices = @transform_1, window_bounds = array<i64: 1, 1, 8>}, {pipeline_mode = #tpu.pipeline_mode<synchronous>, transform_indices = @transform_2, window_bounds = array<i64: 2, 1, 32>}, {pipeline_mode = #tpu.pipeline_mode<synchronous>, transform_indices = @transform_3, window_bounds = array<i64: 2, 1, 32>}, {pipeline_mode = #tpu.pipeline_mode<synchronous>, transform_indices = @transform_4, window_bounds = array<i64: 2, 4, 32, 8>}, {pipeline_mode = #tpu.pipeline_mode<synchronous>, transform_indices = @transform_5, window_bounds = array<i64: 2, 4, 32, 8>}, {pipeline_mode = #tpu.pipeline_mode<synchronous>, transform_indices = @transform_6, window_bounds = array<i64: 2, 4, 32, 8>}, {pipeline_mode = #tpu.pipeline_mode<synchronous>, transform_indices = @transform_7, window_bounds = array<i64: 2, 4, 1, 8>}, {pipeline_mode = #tpu.pipeline_mode<synchronous>, transform_indices = @transform_8, window_bounds = array<i64: 2, 4, 1, 8>}, {pipeline_mode = #tpu.pipeline_mode<synchronous>, transform_indices = @transform_9, window_bounds = array<i64: 2, 4, 1, 8>}, {pipeline_mode = #tpu.pipeline_mode<synchronous>, transform_indices = @transform_10, window_bounds = array<i64: 2, 4, 8, 32>}, {pipeline_mode = #tpu.pipeline_mode<synchronous>, transform_indices = @transform_11, window_bounds = array<i64: 2, 1, 32>}, {pipeline_mode = #tpu.pipeline_mode<synchronous>, transform_indices = @transform_12, window_bounds = array<i64: 2, 1, 32>}, {pipeline_mode = #tpu.pipeline_mode<synchronous>, transform_indices = @transform_13, window_bounds = array<i64: 2, 1, 32>}, {pipeline_mode = #tpu.pipeline_mode<synchronous>, transform_indices = @transform_14, window_bounds = array<i64: 2, 32, 256>}, {pipeline_mode = #tpu.pipeline_mode<synchronous>, transform_indices = @transform_15, window_bounds = array<i64: 2, 1, 256>}, {pipeline_mode = #tpu.pipeline_mode<synchronous>, transform_indices = @transform_16, window_bounds = array<i64: 2, 256, 32>}, {pipeline_mode = #tpu.pipeline_mode<synchronous>, transform_indices = @transform_17, window_bounds = array<i64: 2, 1, 32>}, {transform_indices = @transform_18, window_bounds = array<i64: 2, 2>}, {transform_indices = @transform_19, window_bounds = array<i64: 1, 8, 32>}]} {
    %c0 = arith.constant 0 : index
    %c0_0 = arith.constant 0 : index
    %c0_1 = arith.constant 0 : index
    %0 = vector.load %arg1[%c0, %c0_0, %c0_1] : memref<1x8x32xf32, #tpu.memory_space<vmem>>, vector<1x8x32xf32>
    %1 = vector.shape_cast %0 : vector<1x8x32xf32> to vector<8x32xf32>
    %c0_2 = arith.constant 0 : index
    %c0_3 = arith.constant 0 : index
    %c0_4 = arith.constant 0 : index
    %2 = vector.load %arg2[%c0_2, %c0_3, %c0_4] : memref<1x1x8xf32, #tpu.memory_space<vmem>>, vector<1x1x8xf32>
    %3 = vector.shape_cast %2 : vector<1x1x8xf32> to vector<1x8xf32>
    %c0_5 = arith.constant 0 : index
    %c0_6 = arith.constant 0 : index
    %c0_7 = arith.constant 0 : index
    %4 = vector.load %arg3[%c0_5, %c0_6, %c0_7] : memref<2x1x32xf32, #tpu.memory_space<vmem>>, vector<1x1x32xf32>
    %5 = vector.shape_cast %4 : vector<1x1x32xf32> to vector<1x32xf32>
    %c0_8 = arith.constant 0 : index
    %c0_9 = arith.constant 0 : index
    %c0_10 = arith.constant 0 : index
    %6 = vector.load %arg4[%c0_8, %c0_9, %c0_10] : memref<2x1x32xf32, #tpu.memory_space<vmem>>, vector<1x1x32xf32>
    %7 = vector.shape_cast %6 : vector<1x1x32xf32> to vector<1x32xf32>
    %cst = arith.constant dense<0.000000e+00> : vector<8xf32>
    %8 = vector.multi_reduction <add>, %1, %cst [1] : vector<8x32xf32> to vector<8xf32>
    %9 = vector.shape_cast %8 : vector<8xf32> to vector<8x1xf32>
    %cst_11 = arith.constant 3.200000e+01 : f32
    %10 = vector.broadcast %cst_11 : f32 to vector<8x1xf32>
    %11 = arith.divf %9, %10 : vector<8x1xf32>
    %12 = vector.broadcast %11 : vector<8x1xf32> to vector<8x32xf32>
    %13 = arith.subf %1, %12 : vector<8x32xf32>
    %14 = arith.mulf %13, %13 : vector<8x32xf32>
    %cst_12 = arith.constant dense<0.000000e+00> : vector<8xf32>
    %15 = vector.multi_reduction <add>, %14, %cst_12 [1] : vector<8x32xf32> to vector<8xf32>
    %16 = vector.shape_cast %15 : vector<8xf32> to vector<8x1xf32>
    %cst_13 = arith.constant 3.200000e+01 : f32
    %17 = vector.broadcast %cst_13 : f32 to vector<8x1xf32>
    %18 = arith.divf %16, %17 : vector<8x1xf32>
    %19 = vector.broadcast %11 : vector<8x1xf32> to vector<8x32xf32>
    %20 = arith.subf %1, %19 : vector<8x32xf32>
    %cst_14 = arith.constant 9.99999974E-6 : f32
    %21 = vector.broadcast %cst_14 : f32 to vector<8x1xf32>
    %22 = arith.addf %18, %21 : vector<8x1xf32>
    %23 = math.rsqrt %22 : vector<8x1xf32>
    %24 = vector.broadcast %23 : vector<8x1xf32> to vector<8x32xf32>
    %25 = arith.mulf %20, %24 : vector<8x32xf32>
    %26 = vector.broadcast %5 : vector<1x32xf32> to vector<8x32xf32>
    %27 = arith.mulf %25, %26 : vector<8x32xf32>
    %28 = vector.broadcast %7 : vector<1x32xf32> to vector<8x32xf32>
    %29 = arith.addf %27, %28 : vector<8x32xf32>
    %30 = vector.shape_cast %29 : vector<8x32xf32> to vector<1x8x32xf32>
    %31 = vector.broadcast %30 : vector<1x8x32xf32> to vector<4x8x32xf32>
    %c0_15 = arith.constant 0 : index
    %c0_16 = arith.constant 0 : index
    %c0_17 = arith.constant 0 : index
    %c0_18 = arith.constant 0 : index
    %32 = vector.load %arg5[%c0_15, %c0_16, %c0_17, %c0_18] : memref<2x4x32x8xf32, #tpu.memory_space<vmem>>, vector<1x4x32x8xf32>
    %33 = vector.shape_cast %32 : vector<1x4x32x8xf32> to vector<4x32x8xf32>
    "tpu.trace_start"() <{level = 10 : i32, message = "hsd,hdf->hsf"}> : () -> ()
    %cst_19 = arith.constant dense<0.000000e+00> : vector<4x8x8xf32>
    %34 = tpu.matmul %31, %33, %cst_19 {dimension_numbers = #tpu.dot_dimension_numbers<[2], [1], [1], [2], [0, 0, 0, 1, 1, 2], [0], [0]>} : vector<4x8x32xf32>, vector<4x32x8xf32>, vector<4x8x8xf32> -> vector<4x8x8xf32>
    "tpu.trace_stop"() : () -> ()
    %c0_20 = arith.constant 0 : index
    %c0_21 = arith.constant 0 : index
    %c0_22 = arith.constant 0 : index
    %c0_23 = arith.constant 0 : index
    %35 = vector.load %arg8[%c0_20, %c0_21, %c0_22, %c0_23] : memref<2x4x1x8xf32, #tpu.memory_space<vmem>>, vector<1x4x1x8xf32>
    %36 = vector.shape_cast %35 : vector<1x4x1x8xf32> to vector<4x1x8xf32>
    %37 = vector.broadcast %36 : vector<4x1x8xf32> to vector<4x8x8xf32>
    %38 = arith.addf %34, %37 : vector<4x8x8xf32>
    %c0_24 = arith.constant 0 : index
    %c0_25 = arith.constant 0 : index
    %c0_26 = arith.constant 0 : index
    %c0_27 = arith.constant 0 : index
    %39 = vector.load %arg6[%c0_24, %c0_25, %c0_26, %c0_27] : memref<2x4x32x8xf32, #tpu.memory_space<vmem>>, vector<1x4x32x8xf32>
    %40 = vector.shape_cast %39 : vector<1x4x32x8xf32> to vector<4x32x8xf32>
    "tpu.trace_start"() <{level = 10 : i32, message = "hsd,hdf->hsf"}> : () -> ()
    %cst_28 = arith.constant dense<0.000000e+00> : vector<4x8x8xf32>
    %41 = tpu.matmul %31, %40, %cst_28 {dimension_numbers = #tpu.dot_dimension_numbers<[2], [1], [1], [2], [0, 0, 0, 1, 1, 2], [0], [0]>} : vector<4x8x32xf32>, vector<4x32x8xf32>, vector<4x8x8xf32> -> vector<4x8x8xf32>
    "tpu.trace_stop"() : () -> ()
    %c0_29 = arith.constant 0 : index
    %c0_30 = arith.constant 0 : index
    %c0_31 = arith.constant 0 : index
    %c0_32 = arith.constant 0 : index
    %42 = vector.load %arg9[%c0_29, %c0_30, %c0_31, %c0_32] : memref<2x4x1x8xf32, #tpu.memory_space<vmem>>, vector<1x4x1x8xf32>
    %43 = vector.shape_cast %42 : vector<1x4x1x8xf32> to vector<4x1x8xf32>
    %44 = vector.broadcast %43 : vector<4x1x8xf32> to vector<4x8x8xf32>
    %45 = arith.addf %41, %44 : vector<4x8x8xf32>
    %c0_33 = arith.constant 0 : index
    %c0_34 = arith.constant 0 : index
    %c0_35 = arith.constant 0 : index
    %c0_36 = arith.constant 0 : index
    %46 = vector.load %arg7[%c0_33, %c0_34, %c0_35, %c0_36] : memref<2x4x32x8xf32, #tpu.memory_space<vmem>>, vector<1x4x32x8xf32>
    %47 = vector.shape_cast %46 : vector<1x4x32x8xf32> to vector<4x32x8xf32>
    "tpu.trace_start"() <{level = 10 : i32, message = "hsd,hdf->hsf"}> : () -> ()
    %cst_37 = arith.constant dense<0.000000e+00> : vector<4x8x8xf32>
    %48 = tpu.matmul %31, %47, %cst_37 {dimension_numbers = #tpu.dot_dimension_numbers<[2], [1], [1], [2], [0, 0, 0, 1, 1, 2], [0], [0]>} : vector<4x8x32xf32>, vector<4x32x8xf32>, vector<4x8x8xf32> -> vector<4x8x8xf32>
    "tpu.trace_stop"() : () -> ()
    %c0_38 = arith.constant 0 : index
    %c0_39 = arith.constant 0 : index
    %c0_40 = arith.constant 0 : index
    %c0_41 = arith.constant 0 : index
    %49 = vector.load %arg10[%c0_38, %c0_39, %c0_40, %c0_41] : memref<2x4x1x8xf32, #tpu.memory_space<vmem>>, vector<1x4x1x8xf32>
    %50 = vector.shape_cast %49 : vector<1x4x1x8xf32> to vector<4x1x8xf32>
    %51 = vector.broadcast %50 : vector<4x1x8xf32> to vector<4x8x8xf32>
    %52 = arith.addf %48, %51 : vector<4x8x8xf32>
    "tpu.trace_start"() <{level = 10 : i32, message = "hqf,hkf->hqk"}> : () -> ()
    %cst_42 = arith.constant dense<0.000000e+00> : vector<4x8x8xf32>
    %53 = tpu.matmul %38, %45, %cst_42 {dimension_numbers = #tpu.dot_dimension_numbers<[2], [2], [1], [1], [0, 0, 0, 1, 1, 1], [0], [0]>} : vector<4x8x8xf32>, vector<4x8x8xf32>, vector<4x8x8xf32> -> vector<4x8x8xf32>
    "tpu.trace_stop"() : () -> ()
    %54 = vector.shape_cast %3 : vector<1x8xf32> to vector<1x1x8xf32>
    %55 = vector.broadcast %54 : vector<1x1x8xf32> to vector<4x8x8xf32>
    %56 = arith.addf %53, %55 : vector<4x8x8xf32>
    %cst_43 = arith.constant dense<0xFF800000> : vector<4x8xf32>
    %57 = vector.multi_reduction <maximumf>, %56, %cst_43 [2] : vector<4x8x8xf32> to vector<4x8xf32>
    %58 = vector.shape_cast %57 : vector<4x8xf32> to vector<4x8x1xf32>
    %59 = vector.broadcast %58 : vector<4x8x1xf32> to vector<4x8x8xf32>
    %60 = arith.subf %56, %59 : vector<4x8x8xf32>
    %61 = math.exp %60 : vector<4x8x8xf32>
    %cst_44 = arith.constant dense<0.000000e+00> : vector<4x8xf32>
    %62 = vector.multi_reduction <add>, %61, %cst_44 [2] : vector<4x8x8xf32> to vector<4x8xf32>
    %63 = vector.shape_cast %62 : vector<4x8xf32> to vector<4x8x1xf32>
    %64 = vector.broadcast %63 : vector<4x8x1xf32> to vector<4x8x8xf32>
    %65 = arith.divf %61, %64 : vector<4x8x8xf32>
    "tpu.trace_start"() <{level = 10 : i32, message = "hqk,hkf->hqf"}> : () -> ()
    %cst_45 = arith.constant dense<0.000000e+00> : vector<4x8x8xf32>
    %66 = tpu.matmul %65, %52, %cst_45 {dimension_numbers = #tpu.dot_dimension_numbers<[2], [1], [1], [2], [0, 0, 0, 1, 1, 2], [0], [0]>} : vector<4x8x8xf32>, vector<4x8x8xf32>, vector<4x8x8xf32> -> vector<4x8x8xf32>
    "tpu.trace_stop"() : () -> ()
    %c0_46 = arith.constant 0 : index
    %c0_47 = arith.constant 0 : index
    %c0_48 = arith.constant 0 : index
    %c0_49 = arith.constant 0 : index
    %67 = vector.load %arg11[%c0_46, %c0_47, %c0_48, %c0_49] : memref<2x4x8x32xf32, #tpu.memory_space<vmem>>, vector<1x4x8x32xf32>
    %68 = vector.shape_cast %67 : vector<1x4x8x32xf32> to vector<4x8x32xf32>
    "tpu.trace_start"() <{level = 10 : i32, message = "hqf,hfd->hqd"}> : () -> ()
    %cst_50 = arith.constant dense<0.000000e+00> : vector<4x8x32xf32>
    %69 = tpu.matmul %66, %68, %cst_50 {dimension_numbers = #tpu.dot_dimension_numbers<[2], [1], [1], [2], [0, 0, 0, 1, 1, 2], [0], [0]>} : vector<4x8x8xf32>, vector<4x8x32xf32>, vector<4x8x32xf32> -> vector<4x8x32xf32>
    "tpu.trace_stop"() : () -> ()
    %cst_51 = arith.constant dense<0.000000e+00> : vector<8x32xf32>
    %70 = vector.multi_reduction <add>, %69, %cst_51 [0] : vector<4x8x32xf32> to vector<8x32xf32>
    %71 = arith.addf %1, %70 : vector<8x32xf32>
    %c0_52 = arith.constant 0 : index
    %c0_53 = arith.constant 0 : index
    %c0_54 = arith.constant 0 : index
    %72 = vector.load %arg12[%c0_52, %c0_53, %c0_54] : memref<2x1x32xf32, #tpu.memory_space<vmem>>, vector<1x1x32xf32>
    %73 = vector.shape_cast %72 : vector<1x1x32xf32> to vector<1x32xf32>
    %74 = vector.broadcast %73 : vector<1x32xf32> to vector<8x32xf32>
    %75 = arith.addf %71, %74 : vector<8x32xf32>
    %c0_55 = arith.constant 0 : index
    %c0_56 = arith.constant 0 : index
    %c0_57 = arith.constant 0 : index
    %76 = vector.load %arg13[%c0_55, %c0_56, %c0_57] : memref<2x1x32xf32, #tpu.memory_space<vmem>>, vector<1x1x32xf32>
    %77 = vector.shape_cast %76 : vector<1x1x32xf32> to vector<1x32xf32>
    %c0_58 = arith.constant 0 : index
    %c0_59 = arith.constant 0 : index
    %c0_60 = arith.constant 0 : index
    %78 = vector.load %arg14[%c0_58, %c0_59, %c0_60] : memref<2x1x32xf32, #tpu.memory_space<vmem>>, vector<1x1x32xf32>
    %79 = vector.shape_cast %78 : vector<1x1x32xf32> to vector<1x32xf32>
    %cst_61 = arith.constant dense<0.000000e+00> : vector<8xf32>
    %80 = vector.multi_reduction <add>, %75, %cst_61 [1] : vector<8x32xf32> to vector<8xf32>
    %81 = vector.shape_cast %80 : vector<8xf32> to vector<8x1xf32>
    %cst_62 = arith.constant 3.200000e+01 : f32
    %82 = vector.broadcast %cst_62 : f32 to vector<8x1xf32>
    %83 = arith.divf %81, %82 : vector<8x1xf32>
    %84 = vector.broadcast %83 : vector<8x1xf32> to vector<8x32xf32>
    %85 = arith.subf %75, %84 : vector<8x32xf32>
    %86 = arith.mulf %85, %85 : vector<8x32xf32>
    %cst_63 = arith.constant dense<0.000000e+00> : vector<8xf32>
    %87 = vector.multi_reduction <add>, %86, %cst_63 [1] : vector<8x32xf32> to vector<8xf32>
    %88 = vector.shape_cast %87 : vector<8xf32> to vector<8x1xf32>
    %cst_64 = arith.constant 3.200000e+01 : f32
    %89 = vector.broadcast %cst_64 : f32 to vector<8x1xf32>
    %90 = arith.divf %88, %89 : vector<8x1xf32>
    %91 = vector.broadcast %83 : vector<8x1xf32> to vector<8x32xf32>
    %92 = arith.subf %75, %91 : vector<8x32xf32>
    %cst_65 = arith.constant 9.99999974E-6 : f32
    %93 = vector.broadcast %cst_65 : f32 to vector<8x1xf32>
    %94 = arith.addf %90, %93 : vector<8x1xf32>
    %95 = math.rsqrt %94 : vector<8x1xf32>
    %96 = vector.broadcast %95 : vector<8x1xf32> to vector<8x32xf32>
    %97 = arith.mulf %92, %96 : vector<8x32xf32>
    %98 = vector.broadcast %77 : vector<1x32xf32> to vector<8x32xf32>
    %99 = arith.mulf %97, %98 : vector<8x32xf32>
    %100 = vector.broadcast %79 : vector<1x32xf32> to vector<8x32xf32>
    %101 = arith.addf %99, %100 : vector<8x32xf32>
    %c0_66 = arith.constant 0 : index
    %c0_67 = arith.constant 0 : index
    %c0_68 = arith.constant 0 : index
    %102 = vector.load %arg15[%c0_66, %c0_67, %c0_68] : memref<2x32x256xf32, #tpu.memory_space<vmem>>, vector<1x32x256xf32>
    %103 = vector.shape_cast %102 : vector<1x32x256xf32> to vector<32x256xf32>
    %cst_69 = arith.constant dense<0.000000e+00> : vector<8x256xf32>
    %104 = tpu.matmul %101, %103, %cst_69 {dimension_numbers = #tpu.dot_dimension_numbers<[1], [0], [0], [1], [0, 0, 1, 1], [], []>} : vector<8x32xf32>, vector<32x256xf32>, vector<8x256xf32> -> vector<8x256xf32>
    %c0_70 = arith.constant 0 : index
    %c0_71 = arith.constant 0 : index
    %c0_72 = arith.constant 0 : index
    %105 = vector.load %arg16[%c0_70, %c0_71, %c0_72] : memref<2x1x256xf32, #tpu.memory_space<vmem>>, vector<1x1x256xf32>
    %106 = vector.shape_cast %105 : vector<1x1x256xf32> to vector<1x256xf32>
    %107 = vector.broadcast %106 : vector<1x256xf32> to vector<8x256xf32>
    %108 = arith.addf %104, %107 : vector<8x256xf32>
    %c0_73 = arith.constant 0 : index
    %c0_74 = arith.constant 0 : index
    %109 = memref.load %arg19[%c0_73, %c0_74] : memref<2x2xf32, #tpu.memory_space<smem>>
    %c0_75 = arith.constant 0 : index
    %c1 = arith.constant 1 : index
    %110 = memref.load %arg19[%c0_75, %c1] : memref<2x2xf32, #tpu.memory_space<smem>>
    %111 = vector.broadcast %110 : f32 to vector<8x256xf32>
    %112 = arith.addf %108, %111 : vector<8x256xf32>
    %113 = math.sin %112 : vector<8x256xf32>
    %114 = vector.broadcast %109 : f32 to vector<8x256xf32>
    %115 = arith.mulf %114, %113 : vector<8x256xf32>
    %c0_76 = arith.constant 0 : index
    %c0_77 = arith.constant 0 : index
    %c0_78 = arith.constant 0 : index
    %116 = vector.load %arg17[%c0_76, %c0_77, %c0_78] : memref<2x256x32xf32, #tpu.memory_space<vmem>>, vector<1x256x32xf32>
    %117 = vector.shape_cast %116 : vector<1x256x32xf32> to vector<256x32xf32>
    %cst_79 = arith.constant dense<0.000000e+00> : vector<8x32xf32>
    %118 = tpu.matmul %115, %117, %cst_79 {dimension_numbers = #tpu.dot_dimension_numbers<[1], [0], [0], [1], [0, 0, 1, 1], [], []>} : vector<8x256xf32>, vector<256x32xf32>, vector<8x32xf32> -> vector<8x32xf32>
    %c0_80 = arith.constant 0 : index
    %c0_81 = arith.constant 0 : index
    %c0_82 = arith.constant 0 : index
    %119 = vector.load %arg18[%c0_80, %c0_81, %c0_82] : memref<2x1x32xf32, #tpu.memory_space<vmem>>, vector<1x1x32xf32>
    %120 = vector.shape_cast %119 : vector<1x1x32xf32> to vector<1x32xf32>
    %121 = vector.broadcast %120 : vector<1x32xf32> to vector<8x32xf32>
    %122 = arith.addf %118, %121 : vector<8x32xf32>
    %123 = arith.addf %75, %122 : vector<8x32xf32>
    %c1_83 = arith.constant 1 : index
    %c0_84 = arith.constant 0 : index
    %c0_85 = arith.constant 0 : index
    %124 = vector.load %arg3[%c1_83, %c0_84, %c0_85] : memref<2x1x32xf32, #tpu.memory_space<vmem>>, vector<1x1x32xf32>
    %125 = vector.shape_cast %124 : vector<1x1x32xf32> to vector<1x32xf32>
    %c1_86 = arith.constant 1 : index
    %c0_87 = arith.constant 0 : index
    %c0_88 = arith.constant 0 : index
    %126 = vector.load %arg4[%c1_86, %c0_87, %c0_88] : memref<2x1x32xf32, #tpu.memory_space<vmem>>, vector<1x1x32xf32>
    %127 = vector.shape_cast %126 : vector<1x1x32xf32> to vector<1x32xf32>
    %cst_89 = arith.constant dense<0.000000e+00> : vector<8xf32>
    %128 = vector.multi_reduction <add>, %123, %cst_89 [1] : vector<8x32xf32> to vector<8xf32>
    %129 = vector.shape_cast %128 : vector<8xf32> to vector<8x1xf32>
    %cst_90 = arith.constant 3.200000e+01 : f32
    %130 = vector.broadcast %cst_90 : f32 to vector<8x1xf32>
    %131 = arith.divf %129, %130 : vector<8x1xf32>
    %132 = vector.broadcast %131 : vector<8x1xf32> to vector<8x32xf32>
    %133 = arith.subf %123, %132 : vector<8x32xf32>
    %134 = arith.mulf %133, %133 : vector<8x32xf32>
    %cst_91 = arith.constant dense<0.000000e+00> : vector<8xf32>
    %135 = vector.multi_reduction <add>, %134, %cst_91 [1] : vector<8x32xf32> to vector<8xf32>
    %136 = vector.shape_cast %135 : vector<8xf32> to vector<8x1xf32>
    %cst_92 = arith.constant 3.200000e+01 : f32
    %137 = vector.broadcast %cst_92 : f32 to vector<8x1xf32>
    %138 = arith.divf %136, %137 : vector<8x1xf32>
    %139 = vector.broadcast %131 : vector<8x1xf32> to vector<8x32xf32>
    %140 = arith.subf %123, %139 : vector<8x32xf32>
    %cst_93 = arith.constant 9.99999974E-6 : f32
    %141 = vector.broadcast %cst_93 : f32 to vector<8x1xf32>
    %142 = arith.addf %138, %141 : vector<8x1xf32>
    %143 = math.rsqrt %142 : vector<8x1xf32>
    %144 = vector.broadcast %143 : vector<8x1xf32> to vector<8x32xf32>
    %145 = arith.mulf %140, %144 : vector<8x32xf32>
    %146 = vector.broadcast %125 : vector<1x32xf32> to vector<8x32xf32>
    %147 = arith.mulf %145, %146 : vector<8x32xf32>
    %148 = vector.broadcast %127 : vector<1x32xf32> to vector<8x32xf32>
    %149 = arith.addf %147, %148 : vector<8x32xf32>
    %150 = vector.shape_cast %149 : vector<8x32xf32> to vector<1x8x32xf32>
    %151 = vector.broadcast %150 : vector<1x8x32xf32> to vector<4x8x32xf32>
    %c1_94 = arith.constant 1 : index
    %c0_95 = arith.constant 0 : index
    %c0_96 = arith.constant 0 : index
    %c0_97 = arith.constant 0 : index
    %152 = vector.load %arg5[%c1_94, %c0_95, %c0_96, %c0_97] : memref<2x4x32x8xf32, #tpu.memory_space<vmem>>, vector<1x4x32x8xf32>
    %153 = vector.shape_cast %152 : vector<1x4x32x8xf32> to vector<4x32x8xf32>
    "tpu.trace_start"() <{level = 10 : i32, message = "hsd,hdf->hsf"}> : () -> ()
    %cst_98 = arith.constant dense<0.000000e+00> : vector<4x8x8xf32>
    %154 = tpu.matmul %151, %153, %cst_98 {dimension_numbers = #tpu.dot_dimension_numbers<[2], [1], [1], [2], [0, 0, 0, 1, 1, 2], [0], [0]>} : vector<4x8x32xf32>, vector<4x32x8xf32>, vector<4x8x8xf32> -> vector<4x8x8xf32>
    "tpu.trace_stop"() : () -> ()
    %c1_99 = arith.constant 1 : index
    %c0_100 = arith.constant 0 : index
    %c0_101 = arith.constant 0 : index
    %c0_102 = arith.constant 0 : index
    %155 = vector.load %arg8[%c1_99, %c0_100, %c0_101, %c0_102] : memref<2x4x1x8xf32, #tpu.memory_space<vmem>>, vector<1x4x1x8xf32>
    %156 = vector.shape_cast %155 : vector<1x4x1x8xf32> to vector<4x1x8xf32>
    %157 = vector.broadcast %156 : vector<4x1x8xf32> to vector<4x8x8xf32>
    %158 = arith.addf %154, %157 : vector<4x8x8xf32>
    %c1_103 = arith.constant 1 : index
    %c0_104 = arith.constant 0 : index
    %c0_105 = arith.constant 0 : index
    %c0_106 = arith.constant 0 : index
    %159 = vector.load %arg6[%c1_103, %c0_104, %c0_105, %c0_106] : memref<2x4x32x8xf32, #tpu.memory_space<vmem>>, vector<1x4x32x8xf32>
    %160 = vector.shape_cast %159 : vector<1x4x32x8xf32> to vector<4x32x8xf32>
    "tpu.trace_start"() <{level = 10 : i32, message = "hsd,hdf->hsf"}> : () -> ()
    %cst_107 = arith.constant dense<0.000000e+00> : vector<4x8x8xf32>
    %161 = tpu.matmul %151, %160, %cst_107 {dimension_numbers = #tpu.dot_dimension_numbers<[2], [1], [1], [2], [0, 0, 0, 1, 1, 2], [0], [0]>} : vector<4x8x32xf32>, vector<4x32x8xf32>, vector<4x8x8xf32> -> vector<4x8x8xf32>
    "tpu.trace_stop"() : () -> ()
    %c1_108 = arith.constant 1 : index
    %c0_109 = arith.constant 0 : index
    %c0_110 = arith.constant 0 : index
    %c0_111 = arith.constant 0 : index
    %162 = vector.load %arg9[%c1_108, %c0_109, %c0_110, %c0_111] : memref<2x4x1x8xf32, #tpu.memory_space<vmem>>, vector<1x4x1x8xf32>
    %163 = vector.shape_cast %162 : vector<1x4x1x8xf32> to vector<4x1x8xf32>
    %164 = vector.broadcast %163 : vector<4x1x8xf32> to vector<4x8x8xf32>
    %165 = arith.addf %161, %164 : vector<4x8x8xf32>
    %c1_112 = arith.constant 1 : index
    %c0_113 = arith.constant 0 : index
    %c0_114 = arith.constant 0 : index
    %c0_115 = arith.constant 0 : index
    %166 = vector.load %arg7[%c1_112, %c0_113, %c0_114, %c0_115] : memref<2x4x32x8xf32, #tpu.memory_space<vmem>>, vector<1x4x32x8xf32>
    %167 = vector.shape_cast %166 : vector<1x4x32x8xf32> to vector<4x32x8xf32>
    "tpu.trace_start"() <{level = 10 : i32, message = "hsd,hdf->hsf"}> : () -> ()
    %cst_116 = arith.constant dense<0.000000e+00> : vector<4x8x8xf32>
    %168 = tpu.matmul %151, %167, %cst_116 {dimension_numbers = #tpu.dot_dimension_numbers<[2], [1], [1], [2], [0, 0, 0, 1, 1, 2], [0], [0]>} : vector<4x8x32xf32>, vector<4x32x8xf32>, vector<4x8x8xf32> -> vector<4x8x8xf32>
    "tpu.trace_stop"() : () -> ()
    %c1_117 = arith.constant 1 : index
    %c0_118 = arith.constant 0 : index
    %c0_119 = arith.constant 0 : index
    %c0_120 = arith.constant 0 : index
    %169 = vector.load %arg10[%c1_117, %c0_118, %c0_119, %c0_120] : memref<2x4x1x8xf32, #tpu.memory_space<vmem>>, vector<1x4x1x8xf32>
    %170 = vector.shape_cast %169 : vector<1x4x1x8xf32> to vector<4x1x8xf32>
    %171 = vector.broadcast %170 : vector<4x1x8xf32> to vector<4x8x8xf32>
    %172 = arith.addf %168, %171 : vector<4x8x8xf32>
    "tpu.trace_start"() <{level = 10 : i32, message = "hqf,hkf->hqk"}> : () -> ()
    %cst_121 = arith.constant dense<0.000000e+00> : vector<4x8x8xf32>
    %173 = tpu.matmul %158, %165, %cst_121 {dimension_numbers = #tpu.dot_dimension_numbers<[2], [2], [1], [1], [0, 0, 0, 1, 1, 1], [0], [0]>} : vector<4x8x8xf32>, vector<4x8x8xf32>, vector<4x8x8xf32> -> vector<4x8x8xf32>
    "tpu.trace_stop"() : () -> ()
    %174 = vector.shape_cast %3 : vector<1x8xf32> to vector<1x1x8xf32>
    %175 = vector.broadcast %174 : vector<1x1x8xf32> to vector<4x8x8xf32>
    %176 = arith.addf %173, %175 : vector<4x8x8xf32>
    %cst_122 = arith.constant dense<0xFF800000> : vector<4x8xf32>
    %177 = vector.multi_reduction <maximumf>, %176, %cst_122 [2] : vector<4x8x8xf32> to vector<4x8xf32>
    %178 = vector.shape_cast %177 : vector<4x8xf32> to vector<4x8x1xf32>
    %179 = vector.broadcast %178 : vector<4x8x1xf32> to vector<4x8x8xf32>
    %180 = arith.subf %176, %179 : vector<4x8x8xf32>
    %181 = math.exp %180 : vector<4x8x8xf32>
    %cst_123 = arith.constant dense<0.000000e+00> : vector<4x8xf32>
    %182 = vector.multi_reduction <add>, %181, %cst_123 [2] : vector<4x8x8xf32> to vector<4x8xf32>
    %183 = vector.shape_cast %182 : vector<4x8xf32> to vector<4x8x1xf32>
    %184 = vector.broadcast %183 : vector<4x8x1xf32> to vector<4x8x8xf32>
    %185 = arith.divf %181, %184 : vector<4x8x8xf32>
    "tpu.trace_start"() <{level = 10 : i32, message = "hqk,hkf->hqf"}> : () -> ()
    %cst_124 = arith.constant dense<0.000000e+00> : vector<4x8x8xf32>
    %186 = tpu.matmul %185, %172, %cst_124 {dimension_numbers = #tpu.dot_dimension_numbers<[2], [1], [1], [2], [0, 0, 0, 1, 1, 2], [0], [0]>} : vector<4x8x8xf32>, vector<4x8x8xf32>, vector<4x8x8xf32> -> vector<4x8x8xf32>
    "tpu.trace_stop"() : () -> ()
    %c1_125 = arith.constant 1 : index
    %c0_126 = arith.constant 0 : index
    %c0_127 = arith.constant 0 : index
    %c0_128 = arith.constant 0 : index
    %187 = vector.load %arg11[%c1_125, %c0_126, %c0_127, %c0_128] : memref<2x4x8x32xf32, #tpu.memory_space<vmem>>, vector<1x4x8x32xf32>
    %188 = vector.shape_cast %187 : vector<1x4x8x32xf32> to vector<4x8x32xf32>
    "tpu.trace_start"() <{level = 10 : i32, message = "hqf,hfd->hqd"}> : () -> ()
    %cst_129 = arith.constant dense<0.000000e+00> : vector<4x8x32xf32>
    %189 = tpu.matmul %186, %188, %cst_129 {dimension_numbers = #tpu.dot_dimension_numbers<[2], [1], [1], [2], [0, 0, 0, 1, 1, 2], [0], [0]>} : vector<4x8x8xf32>, vector<4x8x32xf32>, vector<4x8x32xf32> -> vector<4x8x32xf32>
    "tpu.trace_stop"() : () -> ()
    %cst_130 = arith.constant dense<0.000000e+00> : vector<8x32xf32>
    %190 = vector.multi_reduction <add>, %189, %cst_130 [0] : vector<4x8x32xf32> to vector<8x32xf32>
    %191 = arith.addf %123, %190 : vector<8x32xf32>
    %c1_131 = arith.constant 1 : index
    %c0_132 = arith.constant 0 : index
    %c0_133 = arith.constant 0 : index
    %192 = vector.load %arg12[%c1_131, %c0_132, %c0_133] : memref<2x1x32xf32, #tpu.memory_space<vmem>>, vector<1x1x32xf32>
    %193 = vector.shape_cast %192 : vector<1x1x32xf32> to vector<1x32xf32>
    %194 = vector.broadcast %193 : vector<1x32xf32> to vector<8x32xf32>
    %195 = arith.addf %191, %194 : vector<8x32xf32>
    %c1_134 = arith.constant 1 : index
    %c0_135 = arith.constant 0 : index
    %c0_136 = arith.constant 0 : index
    %196 = vector.load %arg13[%c1_134, %c0_135, %c0_136] : memref<2x1x32xf32, #tpu.memory_space<vmem>>, vector<1x1x32xf32>
    %197 = vector.shape_cast %196 : vector<1x1x32xf32> to vector<1x32xf32>
    %c1_137 = arith.constant 1 : index
    %c0_138 = arith.constant 0 : index
    %c0_139 = arith.constant 0 : index
    %198 = vector.load %arg14[%c1_137, %c0_138, %c0_139] : memref<2x1x32xf32, #tpu.memory_space<vmem>>, vector<1x1x32xf32>
    %199 = vector.shape_cast %198 : vector<1x1x32xf32> to vector<1x32xf32>
    %cst_140 = arith.constant dense<0.000000e+00> : vector<8xf32>
    %200 = vector.multi_reduction <add>, %195, %cst_140 [1] : vector<8x32xf32> to vector<8xf32>
    %201 = vector.shape_cast %200 : vector<8xf32> to vector<8x1xf32>
    %cst_141 = arith.constant 3.200000e+01 : f32
    %202 = vector.broadcast %cst_141 : f32 to vector<8x1xf32>
    %203 = arith.divf %201, %202 : vector<8x1xf32>
    %204 = vector.broadcast %203 : vector<8x1xf32> to vector<8x32xf32>
    %205 = arith.subf %195, %204 : vector<8x32xf32>
    %206 = arith.mulf %205, %205 : vector<8x32xf32>
    %cst_142 = arith.constant dense<0.000000e+00> : vector<8xf32>
    %207 = vector.multi_reduction <add>, %206, %cst_142 [1] : vector<8x32xf32> to vector<8xf32>
    %208 = vector.shape_cast %207 : vector<8xf32> to vector<8x1xf32>
    %cst_143 = arith.constant 3.200000e+01 : f32
    %209 = vector.broadcast %cst_143 : f32 to vector<8x1xf32>
    %210 = arith.divf %208, %209 : vector<8x1xf32>
    %211 = vector.broadcast %203 : vector<8x1xf32> to vector<8x32xf32>
    %212 = arith.subf %195, %211 : vector<8x32xf32>
    %cst_144 = arith.constant 9.99999974E-6 : f32
    %213 = vector.broadcast %cst_144 : f32 to vector<8x1xf32>
    %214 = arith.addf %210, %213 : vector<8x1xf32>
    %215 = math.rsqrt %214 : vector<8x1xf32>
    %216 = vector.broadcast %215 : vector<8x1xf32> to vector<8x32xf32>
    %217 = arith.mulf %212, %216 : vector<8x32xf32>
    %218 = vector.broadcast %197 : vector<1x32xf32> to vector<8x32xf32>
    %219 = arith.mulf %217, %218 : vector<8x32xf32>
    %220 = vector.broadcast %199 : vector<1x32xf32> to vector<8x32xf32>
    %221 = arith.addf %219, %220 : vector<8x32xf32>
    %c1_145 = arith.constant 1 : index
    %c0_146 = arith.constant 0 : index
    %c0_147 = arith.constant 0 : index
    %222 = vector.load %arg15[%c1_145, %c0_146, %c0_147] : memref<2x32x256xf32, #tpu.memory_space<vmem>>, vector<1x32x256xf32>
    %223 = vector.shape_cast %222 : vector<1x32x256xf32> to vector<32x256xf32>
    %cst_148 = arith.constant dense<0.000000e+00> : vector<8x256xf32>
    %224 = tpu.matmul %221, %223, %cst_148 {dimension_numbers = #tpu.dot_dimension_numbers<[1], [0], [0], [1], [0, 0, 1, 1], [], []>} : vector<8x32xf32>, vector<32x256xf32>, vector<8x256xf32> -> vector<8x256xf32>
    %c1_149 = arith.constant 1 : index
    %c0_150 = arith.constant 0 : index
    %c0_151 = arith.constant 0 : index
    %225 = vector.load %arg16[%c1_149, %c0_150, %c0_151] : memref<2x1x256xf32, #tpu.memory_space<vmem>>, vector<1x1x256xf32>
    %226 = vector.shape_cast %225 : vector<1x1x256xf32> to vector<1x256xf32>
    %227 = vector.broadcast %226 : vector<1x256xf32> to vector<8x256xf32>
    %228 = arith.addf %224, %227 : vector<8x256xf32>
    %c1_152 = arith.constant 1 : index
    %c0_153 = arith.constant 0 : index
    %229 = memref.load %arg19[%c1_152, %c0_153] : memref<2x2xf32, #tpu.memory_space<smem>>
    %c1_154 = arith.constant 1 : index
    %c1_155 = arith.constant 1 : index
    %230 = memref.load %arg19[%c1_154, %c1_155] : memref<2x2xf32, #tpu.memory_space<smem>>
    %231 = vector.broadcast %230 : f32 to vector<8x256xf32>
    %232 = arith.addf %228, %231 : vector<8x256xf32>
    %233 = math.sin %232 : vector<8x256xf32>
    %234 = vector.broadcast %229 : f32 to vector<8x256xf32>
    %235 = arith.mulf %234, %233 : vector<8x256xf32>
    %c1_156 = arith.constant 1 : index
    %c0_157 = arith.constant 0 : index
    %c0_158 = arith.constant 0 : index
    %236 = vector.load %arg17[%c1_156, %c0_157, %c0_158] : memref<2x256x32xf32, #tpu.memory_space<vmem>>, vector<1x256x32xf32>
    %237 = vector.shape_cast %236 : vector<1x256x32xf32> to vector<256x32xf32>
    %cst_159 = arith.constant dense<0.000000e+00> : vector<8x32xf32>
    %238 = tpu.matmul %235, %237, %cst_159 {dimension_numbers = #tpu.dot_dimension_numbers<[1], [0], [0], [1], [0, 0, 1, 1], [], []>} : vector<8x256xf32>, vector<256x32xf32>, vector<8x32xf32> -> vector<8x32xf32>
    %c1_160 = arith.constant 1 : index
    %c0_161 = arith.constant 0 : index
    %c0_162 = arith.constant 0 : index
    %239 = vector.load %arg18[%c1_160, %c0_161, %c0_162] : memref<2x1x32xf32, #tpu.memory_space<vmem>>, vector<1x1x32xf32>
    %240 = vector.shape_cast %239 : vector<1x1x32xf32> to vector<1x32xf32>
    %241 = vector.broadcast %240 : vector<1x32xf32> to vector<8x32xf32>
    %242 = arith.addf %238, %241 : vector<8x32xf32>
    %243 = arith.addf %195, %242 : vector<8x32xf32>
    %c0_163 = arith.constant 0 : index
    %c0_164 = arith.constant 0 : index
    %c0_165 = arith.constant 0 : index
    %244 = vector.load %arg20[%c0_163, %c0_164, %c0_165] : memref<1x8x32xf32, #tpu.memory_space<vmem>>, vector<1x8x32xf32>
    %245 = vector.shape_cast %244 : vector<1x8x32xf32> to vector<8x32xf32>
    %246 = vector.shape_cast %243 : vector<8x32xf32> to vector<1x8x32xf32>
    tpu.vector_store %arg20[%c0_163, %c0_164, %c0_165], %246 {strides = array<i32>} : memref<1x8x32xf32, #tpu.memory_space<vmem>>, vector<1x8x32xf32>,
    return
  }
  func.func @transform_0(%arg0: i32) -> (i32, i32, i32) {
    %c0_i32 = arith.constant 0 : i32
    %c0_i32_0 = arith.constant 0 : i32
    %c0_i32_1 = arith.constant 0 : i32
    return %arg0, %c0_i32, %c0_i32_0 : i32, i32, i32
  }
  func.func @transform_1(%arg0: i32) -> (i32, i32, i32) {
    %c0_i32 = arith.constant 0 : i32
    %c0_i32_0 = arith.constant 0 : i32
    %c0_i32_1 = arith.constant 0 : i32
    return %arg0, %c0_i32, %c0_i32_0 : i32, i32, i32
  }
  func.func @transform_2(%arg0: i32) -> (i32, i32, i32) {
    %c0_i32 = arith.constant 0 : i32
    %c0_i32_0 = arith.constant 0 : i32
    %c0_i32_1 = arith.constant 0 : i32
    %c0_i32_2 = arith.constant 0 : i32
    return %c0_i32, %c0_i32_0, %c0_i32_1 : i32, i32, i32
  }
  func.func @transform_3(%arg0: i32) -> (i32, i32, i32) {
    %c0_i32 = arith.constant 0 : i32
    %c0_i32_0 = arith.constant 0 : i32
    %c0_i32_1 = arith.constant 0 : i32
    %c0_i32_2 = arith.constant 0 : i32
    return %c0_i32, %c0_i32_0, %c0_i32_1 : i32, i32, i32
  }
  func.func @transform_4(%arg0: i32) -> (i32, i32, i32, i32) {
    %c0_i32 = arith.constant 0 : i32
    %c0_i32_0 = arith.constant 0 : i32
    %c0_i32_1 = arith.constant 0 : i32
    %c0_i32_2 = arith.constant 0 : i32
    %c0_i32_3 = arith.constant 0 : i32
    return %c0_i32, %c0_i32_0, %c0_i32_1, %c0_i32_2 : i32, i32, i32, i32
  }
  func.func @transform_5(%arg0: i32) -> (i32, i32, i32, i32) {
    %c0_i32 = arith.constant 0 : i32
    %c0_i32_0 = arith.constant 0 : i32
    %c0_i32_1 = arith.constant 0 : i32
    %c0_i32_2 = arith.constant 0 : i32
    %c0_i32_3 = arith.constant 0 : i32
    return %c0_i32, %c0_i32_0, %c0_i32_1, %c0_i32_2 : i32, i32, i32, i32
  }
  func.func @transform_6(%arg0: i32) -> (i32, i32, i32, i32) {
    %c0_i32 = arith.constant 0 : i32
    %c0_i32_0 = arith.constant 0 : i32
    %c0_i32_1 = arith.constant 0 : i32
    %c0_i32_2 = arith.constant 0 : i32
    %c0_i32_3 = arith.constant 0 : i32
    return %c0_i32, %c0_i32_0, %c0_i32_1, %c0_i32_2 : i32, i32, i32, i32
  }
  func.func @transform_7(%arg0: i32) -> (i32, i32, i32, i32) {
    %c0_i32 = arith.constant 0 : i32
    %c0_i32_0 = arith.constant 0 : i32
    %c0_i32_1 = arith.constant 0 : i32
    %c0_i32_2 = arith.constant 0 : i32
    %c0_i32_3 = arith.constant 0 : i32
    return %c0_i32, %c0_i32_0, %c0_i32_1, %c0_i32_2 : i32, i32, i32, i32
  }
  func.func @transform_8(%arg0: i32) -> (i32, i32, i32, i32) {
    %c0_i32 = arith.constant 0 : i32
    %c0_i32_0 = arith.constant 0 : i32
    %c0_i32_1 = arith.constant 0 : i32
    %c0_i32_2 = arith.constant 0 : i32
    %c0_i32_3 = arith.constant 0 : i32
    return %c0_i32, %c0_i32_0, %c0_i32_1, %c0_i32_2 : i32, i32, i32, i32
  }
  func.func @transform_9(%arg0: i32) -> (i32, i32, i32, i32) {
    %c0_i32 = arith.constant 0 : i32
    %c0_i32_0 = arith.constant 0 : i32
    %c0_i32_1 = arith.constant 0 : i32
    %c0_i32_2 = arith.constant 0 : i32
    %c0_i32_3 = arith.constant 0 : i32
    return %c0_i32, %c0_i32_0, %c0_i32_1, %c0_i32_2 : i32, i32, i32, i32
  }
  func.func @transform_10(%arg0: i32) -> (i32, i32, i32, i32) {
    %c0_i32 = arith.constant 0 : i32
    %c0_i32_0 = arith.constant 0 : i32
    %c0_i32_1 = arith.constant 0 : i32
    %c0_i32_2 = arith.constant 0 : i32
    %c0_i32_3 = arith.constant 0 : i32
    return %c0_i32, %c0_i32_0, %c0_i32_1, %c0_i32_2 : i32, i32, i32, i32
  }
  func.func @transform_11(%arg0: i32) -> (i32, i32, i32) {
    %c0_i32 = arith.constant 0 : i32
    %c0_i32_0 = arith.constant 0 : i32
    %c0_i32_1 = arith.constant 0 : i32
    %c0_i32_2 = arith.constant 0 : i32
    return %c0_i32, %c0_i32_0, %c0_i32_1 : i32, i32, i32
  }
  func.func @transform_12(%arg0: i32) -> (i32, i32, i32) {
    %c0_i32 = arith.constant 0 : i32
    %c0_i32_0 = arith.constant 0 : i32
    %c0_i32_1 = arith.constant 0 : i32
    %c0_i32_2 = arith.constant 0 : i32
    return %c0_i32, %c0_i32_0, %c0_i32_1 : i32, i32, i32
  }
  func.func @transform_13(%arg0: i32) -> (i32, i32, i32) {
    %c0_i32 = arith.constant 0 : i32
    %c0_i32_0 = arith.constant 0 : i32
    %c0_i32_1 = arith.constant 0 : i32
    %c0_i32_2 = arith.constant 0 : i32
    return %c0_i32, %c0_i32_0, %c0_i32_1 : i32, i32, i32
  }
  func.func @transform_14(%arg0: i32) -> (i32, i32, i32) {
    %c0_i32 = arith.constant 0 : i32
    %c0_i32_0 = arith.constant 0 : i32
    %c0_i32_1 = arith.constant 0 : i32
    %c0_i32_2 = arith.constant 0 : i32
    return %c0_i32, %c0_i32_0, %c0_i32_1 : i32, i32, i32
  }
  func.func @transform_15(%arg0: i32) -> (i32, i32, i32) {
    %c0_i32 = arith.constant 0 : i32
    %c0_i32_0 = arith.constant 0 : i32
    %c0_i32_1 = arith.constant 0 : i32
    %c0_i32_2 = arith.constant 0 : i32
    return %c0_i32, %c0_i32_0, %c0_i32_1 : i32, i32, i32
  }
  func.func @transform_16(%arg0: i32) -> (i32, i32, i32) {
    %c0_i32 = arith.constant 0 : i32
    %c0_i32_0 = arith.constant 0 : i32
    %c0_i32_1 = arith.constant 0 : i32
    %c0_i32_2 = arith.constant 0 : i32
    return %c0_i32, %c0_i32_0, %c0_i32_1 : i32, i32, i32
  }
  func.func @transform_17(%arg0: i32) -> (i32, i32, i32) {
    %c0_i32 = arith.constant 0 : i32
    %c0_i32_0 = arith.constant 0 : i32
    %c0_i32_1 = arith.constant 0 : i32
    %c0_i32_2 = arith.constant 0 : i32
    return %c0_i32, %c0_i32_0, %c0_i32_1 : i32, i32, i32
  }
  func.func @transform_18(%arg0: i32) -> (i32, i32) {
    %c0_i32 = arith.constant 0 : i32
    %c0_i32_0 = arith.constant 0 : i32
    %c0_i32_1 = arith.constant 0 : i32
    return %c0_i32, %c0_i32_0 : i32, i32
  }
  func.func @transform_19(%arg0: i32) -> (i32, i32, i32) {
    %c0_i32 = arith.constant 0 : i32
    %c0_i32_0 = arith.constant 0 : i32
    %c0_i32_1 = arith.constant 0 : i32
    return %arg0, %c0_i32, %c0_i32_0 : i32, i32, i32
  }
}

</mosaic_0001>

<bundles_post_ra>
// kernel: tpu_custom_call.1
= control target key start
LH: loop header
LB: loop body
LE: loop exit
PB: predicated region body
PF: predicated region fallthrough
CT: control target
= control target key end

     0   :  { %s8260_s0 = inlined_call_operand.vmem [shape: f32[2,8,32], index: 0, kind: input, shape index: {}]   ;;  %s8261_s1 = inlined_call_operand.vmem [shape: f32[2,1,8], index: 1, kind: input, shape index: {}]   ;;  %s8262_s2 = inlined_call_operand.vmem [shape: f32[2,1,32], index: 2, kind: input, shape index: {}]   ;;  %s8263_s3 = inlined_call_operand.vmem [shape: f32[2,1,32], index: 3, kind: input, shape index: {}]   ;;  %s8264_s4 = inlined_call_operand.vmem [shape: f32[2,4,32,8], index: 4, kind: input, shape index: {}]   ;;  %s8265_s5 = inlined_call_operand.vmem [shape: f32[2,4,32,8], index: 5, kind: input, shape index: {}]   ;;  %s8266_s6 = inlined_call_operand.vmem [shape: f32[2,4,32,8], index: 6, kind: input, shape index: {}]   ;;  %s8267_s7 = inlined_call_operand.vmem [shape: f32[2,4,1,8], index: 7, kind: input, shape index: {}]   ;;  %s8268_s8 = inlined_call_operand.vmem [shape: f32[2,4,1,8], index: 8, kind: input, shape index: {}]   ;;  %s8269_s9 = inlined_call_operand.vmem [shape: f32[2,4,1,8], index: 9, kind: input, shape index: {}]   ;;  %s8270_s10 = inlined_call_operand.vmem [shape: f32[2,4,8,32], index: 10, kind: input, shape index: {}]   ;;  %s8271_s11 = inlined_call_operand.vmem [shape: f32[2,1,32], index: 11, kind: input, shape index: {}]   ;;  %s8272_s12 = inlined_call_operand.vmem [shape: f32[2,1,32], index: 12, kind: input, shape index: {}]   ;;  %s8273_s13 = inlined_call_operand.vmem [shape: f32[2,1,32], index: 13, kind: input, shape index: {}]   ;;  %s8274_s14 = inlined_call_operand.vmem [shape: f32[2,32,256], index: 14, kind: input, shape index: {}]   ;;  %s8275_s15 = inlined_call_operand.vmem [shape: f32[2,1,256], index: 15, kind: input, shape index: {}]   ;;  %s8276_s16 = inlined_call_operand.vmem [shape: f32[2,256,32], index: 16, kind: input, shape index: {}]   ;;  %s8277_s17 = inlined_call_operand.vmem [shape: f32[2,1,32], index: 17, kind: input, shape index: {}]   ;;  %s8278_s18 = inlined_call_operand.vmem [shape: f32[2,2], index: 18, kind: input, shape index: {}]   ;;  %s8279_s19 = inlined_call_operand.hbm [shape: f32[2,8,32], index: 19, kind: output, shape index: {}]  }
   0x1   :  { %8289 = sst [smem:[#allocation14_spill]] %s8260_s0 }
   0x2   :  { %8290 = sst [smem:[#allocation15_spill]] %s8261_s1 }
   0x3   :  { %8291 = sst [smem:[#allocation16_spill]] %s8262_s2 }
   0x4   :  { %8292 = sst [smem:[#allocation17_spill]] %s8263_s3 }
   0x5   :  { %8293 = sst [smem:[#allocation18_spill]] %s8278_s18 }
   0x6   :  { %8294 = sst [smem:[#allocation19_spill]] %s8279_s19 }
   0x7   :  { %24 = vsyncpa [#allocation4], 0 }
   0x8   :  { %25 = vsyncpa [#allocation3], 0 }
   0x9   :  { %27 = vsyncpa [#allocation3 + $0x1], 0  ;;  %s6967_s0 = smov 0   ;;  %s6969_s30 = smov 0  }
   0xa   :  { %s6971_s20 = smov 0   ;;  %s6973_s21 = smov 0  }
   0xb LB: > { %8295 = sst [smem:[#allocation8_spill]] %s6842_s0  ;;  %s6988_s1 = sadd.s32 4294967295, %s6854_s21   ;;  %s6854_s21 = sphi %s6973_s21, %s8313_s21   ;;  %s6850_s20 = sphi %s6971_s20, %s8315_s20   ;;  %s6846_s30 = sphi %s6969_s30, %s8317_s30   ;;  %s6842_s0 = sphi %s6967_s0, %s8316_s0  }
   0xc   : > { %8296 = sst [smem:[#allocation9_spill]] %s6850_s20  ;;  %s5558_s22 = sadd.s32 4294967294, %s6854_s21  }
   0xd   : > { %8297 = sst [smem:[#allocation10_spill]] %s6854_s21  ;;  %s6992_s2 = sadd.s32 1, %s6854_s21  }
   0xe   : > { %8298 = sst [smem:[#allocation11_spill]] %s6992_s2  ;;  %s449_s23 = sadd.s32 1, %s6850_s20 }
   0xf   : > { %s446_s24 = ssub.s32 %s6854_s21, %s6992_s2  ;;  %p459_p0 = scmp.ne.s32.totalorder %s6850_s20, %s6846_s30 }
  0x10   : > { %p447_p1 = scmp.eq.s32.totalorder %s446_s24, 0  ;;  %p460_p2 = scmp.eq.s32.totalorder %s6988_s1, 1 }
  0x11   : > { %p465_p3 = scmp.ne.s32.totalorder %s6846_s30, %s6842_s0  ;;  %p466_p4 = scmp.eq.s32.totalorder %s5558_s22, 1 }
  0x12   : > { %s7003_s25 = scalar_select %p447_p1, %s6850_s20, %s449_s23  }
  0x13   : > { %p7005_p5 = por %p460_p2, %p459_p0  ;;  %p7009_p6 = por %p466_p4, %p465_p3 }
  0x14   : > { %8299 = sst [smem:[#allocation12_spill]] %s7003_s25  ;;  %p5559_p7 = scmp.ge.s32.totalorder %s6854_s21, 1 }
  0x15   : > { %s8301_s26 = scalar_select %p7009_p6, 1, 0 }
  0x16   : > { %p473_p8 = scmp.lt.s32.totalorder %s6854_s21, 3  ;;  %p6671_p9 = scmp.eq.s32.totalorder %s6988_s1, 0 }
  0x17   : > { %8302 = sst [smem:[#allocation13_spill]] %s8301_s26  ;;  %s8304_s18 = sld [smem:[#allocation18_spill]] }
  0x18   : > { %p7016_p10 = pnand %p5559_p7, %p473_p8 }
  0x1a   : > { %p6663_p11 = pneg %p7016_p10 }
  0x1c   : > { %p6664_p12 = pnand %p6671_p9, %p6663_p11 }
  0x1d   : > { %s534_s22 = sshll.u32 %s8304_s18, 4  ;;  %s535_s22 = int_to_ptr.vmem [resolvable:$true] %s534_s22 }
  0x1e   : > { %s6773_s23 = scalar_lea.vmem %s535_s22, 32  ;;  %p6775_p0 = pneg %p6664_p12 }
  0x1f   : > { %p6774_p13 = scmp.ne.s32.totalorder %s535_s22, %s6773_s23  ;;  %p6781_p3 = scmp.lt.s32.totalorder %s535_s22, %s535_s22 }
  0x20   : > { %p6782_p4 = scmp.lt.s32.totalorder %s6773_s23, %s6773_s23 }
  0x21   : > { %p6776_p1 = pnand %p6775_p0, %p6774_p13 }
  0x22   : > { %p6783_p7 = por %p6782_p4, %p6781_p3 }
  0x23   : > { %p6777_p2 = pneg %p6776_p1 }
  0x25   : > { %p6784_p8 = pnand %p6783_p7, %p6777_p2 }
  0x27   : > { %6787 = shalt.err (!%p6784_p8)
}
  0x28   : > { %s6856_s24 = smov [#allocation2]   ;;  %560 = sbr.rel (%p7016_p10) target bundleno = 4805 (0x12c5), region = 96 }
  0x29   : > { %6666 = dma.vmem_to_smem (!%p6664_p12), %s535_s22, 32, %s6856_s24, [#allocation4]  }
  0x2f   : > { %6833 = dma.done.wait (%p6671_p9), [#allocation4], 32  }
  0x30   : > { %6835 = vsyncadd (%p6671_p9), [#allocation4], 4294967264 }
  0x31   : > { %566 = sfence }
  0x32   : > { %p619_p11 = scmp.lt.s32.totalorder %s6988_s1, 1  ;;  %vm630_vm0 = vcmask 261120   ;;  %s8305_s24 = sld [smem:[#allocation14_spill]]  ;;  %v659_v7 = vld [vmem:[%s8264_s4] sm:$0xff]  ;;  %v660_v8 = vld [vmem:[%s8264_s4 + $0x8] sm:$0xff]  ;;  %v6857_v12 = vmov 0.0|0.0  }
  0x33   : > { %v671_v9 = vld [vmem:[%s8264_s4 + $0x60] sm:$0xff]  ;;  %v6418_v10 = vpack.c.bf16 %v660_v8, %v659_v7  ;;  %v672_v11 = vld [vmem:[%s8264_s4 + $0x68] sm:$0xff]  ;;  %6417 = vmatprep.subr.bf16.mxu0 %v6857_v12  ;;  %6435 = vmatprep.subr.bf16.mxu1 %v6857_v12  ;;  %v661_v14 = vld [vmem:[%s8264_s4 + $0x10] sm:$0xff]  ;;  %vm6858_vm1 = vmmov 0   ;;  %v6859_v20 = vmov 0.0   ;;  %s8306_s23 = sld [smem:[#allocation16_spill]] }
  0x34   : > { %s7035_s28 = scalar_select %p619_p11, %s6988_s1, 1  ;;  %v6436_v13 = vpack.c.bf16 %v672_v11, %v671_v9  ;;  %v662_v15 = vld [vmem:[%s8264_s4 + $0x18] sm:$0xff]  ;;  %v673_v16 = vld [vmem:[%s8264_s4 + $0x70] sm:$0xff]  ;;  %6041 = vmatprep.mubr.msk.f32.mxu0 %vm6858_vm1, %v6859_v20  ;;  %6074 = vmatprep.mubr.msk.f32.mxu1 %vm6858_vm1, %v6859_v20  ;;  %v663_v26 = vld [vmem:[%s8264_s4 + $0x20] sm:$0xff]  ;;  %vm1640_vm2 = vcmask 64512  }
  0x35   : > { %6419 = vmatpush3.bf16.msra.mxu0 %v6418_v10  ;;  %v6421_v17 = vpack.c.bf16 %v662_v15, %v661_v14  ;;  %v674_v18 = vld [vmem:[%s8264_s4 + $0x78] sm:$0xff]  ;;  %v664_v28 = vld [vmem:[%s8264_s4 + $0x28] sm:$0xff]  ;;  %v990_v29 = vld [vmem:[%s8265_s5 + $0x20] sm:$0xff]  ;;  %s8307_s25 = sld [smem:[#allocation17_spill]]  ;;  %s5613_s18 = sld [smem:[#allocation2 + $0x1]] }
  0x36   : > { %s5565_s29 = sshll.u32 %s7035_s28, 3  ;;  %6437 = vmatpush3.bf16.msra.mxu1 %v6436_v13  ;;  %6420 = vmatprep.subr.bf16.mxu0 %v6857_v12  ;;  %v6439_v19 = vpack.c.bf16 %v674_v18, %v673_v16  ;;  %v991_v30 = vld [vmem:[%s8265_s5 + $0x28] sm:$0xff]  ;;  %v6424_v33 = vpack.c.bf16 %v664_v28, %v663_v26  ;;  %v665_v35 = vld [vmem:[%s8264_s4 + $0x30] sm:$0xff]  ;;  %v666_v37 = vld [vmem:[%s8264_s4 + $0x38] sm:$0xff]  ;;  %s2716_s22 = sld [smem:[#allocation2]] }
  0x37   : > { %6438 = vmatprep.subr.bf16.mxu1 %v6857_v12  ;;  %v6448_v34 = vpack.c.bf16 %v991_v30, %v990_v29  ;;  %v992_v38 = vld [vmem:[%s8265_s5 + $0x30] sm:$0xff]  ;;  %v993_v39 = vld [vmem:[%s8265_s5 + $0x38] sm:$0xff]  ;;  %v6427_v40 = vpack.c.bf16 %v666_v37, %v665_v35  ;;  %v667_v42 = vld [vmem:[%s8264_s4 + $0x40] sm:$0xff]  ;;  %s5747_s21 = sld [smem:[#allocation2 + $0x80]]  ;;  %s8309_s19 = sld [smem:[#allocation19_spill]] }
  0x38   : > { %s622_s27 = scalar_lea.vmem %s8305_s24, %s5565_s29  ;;  %v6451_v41 = vpack.c.bf16 %v993_v39, %v992_v38  ;;  %v668_v43 = vld [vmem:[%s8264_s4 + $0x48] sm:$0xff]  ;;  %v998_v44 = vld [vmem:[%s8265_s5 + $0x60] sm:$0xff]  ;;  %v669_v48 = vld [vmem:[%s8264_s4 + $0x50] sm:$0xff]  ;;  %s8308_s24 = sld [smem:[#allocation15_spill]] }
  0x39   : > { %v7041_v0 = vld [vmem:[%s622_s27] sm:$0xff]  ;;  %6422 = vmatpush3.bf16.msra.mxu0 %v6421_v17  ;;  %v999_v45 = vld [vmem:[%s8265_s5 + $0x68] sm:$0xff]  ;;  %v6430_v46 = vpack.c.bf16 %v668_v43, %v667_v42  ;;  %v670_v49 = vld [vmem:[%s8264_s4 + $0x58] sm:$0xff]  ;;  %s616_s27 = sand.u32 1, %s6846_s30  }
  0x3a   : > { %v631_v1 = vsel %vm630_vm0, %v7041_v0, 0.0  ;;  %6440 = vmatpush3.bf16.msra.mxu1 %v6439_v19  ;;  %6423 = vmatprep.subr.bf16.mxu0 %v6857_v12  ;;  %v5566_v25 = vld [vmem:[%s8306_s23] ss:$0 sm:$0xff]  ;;  %v6460_v47 = vpack.c.bf16 %v999_v45, %v998_v44  ;;  %v1000_v50 = vld [vmem:[%s8265_s5 + $0x70] sm:$0xff]  ;;  %v1001_v51 = vld [vmem:[%s8265_s5 + $0x78] sm:$0xff]  ;;  %v6433_v52 = vpack.c.bf16 %v670_v49, %v669_v48 }
  0x3b   : > { %632 = vadd.xlane.f32.xlu0 %v631_v1  ;;  %6447 = vmatprep.subr.bf16.mxu1 %v6857_v12  ;;  %v5567_v31 = vld [vmem:[%s8307_s25] ss:$0 sm:$0xff]  ;;  %v6463_v53 = vpack.c.bf16 %v1001_v51, %v1000_v50  ;;  %v987_v55 = vld [vmem:[%s8265_s5 + $0x8] sm:$0xff]  ;;  %v988_v60 = vld [vmem:[%s8265_s5 + $0x10] sm:$0xff] }
  0x3c   : > { %v986_v54 = vld [vmem:[%s8265_s5] sm:$0xff]  ;;  %v1315_v57 = vld [vmem:[%s8266_s6 + $0x28] sm:$0xff]  ;;  %v989_v61 = vld [vmem:[%s8265_s5 + $0x18] sm:$0xff] }
  0x3d   : > { %v1314_v56 = vld [vmem:[%s8266_s6 + $0x20] sm:$0xff]  ;;  %v6442_v58 = vpack.c.bf16 %v987_v55, %v986_v54  ;;  %v1316_v62 = vld [vmem:[%s8266_s6 + $0x30] sm:$0xff]  ;;  %v1317_v63 = vld [vmem:[%s8266_s6 + $0x38] sm:$0xff]  ;;  %v6445_v1 = vpack.c.bf16 %v989_v61, %v988_v60 }
  0x3e   : > { %v6472_v59 = vpack.c.bf16 %v1315_v57, %v1314_v56  ;;  %v996_v9 = vld [vmem:[%s8265_s5 + $0x50] sm:$0xff]  ;;  %v997_v10 = vld [vmem:[%s8265_s5 + $0x58] sm:$0xff]  ;;  %v1310_v16 = vld [vmem:[%s8266_s6] sm:$0xff]  ;;  %s7337_s0 = scalar_lea.vmem %s8308_s24, %s7035_s28  ;;  %s5748_s28 = sld [smem:[#allocation2 + $0x81]] }
  0x3f   : > { %v1324_v11 = vld [vmem:[%s8266_s6 + $0x70] sm:$0xff]  ;;  %v1325_v13 = vld [vmem:[%s8266_s6 + $0x78] sm:$0xff]  ;;  %v6457_v14 = vpack.c.bf16 %v997_v10, %v996_v9  ;;  %v1311_v17 = vld [vmem:[%s8266_s6 + $0x8] sm:$0xff] }
  0x40   : > { %v6487_v15 = vpack.c.bf16 %v1325_v13, %v1324_v11  ;;  %v6466_v18 = vpack.c.bf16 %v1311_v17, %v1310_v16  ;;  %v1312_v19 = vld [vmem:[%s8266_s6 + $0x10] sm:$0xff]  ;;  %v5579_v38 = vld [vmem:[%s8268_s8 + $0x3] ss:$0 sm:$0xff]  ;;  %v5576_v45 = vld [vmem:[%s8268_s8] ss:$0 sm:$0xff] }
  0x41   : > { %v1320_v26 = vld [vmem:[%s8266_s6 + $0x50] sm:$0xff]  ;;  %v5568_v49 = vld [vmem:[%s8267_s7] ss:$0 sm:$0xff]  ;;  %v5577_v54 = vld [vmem:[%s8268_s8 + $0x1] ss:$0 sm:$0xff] }
  0x42   : > { %v5569_v56 = vld [vmem:[%s8267_s7 + $0x1] ss:$0 sm:$0xff]  ;;  %v5592_v13 = vld [vmem:[%s7337_s0] ss:$0 sm:$0xff] }
  0xc8   : > { %v633_v2 = vpop.xlane.xlu0 %632 }
  0xc9   : > { %v635_v3 = vmul.f32 0.03125, %v633_v2  ;;  %v6475_v2 = vpack.c.bf16 %v1317_v63, %v1316_v62  ;;  %v5570_v62 = vld [vmem:[%s8267_s7 + $0x2] ss:$0 sm:$0xff] }
  0xcb   : > { %v636_v4 = vsub.f32 %v7041_v0, %v635_v3  ;;  %v994_v3 = vld [vmem:[%s8265_s5 + $0x40] sm:$0xff] }
  0xcd   : > { %v637_v5 = vmul.f32 %v636_v4, %v636_v4 }
  0xcf   : > { %v638_v6 = vsel %vm630_vm0, %v637_v5, 0.0  ;;  %v1322_v5 = vld [vmem:[%s8266_s6 + $0x60] sm:$0xff] }
  0xd0   : > { %639 = vadd.xlane.f32.xlu0 %v638_v6  ;;  %v1323_v6 = vld [vmem:[%s8266_s6 + $0x68] sm:$0xff] }
  0xd1   : > { %v6484_v8 = vpack.c.bf16 %v1323_v6, %v1322_v5 }
 0x15d   : > { %v640_v21 = vpop.xlane.xlu0 %639 }
 0x15e   : > { %v641_v22 = vmul.f32 0.03125, %v640_v21  ;;  %v1313_v21 = vld [vmem:[%s8266_s6 + $0x18] sm:$0xff] }
 0x160   : > { %v642_v23 = vadd.f32 1e-05, %v641_v22  ;;  %v6469_v22 = vpack.c.bf16 %v1313_v21, %v1312_v19 }
 0x162   : > { %6716 = vrsqrt.f32 %v642_v23  ;;  %v1318_v23 = vld [vmem:[%s8266_s6 + $0x40] sm:$0xff] }
 0x16c   : > { %v6717_v24 = vpop.eup %6716 }
 0x16d   : > { %v644_v27 = vmul.f32 %v6717_v24, %v636_v4  ;;  %v995_v4 = vld [vmem:[%s8265_s5 + $0x48] sm:$0xff] }
 0x16e   : > { %v6454_v7 = vpack.c.bf16 %v995_v4, %v994_v3  ;;  %v1319_v24 = vld [vmem:[%s8266_s6 + $0x48] sm:$0xff]  ;;  %v5584_v4 = vld [vmem:[%s8269_s9] ss:$0 sm:$0xff] }
 0x16f   : > { %v651_v32 = vmul.f32 %v5566_v25, %v644_v27  ;;  %v6478_v25 = vpack.c.bf16 %v1319_v24, %v1318_v23  ;;  %v1321_v27 = vld [vmem:[%s8266_s6 + $0x58] sm:$0xff] }
 0x170   : > { %v6481_v28 = vpack.c.bf16 %v1321_v27, %v1320_v26 }
 0x171   : > { %v7102_v36 = vadd.f32 %v5567_v31, %v651_v32 }
 0x173   : > { %6042 = vmatmul.mubr.msk.f32.vlgmr.msra.gmra.mrb[0].mxu0 %vm630_vm0, %v7102_v36  ;;  %6075 = vmatmul.mubr.msk.f32.vlgmr.msra.gmra.mrb[0].mxu1 %vm630_vm0, %v7102_v36 }
 0x174   : > { %6425 = vmatpush3.bf16.msra.mxu0 %v6424_v33  ;;  %6449 = vmatpush3.bf16.msra.mxu1 %v6448_v34 }
 0x175   : > { %6426 = vmatprep.subr.bf16.mxu0 %v6857_v12  ;;  %6450 = vmatprep.subr.bf16.mxu1 %v6857_v12 }
 0x176   : > { %6052 = vmatprep.mubr.msk.f32.mxu0 %vm6858_vm1, %v6859_v20  ;;  %6096 = vmatprep.mubr.msk.f32.mxu1 %vm6858_vm1, %v6859_v20 }
 0x178   : > { %6428 = vmatpush3.bf16.msra.mxu0 %v6427_v40  ;;  %6452 = vmatpush3.bf16.msra.mxu1 %v6451_v41 }
 0x179   : > { %6429 = vmatprep.subr.bf16.mxu0 %v6857_v12  ;;  %6459 = vmatprep.subr.bf16.mxu1 %v6857_v12 }
 0x17b   : > { %6053 = vmatmul.mubr.msk.f32.vlgmr.msra.gmra.mrb[2].mxu0 %vm630_vm0, %v7102_v36  ;;  %6097 = vmatmul.mubr.msk.f32.vlgmr.msra.gmra.mrb[2].mxu1 %vm630_vm0, %v7102_v36 }
 0x17c   : > { %6431 = vmatpush3.bf16.msra.mxu0 %v6430_v46  ;;  %6461 = vmatpush3.bf16.msra.mxu1 %v6460_v47  ;;  %v5585_v46 = vld [vmem:[%s8269_s9 + $0x1] ss:$0 sm:$0xff] }
 0x17d   : > { %6432 = vmatprep.subr.bf16.mxu0 %v6857_v12  ;;  %6462 = vmatprep.subr.bf16.mxu1 %v6857_v12 }
 0x17e   : > { %6063 = vmatprep.mubr.msk.f32.mxu0 %vm6858_vm1, %v6859_v20  ;;  %6118 = vmatprep.mubr.msk.f32.mxu1 %vm6858_vm1, %v6859_v20 }
 0x180   : > { %6434 = vmatpush3.bf16.msra.mxu0 %v6433_v52  ;;  %6464 = vmatpush3.bf16.msra.mxu1 %v6463_v53 }
 0x181   : > { %6441 = vmatprep.subr.bf16.mxu0 %v6857_v12  ;;  %6471 = vmatprep.subr.bf16.mxu1 %v6857_v12 }
 0x183   : > { %6064 = vmatmul.mubr.msk.f32.vlgmr.msra.gmra.mrb[4].mxu0 %vm630_vm0, %v7102_v36  ;;  %6119 = vmatmul.mubr.msk.f32.vlgmr.msra.gmra.mrb[4].mxu1 %vm630_vm0, %v7102_v36 }
 0x184   : > { %6443 = vmatpush3.bf16.msra.mxu0 %v6442_v58  ;;  %6473 = vmatpush3.bf16.msra.mxu1 %v6472_v59  ;;  %v5578_v58 = vld [vmem:[%s8268_s8 + $0x2] ss:$0 sm:$0xff] }
 0x185   : > { %6444 = vmatprep.subr.bf16.mxu0 %v6857_v12  ;;  %6474 = vmatprep.subr.bf16.mxu1 %v6857_v12 }
 0x186   : > { %6085 = vmatprep.mubr.msk.f32.mxu0 %vm6858_vm1, %v6859_v20  ;;  %6140 = vmatprep.mubr.msk.f32.mxu1 %vm6858_vm1, %v6859_v20 }
 0x188   : > { %6446 = vmatpush3.bf16.msra.mxu0 %v6445_v1  ;;  %6476 = vmatpush3.bf16.msra.mxu1 %v6475_v2 }
 0x189   : > { %6453 = vmatprep.subr.bf16.mxu0 %v6857_v12  ;;  %6483 = vmatprep.subr.bf16.mxu1 %v6857_v12 }
 0x18b   : > { %6086 = vmatmul.mubr.msk.f32.vlgmr.msra.gmra.mrb[6].mxu0 %vm630_vm0, %v7102_v36  ;;  %6141 = vmatmul.mubr.msk.f32.vlgmr.msra.gmra.mrb[6].mxu1 %vm630_vm0, %v7102_v36 }
 0x18c   : > { %6455 = vmatpush3.bf16.msra.mxu0 %v6454_v7  ;;  %6485 = vmatpush3.bf16.msra.mxu1 %v6484_v8 }
 0x18d   : > { %6456 = vmatprep.subr.bf16.mxu0 %v6857_v12  ;;  %6486 = vmatprep.subr.bf16.mxu1 %v6857_v12 }
 0x18e   : > { %6107 = vmatprep.mubr.msk.f32.mxu0 %vm6858_vm1, %v6859_v20  ;;  %6162 = vmatprep.mubr.msk.f32.mxu1 %vm6858_vm1, %v6859_v20 }
 0x190   : > { %6458 = vmatpush3.bf16.msra.mxu0 %v6457_v14  ;;  %6488 = vmatpush3.bf16.msra.mxu1 %v6487_v15 }
 0x191   : > { %6465 = vmatprep.subr.bf16.mxu0 %v6857_v12  ;;  %6180 = vmatprep.subr.mxu1 %v6859_v20 }
 0x193   : > { %6108 = vmatmul.mubr.msk.f32.vlgmr.msra.gmra.mrb[8].mxu0 %vm630_vm0, %v7102_v36  ;;  %6163 = vmatmul.mubr.msk.f32.vlgmr.msra.gmra.mrb[8].mxu1 %vm630_vm0, %v7102_v36 }
 0x194   : > { %6467 = vmatpush3.bf16.msra.mxu0 %v6466_v18  ;;  %6129 = vmatprep.mubr.msk.f32.mxu0 %vm6858_vm1, %v6859_v20 }
 0x195   : > { %6468 = vmatprep.subr.bf16.mxu0 %v6857_v12  ;;  %6182 = vmatprep.mubr.msk.f32.mxu1 %vm6858_vm1, %v6859_v20 }
 0x198   : > { %6470 = vmatpush3.bf16.msra.mxu0 %v6469_v22 }
 0x199   : > { %6477 = vmatprep.subr.bf16.mxu0 %v6857_v12 }
 0x19b   : > { %6130 = vmatmul.mubr.msk.f32.vlgmr.msra.gmra.mrb[10].mxu0 %vm630_vm0, %v7102_v36 }
 0x19c   : > { %6479 = vmatpush3.bf16.msra.mxu0 %v6478_v25  ;;  %6151 = vmatprep.mubr.msk.f32.mxu0 %vm6858_vm1, %v6859_v20 }
 0x19d   : > { %6480 = vmatprep.subr.bf16.mxu0 %v6857_v12 }
 0x1a0   : > { %6482 = vmatpush3.bf16.msra.mxu0 %v6481_v28 }
 0x1a1   : > { %6165 = vmatprep.subr.mxu0 %v6859_v20 }
 0x1a3   : > { %6152 = vmatmul.mubr.msk.f32.vlgmr.msra.gmra.mrb[12].mxu0 %vm630_vm0, %v7102_v36  ;;  %v5571_v36 = vld [vmem:[%s8267_s7 + $0x3] ss:$0 sm:$0xff] }
 0x1a4   : > { %6167 = vmatprep.mubr.msk.f32.mxu0 %vm6858_vm1, %v6859_v20 }
 0x246   : > { %v772_v29 = vpop.f32.mrb[0].mxu0  ;;  %v982_v30 = vpop.f32.mrb[0].mxu1 }
 0x247   : > { %v6043_v31 = vpop.f32.mrb[1].mxu0  ;;  %v6076_v32 = vpop.f32.mrb[1].mxu1  ;;  %v983_v44 = vadd.f32 %v5571_v36, %v982_v30  ;;  %v773_v55 = vadd.f32 %v5568_v49, %v772_v29 }
 0x24e   : > { %v842_v33 = vpop.f32.mrb[2].mxu0  ;;  %v1166_v34 = vpop.f32.mrb[2].mxu1 }
 0x24f   : > { %v6054_v35 = vpop.f32.mrb[3].mxu0  ;;  %v6098_v37 = vpop.f32.mrb[3].mxu1  ;;  %v1167_v57 = vadd.f32 %v5577_v54, %v1166_v34  ;;  %v843_v59 = vadd.f32 %v5569_v56, %v842_v33 }
 0x256   : > { %v912_v39 = vpop.f32.mrb[4].mxu0  ;;  %v1306_v40 = vpop.f32.mrb[4].mxu1 }
 0x257   : > { %v1307_v41 = vadd.f32 %v5579_v38, %v1306_v40  ;;  %v6065_v42 = vpop.f32.mrb[5].mxu0  ;;  %v6120_v43 = vpop.f32.mrb[5].mxu1  ;;  %v913_v3 = vadd.f32 %v5570_v62, %v912_v39 }
 0x259   : > { %6181 = vmatpush3.xpose.msk.msra.mxu1 %vm1640_vm2, %v1307_v41 }
 0x25a   : > { %6190 = vmatprep.subr.mxu1 %v6859_v20 }
 0x25c   : > { %6183 = vmatmul.mubr.msk.f32.vlgmr.msra.gmra.mrb[10].mxu1 %vm1640_vm2, %v983_v44 }
 0x25d   : > { %6192 = vmatprep.mubr.msk.f32.mxu1 %vm6858_vm1, %v6859_v20 }
 0x25e   : > { %v1096_v47 = vpop.f32.mrb[6].mxu0  ;;  %v1490_v48 = vpop.f32.mrb[6].mxu1 }
 0x25f   : > { %v1097_v50 = vadd.f32 %v5576_v45, %v1096_v47  ;;  %v1491_v51 = vadd.f32 %v5585_v46, %v1490_v48  ;;  %v6087_v52 = vpop.f32.mrb[7].mxu0  ;;  %v6142_v53 = vpop.f32.mrb[7].mxu1 }
 0x260   : > { %v5586_v53 = vld [vmem:[%s8269_s9 + $0x2] ss:$0 sm:$0xff] }
 0x261   : > { %6166 = vmatpush3.xpose.msk.msra.mxu0 %vm1640_vm2, %v1097_v50  ;;  %6191 = vmatpush3.msra.mxu1 %v1491_v51 }
 0x262   : > { %6170 = vmatprep.subr.mxu0 %v6859_v20  ;;  %6200 = vmatprep.subr.mxu1 %v6859_v20 }
 0x264   : > { %6168 = vmatmul.mubr.msk.f32.vlgmr.msra.gmra.mrb[14].mxu0 %vm1640_vm2, %v773_v55 }
 0x265   : > { %6171 = vmatpush3.xpose.msk.msra.mxu0 %vm1640_vm2, %v1167_v57  ;;  %6172 = vmatprep.mubr.msk.f32.mxu0 %vm6858_vm1, %v6859_v20  ;;  %v5587_v57 = vld [vmem:[%s8269_s9 + $0x3] ss:$0 sm:$0xff] }
 0x266   : > { %v1236_v60 = vpop.f32.mrb[8].mxu0  ;;  %v7313_v61 = vpop.f32.mrb[8].mxu1  ;;  %6175 = vmatprep.subr.mxu0 %v6859_v20 }
 0x267   : > { %v1237_v63 = vadd.f32 %v5578_v58, %v1236_v60  ;;  %v6109_v1 = vpop.f32.mrb[9].mxu0  ;;  %v6164_v2 = vpop.f32.mrb[9].mxu1  ;;  %v1631_v60 = vadd.f32 %v5587_v57, %v7313_v61  ;;  %v2281_v61 = vld [vmem:[%s8270_s10] sm:$0xff] }
 0x268   : > { %6173 = vmatmul.mubr.msk.f32.vlgmr.msra.gmra.mrb[16].mxu0 %vm1640_vm2, %v843_v59  ;;  %v5611_v57 = vld [vmem:[%s8273_s13] ss:$0 sm:$0xff] }
 0x269   : > { %6176 = vmatpush3.xpose.msk.msra.mxu0 %vm1640_vm2, %v1237_v63  ;;  %6177 = vmatprep.mubr.msk.f32.mxu0 %vm6858_vm1, %v6859_v20 }
 0x26a   : > { %6185 = vmatprep.subr.mxu0 %v6859_v20 }
 0x26c   : > { %6178 = vmatmul.mubr.msk.f32.vlgmr.msra.gmra.mrb[18].mxu0 %vm1640_vm2, %v913_v3  ;;  %v2282_v3 = vld [vmem:[%s8270_s10 + $0x8] sm:$0xff] }
 0x26d   : > { %6187 = vmatprep.mubr.msk.f32.mxu0 %vm6858_vm1, %v6859_v20 }
 0x26e   : > { %v1420_v5 = vpop.f32.mrb[10].mxu0 }
 0x26f   : > { %v1421_v6 = vadd.f32 %v5584_v4, %v1420_v5  ;;  %v6131_v7 = vpop.f32.mrb[11].mxu0  ;;  %v2283_v4 = vld [vmem:[%s8270_s10 + $0x10] sm:$0xff] }
 0x270   : > { %v2284_v7 = vld [vmem:[%s8270_s10 + $0x18] sm:$0xff] }
 0x271   : > { %6186 = vmatpush3.msra.mxu0 %v1421_v6 }
 0x272   : > { %6195 = vmatprep.subr.mxu0 %v6859_v20 }
 0x276   : > { %v7331_v8 = vpop.f32.mrb[12].mxu0 }
 0x277   : > { %v6153_v9 = vpop.f32.mrb[13].mxu0  ;;  %v1561_v56 = vadd.f32 %v5586_v53, %v7331_v8 }
 0x32f   : > { %v1941_v10 = vpop.f32.mrb[10].mxu1 }
 0x330   : > { %v6184_v11 = vpop.f32.mrb[11].mxu1  ;;  %v1942_v22 = vadd.f32 %v5592_v13, %v1941_v10 }
 0x332   : > { %v1954_v27 = vsel %vm1640_vm2, %v1942_v22, -inf }
 0x337   : > { %v1713_v14 = vpop.f32.mrb[14].mxu0 }
 0x338   : > { %v1714_v15 = vadd.f32 %v5592_v13, %v1713_v14  ;;  %v6169_v16 = vpop.f32.mrb[15].mxu0 }
 0x33a   : > { %v1945_v17 = vsel %vm1640_vm2, %v1714_v15, -inf }
 0x33b   : > { %1946 = vmax.xlane.f32.xlu1 %v1945_v17  ;;  %v1789_v18 = vpop.f32.mrb[16].mxu0 }
 0x33c   : > { %v1790_v19 = vadd.f32 %v5592_v13, %v1789_v18  ;;  %v6174_v21 = vpop.f32.mrb[17].mxu0 }
 0x33e   : > { %v1948_v23 = vsel %vm1640_vm2, %v1790_v19, -inf }
 0x33f   : > { %1949 = vmax.xlane.f32.xlu1 %v1948_v23  ;;  %v1865_v24 = vpop.f32.mrb[18].mxu0 }
 0x340   : > { %v1866_v25 = vadd.f32 %v5592_v13, %v1865_v24  ;;  %v6179_v26 = vpop.f32.mrb[19].mxu0 }
 0x342   : > { %v1951_v28 = vsel %vm1640_vm2, %v1866_v25, -inf }
 0x343   : > { %1955 = vmax.xlane.f32.xlu1 %v1954_v27  ;;  %1952 = vmax.xlane.f32.xlu0 %v1951_v28 }
 0x3c8   : > { %v1947_v29 = vpop.xlane.xlu1 %1946 }
 0x3c9   : > { %v1957_v30 = vsub.f32 %v1714_v15, %v1947_v29 }
 0x3cb   : > { %v1961_v31 = vmul.f32 1.442695, %v1957_v30 }
 0x3cc   : > { %v1950_v32 = vpop.xlane.xlu1 %1949 }
 0x3cd   : > { %6718 = vpow2.f32 %v1961_v31  ;;  %v1958_v33 = vsub.f32 %v1790_v19, %v1950_v32  ;;  %v5609_v31 = vld [vmem:[%s8271_s11] ss:$0 sm:$0xff] }
 0x3cf   : > { %v1963_v34 = vmul.f32 1.442695, %v1958_v33 }
 0x3d0   : > { %v1956_v35 = vpop.xlane.xlu1 %1955  ;;  %v1953_v37 = vpop.xlane.xlu0 %1952 }
 0x3d1   : > { %6720 = vpow2.f32 %v1963_v34  ;;  %v1960_v38 = vsub.f32 %v1942_v22, %v1956_v35  ;;  %v1959_v39 = vsub.f32 %v1866_v25, %v1953_v37 }
 0x3d3   : > { %v1967_v40 = vmul.f32 1.442695, %v1960_v38  ;;  %v1965_v36 = vmul.f32 1.442695, %v1959_v39 }
 0x3d5   : > { %6722 = vpow2.f32 %v1967_v40 }
 0x3d6   : > { %6724 = vpow2.f32 %v1965_v36  ;;  %v2623_v36 = vld [vmem:[%s8274_s14 + $0x8] sm:$0xff] }
 0x3d7   : > { %v6719_v41 = vpop.eup %6718 }
 0x3d8   : > { %v1969_v42 = vsel %vm1640_vm2, %v6719_v41, 0.0 }
 0x3d9   : > { %1970 = vadd.xlane.f32.xlu0 %v1969_v42  ;;  %v2622_v42 = vld [vmem:[%s8274_s14] sm:$0xff] }
 0x3db   : > { %v6721_v43 = vpop.eup %6720 }
 0x3dc   : > { %v1972_v44 = vsel %vm1640_vm2, %v6721_v43, 0.0 }
 0x3dd   : > { %1973 = vadd.xlane.f32.xlu1 %v1972_v44 }
 0x3df   : > { %v6723_v45 = vpop.eup %6722 }
 0x3e0   : > { %v6725_v46 = vpop.eup %6724  ;;  %v1978_v47 = vsel %vm1640_vm2, %v6723_v45, 0.0 }
 0x3e1   : > { %1979 = vadd.xlane.f32.xlu1 %v1978_v47  ;;  %v1975_v48 = vsel %vm1640_vm2, %v6725_v46, 0.0 }
 0x3e2   : > { %1976 = vadd.xlane.f32.xlu0 %v1975_v48  ;;  %v2626_v48 = vld [vmem:[%s8274_s14 + $0x20] sm:$0xff] }
 0x466   : > { %v1971_v49 = vpop.xlane.xlu0 %1970 }
 0x467   : > { %6726 = vrcp.f32 %v1971_v49  ;;  %v2628_v49 = vld [vmem:[%s8274_s14 + $0x30] sm:$0xff] }
 0x46a   : > { %v1974_v50 = vpop.xlane.xlu1 %1973 }
 0x46b   : > { %6728 = vrcp.f32 %v1974_v50  ;;  %v6495_v50 = vpack.c.bf16 %v2628_v49, %v2626_v48 }
 0x46e   : > { %v1980_v51 = vpop.xlane.xlu1 %1979 }
 0x46f   : > { %6730 = vrcp.f32 %v1980_v51  ;;  %v1977_v52 = vpop.xlane.xlu0 %1976 }
 0x470   : > { %6732 = vrcp.f32 %v1977_v52 }
 0x471   : > { %v6727_v54 = vpop.eup %6726 }
 0x472   : > { %v1982_v55 = vmul.f32 %v6727_v54, %v6719_v41 }
 0x474   : > { %6188 = vmatmul.mubr.msk.f32.vlgmr.msra.gmra.mrb[20].mxu0 %vm1640_vm2, %v1982_v55  ;;  %v5610_v55 = vld [vmem:[%s8272_s12] ss:$0 sm:$0xff] }
 0x475   : > { %v6729_v58 = vpop.eup %6728  ;;  %6196 = vmatpush3.msra.mxu0 %v1561_v56  ;;  %6197 = vmatprep.mubr.msk.f32.mxu0 %vm6858_vm1, %v6859_v20 }
 0x476   : > { %v1984_v59 = vmul.f32 %v6729_v58, %v6721_v43  ;;  %6205 = vmatprep.subr.mxu0 %v6859_v20  ;;  %v2624_v43 = vld [vmem:[%s8274_s14 + $0x10] sm:$0xff] }
 0x477   : > { %v6491_v44 = vpack.c.bf16 %v2624_v43, %v2622_v42 }
 0x478   : > { %6193 = vmatmul.mubr.msk.f32.vlgmr.msra.gmra.mrb[12].mxu1 %vm1640_vm2, %v1984_v59 }
 0x479   : > { %v6731_v62 = vpop.eup %6730  ;;  %6201 = vmatpush3.msra.mxu1 %v1631_v60  ;;  %6202 = vmatprep.mubr.msk.f32.mxu1 %vm6858_vm1, %v6859_v20  ;;  %v2948_v60 = vld [vmem:[%s8276_s16 + $0x80] sm:$0xff] }
 0x47a   : > { %v6733_v63 = vpop.eup %6732  ;;  %v1988_v1 = vmul.f32 %v6731_v62, %v6723_v45  ;;  %6210 = vmatprep.subr.mxu1 %v6859_v20  ;;  %v2627_v45 = vld [vmem:[%s8274_s14 + $0x28] sm:$0xff] }
 0x47b   : > { %v1986_v2 = vmul.f32 %v6733_v63, %v6725_v46  ;;  %v2629_v46 = vld [vmem:[%s8274_s14 + $0x38] sm:$0xff]  ;;  %v2949_v62 = vld [vmem:[%s8276_s16 + $0x88] sm:$0xff] }
 0x47c   : > { %6203 = vmatmul.mubr.msk.f32.vlgmr.msra.gmra.mrb[14].mxu1 %vm1640_vm2, %v1988_v1  ;;  %v6493_v47 = vpack.c.bf16 %v2629_v46, %v2627_v45  ;;  %v6497_v63 = vpack.c.bf16 %v2949_v62, %v2948_v60  ;;  %v2932_v1 = vld [vmem:[%s8276_s16] sm:$0xff]  ;;  %v2947_v45 = vld [vmem:[%s8276_s16 + $0x78] sm:$0xff] }
 0x47d   : > { %6198 = vmatmul.mubr.msk.f32.vlgmr.msra.gmra.mrb[22].mxu0 %vm1640_vm2, %v1986_v2  ;;  %6212 = vmatprep.mubr.msk.f32.mxu1 %vm6858_vm1, %v6859_v20  ;;  %v2933_v2 = vld [vmem:[%s8276_s16 + $0x8] sm:$0xff] }
 0x47e   : > { %6207 = vmatprep.mubr.msk.f32.mxu0 %vm6858_vm1, %v6859_v20  ;;  %6206 = vmatpush3.msra.mxu0 %v2281_v61  ;;  %v6499_v61 = vpack.c.bf16 %v2933_v2, %v2932_v1 }
 0x47f   : > { %6215 = vmatprep.subr.mxu0 %v6859_v20  ;;  %6211 = vmatpush3.msra.mxu1 %v2282_v3  ;;  %v2950_v3 = vld [vmem:[%s8276_s16 + $0x90] sm:$0xff] }
 0x480   : > { %6220 = vmatprep.subr.mxu1 %v6859_v20 }
 0x547   : > { %v2058_v5 = vpop.f32.mrb[20].mxu0 }
 0x548   : > { %v6189_v6 = vpop.f32.mrb[21].mxu0  ;;  %6208 = vmatmul.mubr.msk.f32.vlgmr.msra.gmra.mrb[24].mxu0 %vm1640_vm2, %v2058_v5 }
 0x549   : > { %6216 = vmatpush3.msra.mxu0 %v2283_v4  ;;  %6217 = vmatprep.mubr.msk.f32.mxu0 %vm6858_vm1, %v6859_v20  ;;  %v2951_v4 = vld [vmem:[%s8276_s16 + $0x98] sm:$0xff]  ;;  %v2934_v6 = vld [vmem:[%s8276_s16 + $0x10] sm:$0xff] }
 0x54a   : > { %v6501_v5 = vpack.c.bf16 %v2951_v4, %v2950_v3 }
 0x54b   : > { %v2131_v8 = vpop.f32.mrb[12].mxu1 }
 0x54c   : > { %v6194_v9 = vpop.f32.mrb[13].mxu1  ;;  %6213 = vmatmul.mubr.msk.f32.vlgmr.msra.gmra.mrb[16].mxu1 %vm1640_vm2, %v2131_v8 }
 0x54d   : > { %6221 = vmatpush3.msra.mxu1 %v2284_v7  ;;  %6222 = vmatprep.mubr.msk.f32.mxu1 %vm6858_vm1, %v6859_v20  ;;  %v2935_v7 = vld [vmem:[%s8276_s16 + $0x18] sm:$0xff]  ;;  %v2952_v9 = vld [vmem:[%s8276_s16 + $0xa0] sm:$0xff] }
 0x54e   : > { %6498 = vmatprep.subr.bf16.mxu1 %v6497_v63  ;;  %v6503_v8 = vpack.c.bf16 %v2935_v7, %v2934_v6 }
 0x54f   : > { %v2277_v10 = vpop.f32.mrb[14].mxu1 }
 0x550   : > { %v2204_v11 = vpop.f32.mrb[22].mxu0  ;;  %v6204_v13 = vpop.f32.mrb[15].mxu1  ;;  %6223 = vmatmul.mubr.msk.f32.vlgmr.msra.gmra.mrb[18].mxu1 %vm1640_vm2, %v2277_v10  ;;  %v2953_v10 = vld [vmem:[%s8276_s16 + $0xa8] sm:$0xff] }
 0x551   : > { %v6199_v14 = vpop.f32.mrb[23].mxu0  ;;  %6218 = vmatmul.mubr.msk.f32.vlgmr.msra.gmra.mrb[26].mxu0 %vm1640_vm2, %v2204_v11  ;;  %6500 = vmatpush3.bf16.msra.mxu1 %v6499_v61  ;;  %v6505_v11 = vpack.c.bf16 %v2953_v10, %v2952_v9  ;;  %v2936_v13 = vld [vmem:[%s8276_s16 + $0x20] sm:$0xff] }
 0x552   : > { %2709 = vmatprep.mubr.f32.mxu0 %v6859_v20  ;;  %6502 = vmatprep.subr.bf16.mxu1 %v6501_v5  ;;  %v2937_v14 = vld [vmem:[%s8276_s16 + $0x28] sm:$0xff] }
 0x555   : > { %6504 = vmatpush3.bf16.msra.mxu1 %v6503_v8 }
 0x556   : > { %6506 = vmatprep.subr.bf16.mxu1 %v6505_v11 }
 0x61b   : > { %v2354_v15 = vpop.f32.mrb[24].mxu0 }
 0x61c   : > { %v6209_v16 = vpop.f32.mrb[25].mxu0  ;;  %v2577_v18 = vsel %vm630_vm0, %v2354_v15, 0.0  ;;  %v2954_v15 = vld [vmem:[%s8276_s16 + $0xb0] sm:$0xff] }
 0x61d   : > { %v6507_v16 = vpack.c.bf16 %v2937_v14, %v2936_v13 }
 0x61f   : > { %v2427_v17 = vpop.f32.mrb[16].mxu1  ;;  %6508 = vmatpush3.bf16.msra.mxu1 %v6507_v16 }
 0x620   : > { %v2578_v19 = vsel %vm630_vm0, %v2427_v17, 0.0  ;;  %v6214_v21 = vpop.f32.mrb[17].mxu1  ;;  %v2955_v17 = vld [vmem:[%s8276_s16 + $0xb8] sm:$0xff] }
 0x621   : > { %v2579_v22 = vadd.f32 %v2578_v19, %v2577_v18  ;;  %v2938_v18 = vld [vmem:[%s8276_s16 + $0x30] sm:$0xff]  ;;  %v2939_v19 = vld [vmem:[%s8276_s16 + $0x38] sm:$0xff]  ;;  %v6509_v21 = vpack.c.bf16 %v2955_v17, %v2954_v15 }
 0x623   : > { %v2573_v23 = vpop.f32.mrb[18].mxu1  ;;  %6510 = vmatprep.subr.bf16.mxu1 %v6509_v21 }
 0x624   : > { %v2500_v24 = vpop.f32.mrb[26].mxu0  ;;  %v6224_v25 = vpop.f32.mrb[19].mxu1  ;;  %v2582_v29 = vsel %vm630_vm0, %v2573_v23, 0.0  ;;  %v2957_v23 = vld [vmem:[%s8276_s16 + $0xc8] sm:$0xff] }
 0x625   : > { %v2580_v26 = vsel %vm630_vm0, %v2500_v24, 0.0  ;;  %v6219_v27 = vpop.f32.mrb[27].mxu0  ;;  %v6511_v24 = vpack.c.bf16 %v2939_v19, %v2938_v18  ;;  %v6860_v19 = vmov 683565275  }
 0x626   : > { %v2581_v28 = vadd.f32 %v2580_v26, %v2579_v22  ;;  %v2956_v22 = vld [vmem:[%s8276_s16 + $0xc0] sm:$0xff]  ;;  %v2941_v27 = vld [vmem:[%s8276_s16 + $0x48] sm:$0xff] }
 0x627   : > { %v6513_v25 = vpack.c.bf16 %v2957_v23, %v2956_v22  ;;  %v2940_v26 = vld [vmem:[%s8276_s16 + $0x40] sm:$0xff]  ;;  %6512 = vmatpush3.bf16.msra.mxu1 %v6511_v24  ;;  %v6861_v24 = vmov 2475754826  }
 0x628   : > { %v2583_v30 = vadd.f32 %v2582_v29, %v2581_v28  ;;  %v2958_v28 = vld [vmem:[%s8276_s16 + $0xd0] sm:$0xff]  ;;  %v2959_v29 = vld [vmem:[%s8276_s16 + $0xd8] sm:$0xff] }
 0x629   : > { %6514 = vmatprep.subr.bf16.mxu1 %v6513_v25 }
 0x62a   : > { %v2584_v32 = vadd.f32 %v2583_v30, %v7041_v0  ;;  %v2625_v0 = vld [vmem:[%s8274_s14 + $0x18] sm:$0xff]  ;;  %v6515_v30 = vpack.c.bf16 %v2941_v27, %v2940_v26  ;;  %v6862_v26 = vmov 2131351028  }
 0x62b   : > { %v6489_v41 = vpack.c.bf16 %v2625_v0, %v2623_v36  ;;  %v2945_v36 = vld [vmem:[%s8276_s16 + $0x68] sm:$0xff]  ;;  %v2962_v0 = vld [vmem:[%s8276_s16 + $0xf0] sm:$0xff] }
 0x62c   : > { %v7401_v33 = vadd.f32 %v5609_v31, %v2584_v32  ;;  %v6517_v31 = vpack.c.bf16 %v2959_v29, %v2958_v28  ;;  %v2942_v32 = vld [vmem:[%s8276_s16 + $0x50] sm:$0xff]  ;;  %6516 = vmatpush3.bf16.msra.mxu1 %v6515_v30  ;;  %v6863_v28 = vmov 2102212464   ;;  %v6864_v30 = vmov 920167782  }
 0x62d   : > { %6490 = vmatprep.subr.bf16.mxu0 %v6489_v41  ;;  %v2963_v41 = vld [vmem:[%s8276_s16 + $0xf8] sm:$0xff] }
 0x62e   : > { %v2595_v34 = vsel %vm630_vm0, %v7401_v33, 0.0  ;;  %6492 = vmatpush1.bf16.msra.mxu0 %v6491_v44  ;;  %6518 = vmatprep.subr.bf16.mxu1 %v6517_v31  ;;  %v6525_v43 = vpack.c.bf16 %v2963_v41, %v2962_v0  ;;  %v2946_v44 = vld [vmem:[%s8276_s16 + $0x70] sm:$0xff] }
 0x62f   : > { %2596 = vadd.xlane.f32.xlu0 %v2595_v34  ;;  %6494 = vmatprep.subr.bf16.mxu0 %v6493_v47  ;;  %v2943_v34 = vld [vmem:[%s8276_s16 + $0x58] sm:$0xff]  ;;  %v6527_v46 = vpack.c.bf16 %v2947_v45, %v2946_v44  ;;  %v2632_v47 = vlaneseq }
 0x631   : > { %v7538_v48 = vshrl.u32 %v2632_v47, 7 }
 0x632   : > { %6496 = vmatpush1.bf16.msra.mxu0 %v6495_v50  ;;  %v2630_v50 = vld [vmem:[%s8275_s15] sm:$0x3] }
 0x633   : > { %6529 = vmatprep.subr.bf16.mxu0 %v6857_v12  ;;  %v2634_v49 = vsub.s32 0, %v7538_v48 }
 0x6bc   : > { %v2597_v35 = vpop.xlane.xlu0 %2596 }
 0x6bd   : > { %v2598_v37 = vmul.f32 0.03125, %v2597_v35  ;;  %v2960_v35 = vld [vmem:[%s8276_s16 + $0xe0] sm:$0xff] }
 0x6bf   : > { %v2599_v38 = vsub.f32 %v7401_v33, %v2598_v37  ;;  %v2961_v37 = vld [vmem:[%s8276_s16 + $0xe8] sm:$0xff] }
 0x6c1   : > { %v2600_v39 = vmul.f32 %v2599_v38, %v2599_v38 }
 0x6c3   : > { %v2601_v40 = vsel %vm630_vm0, %v2600_v39, 0.0  ;;  %v6521_v39 = vpack.c.bf16 %v2961_v37, %v2960_v35 }
 0x6c4   : > { %2602 = vadd.xlane.f32.xlu1 %v2601_v40  ;;  %v2944_v40 = vld [vmem:[%s8276_s16 + $0x60] sm:$0xff] }
 0x6c5   : > { %v6523_v42 = vpack.c.bf16 %v2945_v36, %v2944_v40 }
 0x751   : > { %v2603_v51 = vpop.xlane.xlu1 %2602 }
 0x752   : > { %v2604_v52 = vmul.f32 0.03125, %v2603_v51  ;;  %v2638_v51 = vsub.s32 1, %v7538_v48 }
 0x754   : > { %v2605_v53 = vadd.f32 1e-05, %v2604_v52  ;;  %v2635_v52 = vrot.slane %v2630_v50, %v2634_v49 }
 0x756   : > { %6734 = vrsqrt.f32 %v2605_v53  ;;  %v2639_v53 = vrot.slane %v2630_v50, %v2638_v51 }
 0x760   : > { %v6735_v54 = vpop.eup %6734 }
 0x761   : > { %v2607_v56 = vmul.f32 %v6735_v54, %v2599_v38  ;;  %v6519_v38 = vpack.c.bf16 %v2943_v34, %v2942_v32 }
 0x763   : > { %v2614_v58 = vmul.f32 %v5610_v55, %v2607_v56  ;;  %6520 = vmatpush3.bf16.msra.mxu1 %v6519_v38  ;;  %v2718_v55 = vstv %s5613_s18  ;;  %s5564_s18 = sshll.u32 %s616_s27, 3 }
 0x764   : > { %6522 = vmatprep.subr.bf16.mxu1 %v6521_v39  ;;  %v6865_v39 = vmov 1326507024   ;;  %s618_s2 = scalar_lea.vmem [#allocation5], %s5564_s18 }
 0x765   : > { %v2621_v59 = vadd.f32 %v5611_v57, %v2614_v58 }
 0x767   : > { %5612 = vmatmul.mubr.msk.f32.vlgmr.msra.gmra.mrb[28].mxu0 %vm630_vm0, %v2621_v59  ;;  %6524 = vmatpush3.bf16.msra.mxu1 %v6523_v42 }
 0x768   : > { %6233 = vmatprep.mubr.msk.f32.mxu0 %vm6858_vm1, %v6859_v20  ;;  %6526 = vmatprep.subr.bf16.mxu1 %v6525_v43 }
 0x76b   : > { %6528 = vmatpush3.bf16.msra.mxu1 %v6527_v46 }
 0x76c   : > { %6553 = vmatprep.subr.bf16.mxu1 %v6857_v12 }
 0x83a   : > { %v2711_v54 = vpop.f32.mrb[28].mxu0 }
 0x83b   : > { %v2712_v56 = vadd.f32 %v2711_v54, %v2635_v52  ;;  %v2713_v57 = vpop.f32.mrb[29].mxu0 }
 0x83c   : > { %v2714_v58 = vadd.f32 %v2713_v57, %v2639_v53 }
 0x83d   : > { %v7549_v59 = vadd.f32 %v2718_v55, %v2712_v56 }
 0x83e   : > { %v7551_v60 = vadd.f32 %v2718_v55, %v2714_v58 }
 0x83f   : > { %v2721_v62 = vand.u32 2147483647, %v7549_v59  ;;  %v2724_v63 = vand.u32 2139095040, %v7549_v59 }
 0x840   : > { %v2828_v1 = vand.u32 2139095040, %v7551_v60  ;;  %v2825_v3 = vand.u32 2147483647, %v7551_v60 }
 0x841   : > { %v2725_v2 = vshrl.u32 %v2724_v63, 23  ;;  %v2728_v61 = vand.u32 8388607, %v2721_v62 }
 0x842   : > { %v2829_v4 = vshrl.u32 %v2828_v1, 23  ;;  %v7561_v9 = vand.u32 8388607, %v2825_v3 }
 0x843   : > { %v5614_v5 = vadd.s32 4294967169, %v2725_v2  ;;  %v2729_v8 = vor.u32 8388608, %v2728_v61 }
 0x844   : > { %v5618_v6 = vadd.s32 4294967169, %v2829_v4  ;;  %v2833_v17 = vor.u32 8388608, %v7561_v9 }
 0x845   : > { %v2731_v7 = vadd.s32 1, %v5614_v5  ;;  %v7563_v16 = vshll.u32 %v2729_v8, 8 }
 0x846   : > { %v2835_v10 = vadd.s32 1, %v5618_v6 }
 0x847   : > { %vm2732_vm3 = vcmp.gt.s32.totalorder %v2731_v7, 0 }
 0x848   : > { %v2733_v11 = vsel %vm2732_vm3, %v2731_v7, 0  ;;  %vm2836_vm4 = vcmp.gt.s32.totalorder %v2835_v10, 0 }
 0x849   : > { %v2734_v13 = vshrl.u32 %v2733_v11, 5  ;;  %v2735_v14 = vand.u32 31, %v2733_v11  ;;  %v2837_v15 = vsel %vm2836_vm4, %v2835_v10, 0  ;;  %vm2723_vm4 = vcmp.lt.s32.totalorder %v7549_v59, 0 }
 0x84a   : > { %v7567_v22 = vshrl.u32 %v2837_v15, 5  ;;  %v2839_v23 = vand.u32 31, %v2837_v15 }
 0x84b   : > { %v2736_v18 = vsub.s32 32, %v2735_v14  ;;  %v2738_v21 = vshll.u32 %v6860_v19, %v2735_v14  ;;  %v2741_v25 = vshll.u32 %v6861_v24, %v2735_v14  ;;  %v2744_v27 = vshll.u32 %v6862_v26, %v2735_v14 }
 0x84c   : > { %v2747_v29 = vshll.u32 %v6863_v28, %v2735_v14  ;;  %v2750_v31 = vshll.u32 %v6864_v30, %v2735_v14  ;;  %vm2753_vm5 = vcmp.lt.s32.totalorder %v2734_v13, 1  ;;  %vm2754_vm6 = vcmp.lt.s32.totalorder %v2734_v13, 2 }
 0x84d   : > { %v2739_v32 = vshrl.u32 %v6861_v24, %v2736_v18  ;;  %v2742_v34 = vshrl.u32 %v6862_v26, %v2736_v18  ;;  %v2745_v35 = vshrl.u32 %v6863_v28, %v2736_v18  ;;  %v2737_v37 = vshrl.u32 %v6860_v19, %v2736_v18 }
 0x84e   : > { %v2748_v38 = vshrl.u32 %v6864_v30, %v2736_v18  ;;  %v2751_v40 = vshrl.u32 %v6865_v39, %v2736_v18  ;;  %v2840_v42 = vsub.s32 32, %v2839_v23  ;;  %vm2755_vm7 = vcmp.lt.s32.totalorder %v2734_v13, 3 }
 0x84f   : > { %v2740_v36 = vor.u32 %v2739_v32, %v2738_v21  ;;  %v2743_v0 = vor.u32 %v2742_v34, %v2741_v25  ;;  %v2746_v41 = vor.u32 %v2745_v35, %v2744_v27  ;;  %vm2756_vm8 = vcmp.lt.s32.totalorder %v2734_v13, 4 }
 0x850   : > { %v2749_v43 = vor.u32 %v2748_v38, %v2747_v29  ;;  %v2752_v44 = vor.u32 %v2751_v40, %v2750_v31  ;;  %v2842_v55 = vshll.u32 %v6860_v19, %v2839_v23  ;;  %v2843_v58 = vshrl.u32 %v6861_v24, %v2840_v42 }
 0x851   : > { %v2757_v45 = vsel %vm2753_vm5, %v2737_v37, %v2740_v36  ;;  %v2758_v46 = vsel %vm2756_vm8, %v2746_v41, 2102212464  ;;  %v2761_v47 = vsel %vm2753_vm5, %v2740_v36, %v2743_v0  ;;  %v2765_v50 = vsel %vm2753_vm5, %v2743_v0, %v2746_v41 }
 0x852   : > { %v2759_v52 = vsel %vm2755_vm7, %v2743_v0, %v2758_v46  ;;  %v2762_v53 = vsel %vm2756_vm8, %v2749_v43, 920167782  ;;  %v2766_v54 = vsel %vm2756_vm8, %v2752_v44, 1326507024  ;;  %v2845_v63 = vshll.u32 %v6861_v24, %v2839_v23 }
 0x853   : > { %v2763_v56 = vsel %vm2755_vm7, %v2746_v41, %v2762_v53  ;;  %v2767_v57 = vsel %vm2755_vm7, %v2749_v43, %v2766_v54  ;;  %v2760_v1 = vsel %vm2754_vm6, %v2757_v45, %v2759_v52  ;;  %v2846_v4 = vshrl.u32 %v6862_v26, %v2840_v42 }
 0x854   : > { %v2764_v2 = vsel %vm2754_vm6, %v2761_v47, %v2763_v56  ;;  %v2768_v61 = vsel %vm2754_vm6, %v2765_v50, %v2767_v57  ;;  %v2844_v9 = vor.u32 %v2843_v58, %v2842_v55  ;;  %v2848_v11 = vshll.u32 %v6862_v26, %v2839_v23 }
 0x855   : > { %v7590_v5 = vmul.u32.u64.low %v7563_v16, %v2768_v61  ;;  %v7591_v6 = vmul.u32.u64.high %v7563_v16, %v2768_v61, %v7590_v5  ;;  %v7594_v7 = vmul.u32.u64.low %v7563_v16, %v2764_v2  ;;  %v7595_v8 = vmul.u32.u64.high %v7563_v16, %v2764_v2, %v7594_v7 }
 0x856   : > { %v2847_v10 = vor.u32 %v2846_v4, %v2845_v63  ;;  %v2849_v14 = vshrl.u32 %v6863_v28, %v2840_v42  ;;  %v2851_v15 = vshll.u32 %v6863_v28, %v2839_v23  ;;  %v2852_v13 = vshrl.u32 %v6864_v30, %v2840_v42 }
 0x857   : > { %v2855_v18 = vshrl.u32 %v6865_v39, %v2840_v42  ;;  %v2873_v21 = vshll.u32 %v2833_v17, 8  ;;  %v2776_v25 = vmul.u32 %v7563_v16, %v2760_v1  ;;  %v2841_v27 = vshrl.u32 %v6860_v19, %v2840_v42 }
 0x858   : > { %v2850_v29 = vor.u32 %v2849_v14, %v2848_v11  ;;  %v2854_v31 = vshll.u32 %v6864_v30, %v2839_v23  ;;  %vm2778_vm9 = vc.u32 %v7591_v6, %v7594_v7  ;;  %v2779_v32 = vadd.s32 1, %v7595_v8 }
 0x859   : > { %v2853_v34 = vor.u32 %v2852_v13, %v2851_v15  ;;  %vm2857_vm10 = vcmp.lt.s32.totalorder %v7567_v22, 1  ;;  %vm2859_vm11 = vcmp.lt.s32.totalorder %v7567_v22, 3  ;;  %vm2860_vm12 = vcmp.lt.s32.totalorder %v7567_v22, 4 }
 0x85a   : > { %v2856_v35 = vor.u32 %v2855_v18, %v2854_v31  ;;  %v2865_v17 = vsel %vm2857_vm10, %v2844_v9, %v2847_v10  ;;  %v2780_v16 = vsel %vm2778_vm9, %v2779_v32, %v7595_v8  ;;  %v2862_v37 = vsel %vm2860_vm12, %v2850_v29, 2102212464 }
 0x85b   : > { %v2866_v38 = vsel %vm2860_vm12, %v2853_v34, 920167782  ;;  %v2869_v40 = vsel %vm2857_vm10, %v2847_v10, %v2850_v29  ;;  %v2781_v36 = vadd.s32 %v2780_v16, %v2776_v25  ;;  %vm2858_vm13 = vcmp.lt.s32.totalorder %v7567_v22, 2 }
 0x85c   : > { %v2867_v23 = vsel %vm2859_vm11, %v2850_v29, %v2866_v38  ;;  %v2870_v0 = vsel %vm2860_vm12, %v2856_v35, 1326507024  ;;  %v2861_v41 = vsel %vm2857_vm10, %v2841_v27, %v2844_v9  ;;  %v2863_v42 = vsel %vm2859_vm11, %v2847_v10, %v2862_v37 }
 0x85d   : > { %v2868_v43 = vsel %vm2858_vm13, %v2865_v17, %v2867_v23  ;;  %v2871_v44 = vsel %vm2859_vm11, %v2853_v34, %v2870_v0  ;;  %v2782_v45 = vadd.s32 536870912, %v2781_v36  ;;  %v2864_v55 = vsel %vm2858_vm13, %v2861_v41, %v2863_v42 }
 0x85e   : > { %v2872_v46 = vsel %vm2858_vm13, %v2869_v40, %v2871_v44  ;;  %v7612_v47 = vmul.u32.u64.low %v2873_v21, %v2868_v43  ;;  %v7613_v50 = vmul.u32.u64.high %v2873_v21, %v2868_v43, %v7612_v47  ;;  %v2880_v22 = vmul.u32 %v2873_v21, %v2864_v55 }
 0x85f   : > { %v7615_v52 = vmul.u32.u64.low %v2873_v21, %v2872_v46  ;;  %v7616_v53 = vmul.u32.u64.high %v2873_v21, %v2872_v46, %v7615_v52  ;;  %v2783_v54 = vshrl.u32 %v2782_v45, 30  ;;  %v2777_v13 = vadd.s32 %v7594_v7, %v7591_v6 }
 0x860   : > { %v2883_v57 = vadd.s32 1, %v7613_v50  ;;  %vm2722_vm5 = vcmp.le.f32.partialorder %v2721_v62, 0.7853982  ;;  %vm2827_vm6 = vcmp.lt.s32.totalorder %v7551_v60, 0  ;;  %vm2826_vm7 = vcmp.le.f32.partialorder %v2825_v3, 0.7853982 }
 0x861   : > { %v2784_v56 = vshll.u32 %v2783_v54, 30  ;;  %vm2882_vm14 = vc.u32 %v7616_v53, %v7612_v47  ;;  %v2807_v7 = vsub.s32 4, %v2783_v54  ;;  %vm2813_vm11 = vweird.f32 %v7549_v59 }
 0x862   : > { %v2884_v63 = vsel %vm2882_vm14, %v2883_v57, %v7613_v50 }
 0x863   : > { %v2785_v58 = vsub.s32 %v2781_v36, %v2784_v56  ;;  %v2885_v1 = vadd.s32 %v2884_v63, %v2880_v22  ;;  %v2881_v36 = vadd.s32 %v7612_v47, %v7616_v53  ;;  %v2808_v52 = vsel %vm2723_vm4, %v2807_v7, %v2783_v54 }
 0x864   : > { %v2810_v57 = vsel %vm2722_vm5, 0, %v2808_v52 }
 0x865   : > { %v2787_v2 = vsub.s32 0, %v2785_v58  ;;  %v2886_v61 = vadd.s32 536870912, %v2885_v1  ;;  %v2814_v63 = vadd.s32 3, %v2810_v57  ;;  %v5658_v57 = vld [vmem:[%s8265_s5 + $0x98] sm:$0xff] }
 0x867   : > { %v5615_v4 = vmin.u32 %v2787_v2, %v2785_v58  ;;  %v2887_v5 = vshrl.u32 %v2886_v61, 30  ;;  %v2815_v54 = vand.u32 3, %v2814_v63 }
 0x869   : > { %v2789_v8 = vclz %v5615_v4  ;;  %v2888_v9 = vshll.u32 %v2887_v5, 30  ;;  %vm2820_vm8 = vcmp.eq.s32.totalorder %v2815_v54, 2  ;;  %vm2817_vm9 = vcmp.eq.s32.totalorder %v2815_v54, 0 }
 0x86a   : > { %vm2816_vm10 = vcmp.lt.s32.totalorder %v2815_v54, 2  ;;  %v5631_v54 = vld [vmem:[%s8264_s4 + $0xa0] sm:$0xff] }
 0x86b   : > { %v5616_v10 = vadd.s32 4294967294, %v2789_v8  ;;  %v2889_v11 = vsub.s32 %v2885_v1, %v2888_v9 }
 0x86d   : > { %vm5617_vm15 = vcmp.lt.s32.totalorder %v5616_v10, 0  ;;  %v2891_v15 = vsub.s32 0, %v2889_v11 }
 0x86e   : > { %v2792_v14 = vsel %vm5617_vm15, 0, %v5616_v10  ;;  %vm2917_vm15 = vweird.f32 %v7551_v60 }
 0x86f   : > { %v2793_v18 = vsub.s32 32, %v2792_v14  ;;  %v2797_v21 = vsub.s32 4294967266, %v2792_v14  ;;  %v5619_v25 = vmin.u32 %v2891_v15, %v2889_v11  ;;  %v2794_v27 = vshll.u32 %v2785_v58, %v2792_v14 }
 0x870   : > { %v2911_v58 = vsub.s32 4, %v2887_v5 }
 0x871   : > { %v2795_v29 = vshrl.u32 %v2777_v13, %v2793_v18  ;;  %v2798_v31 = vadd.s32 127, %v2797_v21  ;;  %v2893_v32 = vclz %v5619_v25 }
 0x872   : > { %v2912_v62 = vsel %vm2827_vm6, %v2911_v58, %v2887_v5 }
 0x873   : > { %v2796_v34 = vor.u32 %v2795_v29, %v2794_v27  ;;  %v2799_v35 = vshll.u32 %v2798_v31, 23  ;;  %v5620_v17 = vadd.s32 4294967294, %v2893_v32  ;;  %v2914_v8 = vsel %vm2826_vm7, 0, %v2912_v62  ;;  %v5625_v62 = vld [vmem:[%s8306_s23 + $0x1] ss:$0 sm:$0xff] }
 0x874   : > { %v2918_v15 = vadd.s32 3, %v2914_v8  ;;  %v5663_v8 = vld [vmem:[%s8265_s5 + $0xc0] sm:$0xff] }
 0x875   : > { %v2800_v16 = vor.u32 4788187, %v2799_v35  ;;  %vm5621_vm3 = vcmp.lt.s32.totalorder %v5620_v17, 0  ;;  %v2803_v38 = vcvt.s32.f32 %v2796_v34  ;;  %v2929_v34 = vstv %s2716_s22  ;;  %s5792_s22 = sshll.u32 %s6988_s1, 7  ;;  %s6866_s1 = smov [#allocation5]  }
 0x876   : > { %v2896_v40 = vsel %vm5621_vm3, 0, %v5620_v17  ;;  %v2919_v18 = vand.u32 3, %v2918_v15  ;;  %s8217_s26 = scalar_lea.hbm %s8309_s19, %s5792_s22  ;;  %s6792_s18 = sshll.u32 %s6866_s1, 4  ;;  %s6793_s18 = int_to_ptr.vmem [resolvable:$false] %s6792_s18 }
 0x877   : > { %v2801_v37 = vand.u32 2147483647, %v2800_v16  ;;  %v2897_v23 = vsub.s32 32, %v2896_v40  ;;  %v2901_v0 = vsub.s32 4294967266, %v2896_v40  ;;  %v2898_v41 = vshll.u32 %v2889_v11, %v2896_v40  ;;  %s6794_s20 = scalar_lea.vmem %s6793_s18, 256 }
 0x878   : > { %vm2924_vm12 = vcmp.eq.s32.totalorder %v2919_v18, 2  ;;  %vm2921_vm13 = vcmp.eq.s32.totalorder %v2919_v18, 0  ;;  %vm2920_vm14 = vcmp.lt.s32.totalorder %v2919_v18, 2  ;;  %v5665_v18 = vld [vmem:[%s8265_s5 + $0xd0] sm:$0xff] }
 0x879   : > { %v2804_v6 = vmul.f32 %v2803_v38, %v2801_v37  ;;  %v2899_v42 = vshrl.u32 %v2881_v36, %v2897_v23  ;;  %v2902_v43 = vadd.s32 127, %v2901_v0  ;;  %v5622_v38 = vld [vmem:[%s8277_s17] ss:$0 sm:$0xff] }
 0x87b   : > { %v2805_v44 = vxor.u32 2147483648, %v2804_v6  ;;  %v2900_v45 = vor.u32 %v2899_v42, %v2898_v41  ;;  %v2903_v46 = vshll.u32 %v2902_v43, 23 }
 0x87d   : > { %v2806_v50 = vsel %vm2723_vm4, %v2805_v44, %v2804_v6  ;;  %v2904_v47 = vor.u32 4788187, %v2903_v46  ;;  %v2907_v56 = vcvt.s32.f32 %v2900_v45  ;;  %v5627_v44 = vld [vmem:[%s8264_s4 + $0x80] sm:$0xff] }
 0x87e   : > { %v2809_v55 = vsel %vm2722_vm5, %v7549_v59, %v2806_v50  ;;  %v5655_v45 = vld [vmem:[%s8265_s5 + $0x80] sm:$0xff]  ;;  %v5656_v50 = vld [vmem:[%s8265_s5 + $0x88] sm:$0xff] }
 0x87f   : > { %6736 = vcosq.f32 %v2809_v55  ;;  %v2905_v53 = vand.u32 2147483647, %v2904_v47  ;;  %v6554_v52 = vpack.c.bf16 %v5656_v50, %v5655_v45  ;;  %v5630_v47 = vld [vmem:[%s8264_s4 + $0x98] sm:$0xff] }
 0x880   : > { %6738 = vsinq.f32 %v2809_v55  ;;  %v5629_v55 = vld [vmem:[%s8264_s4 + $0x90] sm:$0xff]  ;;  %v5694_v45 = vld [vmem:[%s8266_s6 + $0xd8] sm:$0xff] }
 0x881   : > { %v2908_v22 = vmul.f32 %v2907_v56, %v2905_v53  ;;  %v5657_v53 = vld [vmem:[%s8265_s5 + $0x90] sm:$0xff]  ;;  %v6533_v56 = vpack.c.bf16 %v5630_v47, %v5629_v55  ;;  %v5660_v55 = vld [vmem:[%s8265_s5 + $0xa8] sm:$0xff] }
 0x883   : > { %v2909_v1 = vxor.u32 2147483648, %v2908_v22 }
 0x885   : > { %v2910_v2 = vsel %vm2827_vm6, %v2909_v1, %v2908_v22  ;;  %v6557_v22 = vpack.c.bf16 %v5658_v57, %v5657_v53  ;;  %v5661_v53 = vld [vmem:[%s8265_s5 + $0xb0] sm:$0xff] }
 0x886   : > { %v2913_v61 = vsel %vm2826_vm7, %v7551_v60, %v2910_v2 }
 0x887   : > { %6740 = vcosq.f32 %v2913_v61 }
 0x888   : > { %6742 = vsinq.f32 %v2913_v61 }
 0x889   : > { %v6737_v4 = vpop.eup %6736 }
 0x88a   : > { %v6739_v9 = vpop.eup %6738  ;;  %v2821_v10 = vxor.u32 2147483648, %v6737_v4 }
 0x88b   : > { %v2818_v11 = vxor.u32 2147483648, %v6739_v9 }
 0x88c   : > { %v2822_v14 = vsel %vm2820_vm8, %v2821_v10, %v6739_v9  ;;  %v5664_v9 = vld [vmem:[%s8265_s5 + $0xc8] sm:$0xff]  ;;  %v5626_v10 = vld [vmem:[%s8307_s25 + $0x1] ss:$0 sm:$0xff] }
 0x88d   : > { %v2819_v13 = vsel %vm2817_vm9, %v6737_v4, %v2818_v11  ;;  %v5632_v4 = vld [vmem:[%s8264_s4 + $0xa8] sm:$0xff]  ;;  %v6566_v15 = vpack.c.bf16 %v5664_v9, %v5663_v8  ;;  %v5689_v8 = vld [vmem:[%s8266_s6 + $0xb0] sm:$0xff]  ;;  %v5690_v9 = vld [vmem:[%s8266_s6 + $0xb8] sm:$0xff] }
 0x88e   : > { %v2823_v3 = vsel %vm2816_vm10, %v2819_v13, %v2822_v14  ;;  %v6536_v14 = vpack.c.bf16 %v5632_v4, %v5631_v54  ;;  %v5633_v13 = vld [vmem:[%s8264_s4 + $0xb0] sm:$0xff]  ;;  %v5687_v54 = vld [vmem:[%s8266_s6 + $0xa0] sm:$0xff] }
 0x88f   : > { %v2824_v5 = vsel %vm2813_vm11, nan, %v2823_v3 }
 0x890   : > { %v2930_v37 = vmul.f32 %v2929_v34, %v2824_v5  ;;  %v5634_v5 = vld [vmem:[%s8264_s4 + $0xb8] sm:$0xff] }
 0x891   : > { %v6741_v21 = vpop.eup %6740 }
 0x892   : > { %v6743_v25 = vpop.eup %6742  ;;  %v2925_v27 = vxor.u32 2147483648, %v6741_v21 }
 0x893   : > { %v2922_v29 = vxor.u32 2147483648, %v6743_v25 }
 0x894   : > { %v2926_v31 = vsel %vm2924_vm12, %v2925_v27, %v6743_v25  ;;  %v6539_v25 = vpack.c.bf16 %v5634_v5, %v5633_v13  ;;  %v5697_v13 = vld [vmem:[%s8266_s6 + $0xf0] sm:$0xff]  ;;  %v5698_v5 = vld [vmem:[%s8266_s6 + $0xf8] sm:$0xff] }
 0x895   : > { %v2923_v32 = vsel %vm2921_vm13, %v6741_v21, %v2922_v29  ;;  %v5666_v21 = vld [vmem:[%s8265_s5 + $0xd8] sm:$0xff]  ;;  %v5635_v29 = vld [vmem:[%s8264_s4 + $0xc0] sm:$0xff] }
 0x896   : > { %v2927_v35 = vsel %vm2920_vm14, %v2923_v32, %v2926_v31  ;;  %v6569_v27 = vpack.c.bf16 %v5666_v21, %v5665_v18  ;;  %v5636_v31 = vld [vmem:[%s8264_s4 + $0xc8] sm:$0xff]  ;;  %v5683_v32 = vld [vmem:[%s8266_s6 + $0x80] sm:$0xff]  ;;  %v6599_v18 = vpack.c.bf16 %v5698_v5, %v5697_v13 }
 0x897   : > { %v2928_v17 = vsel %vm2917_vm15, nan, %v2927_v35  ;;  %v6542_v35 = vpack.c.bf16 %v5636_v31, %v5635_v29  ;;  %v5675_v21 = vld [vmem:[%s8268_s8 + $0x4] ss:$0 sm:$0xff] }
 0x898   : > { %v2931_v16 = vmul.f32 %v2929_v34, %v2928_v17  ;;  %v5684_v34 = vld [vmem:[%s8266_s6 + $0x88] sm:$0xff]  ;;  %v5647_v29 = vld [vmem:[%s8267_s7 + $0x4] ss:$0 sm:$0xff] }
 0x899   : > { %v6578_v17 = vpack.c.bf16 %v5684_v34, %v5683_v32 }
 0x89a   : > { %3035 = vmatprep.mubr.f32.mxu1 %v2931_v16  ;;  %v5637_v16 = vld [vmem:[%s8264_s4 + $0xd0] sm:$0xff] }
 0x89b   : > { %3036 = vmatmul.mubr.f32.vlgmr.msra.gmra.mrb[20].mxu1 %v2930_v37  ;;  %v5638_v37 = vld [vmem:[%s8264_s4 + $0xd8] sm:$0xff] }
 0x89c   : > { %6277 = vmatprep.mubr.msk.f32.mxu1 %vm6858_vm1, %v6859_v20  ;;  %6555 = vmatpush3.bf16.msra.mxu1 %v6554_v52  ;;  %v5659_v52 = vld [vmem:[%s8265_s5 + $0xa0] sm:$0xff] }
 0x89d   : > { %6556 = vmatprep.subr.bf16.mxu1 %v6857_v12  ;;  %v6560_v47 = vpack.c.bf16 %v5660_v55, %v5659_v52 }
 0x8a0   : > { %6558 = vmatpush3.bf16.msra.mxu1 %v6557_v22  ;;  %v5667_v22 = vld [vmem:[%s8265_s5 + $0xe0] sm:$0xff] }
 0x8a1   : > { %6565 = vmatprep.subr.bf16.mxu1 %v6857_v12 }
 0x96e   : > { %v5911_v59 = vpop.f32.mrb[20].mxu1 }
 0x96f   : > { %v5912_v40 = vpop.f32.mrb[21].mxu1 }
 0x970   : > { %v5913_v36 = vadd.f32 %v5912_v40, %v5911_v59  ;;  %v5685_v59 = vld [vmem:[%s8266_s6 + $0x90] sm:$0xff]  ;;  %v6545_v40 = vpack.c.bf16 %v5638_v37, %v5637_v16 }
 0x972   : > { %v3038_v23 = vadd.f32 %v5913_v36, %v5622_v38  ;;  %v5686_v38 = vld [vmem:[%s8266_s6 + $0x98] sm:$0xff] }
 0x973   : > { %v6581_v36 = vpack.c.bf16 %v5686_v38, %v5685_v59  ;;  %v5649_v38 = vld [vmem:[%s8267_s7 + $0x6] ss:$0 sm:$0xff] }
 0x974   : > { %v7639_v0 = vadd.f32 %v3038_v23, %v7401_v33  ;;  %v5628_v33 = vld [vmem:[%s8264_s4 + $0x88] sm:$0xff]  ;;  %v5639_v23 = vld [vmem:[%s8264_s4 + $0xe0] sm:$0xff] }
 0x975   : > { %v6530_v46 = vpack.c.bf16 %v5628_v33, %v5627_v44  ;;  %v5642_v44 = vld [vmem:[%s8264_s4 + $0xf8] sm:$0xff]  ;;  %v5693_v33 = vld [vmem:[%s8266_s6 + $0xd0] sm:$0xff] }
 0x976   : > { %v3046_v60 = vsel %vm630_vm0, %v7639_v0, 0.0  ;;  %v6593_v50 = vpack.c.bf16 %v5694_v45, %v5693_v33  ;;  %v5676_v45 = vld [vmem:[%s8268_s8 + $0x5] ss:$0 sm:$0xff] }
 0x977   : > { %3047 = vadd.xlane.f32.xlu0 %v3046_v60  ;;  %6531 = vmatpush3.bf16.msra.mxu0 %v6530_v46  ;;  %v5640_v60 = vld [vmem:[%s8264_s4 + $0xe8] sm:$0xff] }
 0x978   : > { %6532 = vmatprep.subr.bf16.mxu0 %v6857_v12 }
 0x97b   : > { %6534 = vmatpush3.bf16.msra.mxu0 %v6533_v56  ;;  %v5662_v56 = vld [vmem:[%s8265_s5 + $0xb8] sm:$0xff] }
 0x97c   : > { %6535 = vmatprep.subr.bf16.mxu0 %v6857_v12  ;;  %v6563_v57 = vpack.c.bf16 %v5662_v56, %v5661_v53  ;;  %v5678_v53 = vld [vmem:[%s8268_s8 + $0x7] ss:$0 sm:$0xff] }
 0xa04   : > { %v3048_v6 = vpop.xlane.xlu0 %3047 }
 0xa05   : > { %v3049_v7 = vmul.f32 0.03125, %v3048_v6  ;;  %v5691_v6 = vld [vmem:[%s8266_s6 + $0xc0] sm:$0xff] }
 0xa07   : > { %v3050_v41 = vsub.f32 %v7639_v0, %v3049_v7  ;;  %v5692_v7 = vld [vmem:[%s8266_s6 + $0xc8] sm:$0xff] }
 0xa09   : > { %v3051_v42 = vmul.f32 %v3050_v41, %v3050_v41 }
 0xa0b   : > { %v3052_v43 = vsel %vm630_vm0, %v3051_v42, 0.0  ;;  %v6590_v42 = vpack.c.bf16 %v5692_v7, %v5691_v6 }
 0xa0c   : > { %3053 = vadd.xlane.f32.xlu1 %v3052_v43  ;;  %v5641_v43 = vld [vmem:[%s8264_s4 + $0xf0] sm:$0xff] }
 0xa0d   : > { %v6551_v46 = vpack.c.bf16 %v5642_v44, %v5641_v43 }
 0xa99   : > { %v3054_v58 = vpop.xlane.xlu1 %3053 }
 0xa9a   : > { %v3055_v63 = vmul.f32 0.03125, %v3054_v58  ;;  %v5668_v58 = vld [vmem:[%s8265_s5 + $0xe8] sm:$0xff] }
 0xa9c   : > { %v3056_v1 = vadd.f32 1e-05, %v3055_v63  ;;  %v6572_v63 = vpack.c.bf16 %v5668_v58, %v5667_v22 }
 0xa9e   : > { %6744 = vrsqrt.f32 %v3056_v1  ;;  %v5669_v1 = vld [vmem:[%s8265_s5 + $0xf0] sm:$0xff] }
 0xaa8   : > { %v6745_v2 = vpop.eup %6744 }
 0xaa9   : > { %v3058_v61 = vmul.f32 %v6745_v2, %v3050_v41  ;;  %v6548_v41 = vpack.c.bf16 %v5640_v60, %v5639_v23  ;;  %v5670_v2 = vld [vmem:[%s8265_s5 + $0xf8] sm:$0xff] }
 0xaab   : > { %v3065_v11 = vmul.f32 %v5625_v62, %v3058_v61  ;;  %v6575_v62 = vpack.c.bf16 %v5670_v2, %v5669_v1  ;;  %v5688_v61 = vld [vmem:[%s8266_s6 + $0xa8] sm:$0xff]  ;;  %v5704_v1 = vld [vmem:[%s8269_s9 + $0x5] ss:$0 sm:$0xff] }
 0xaac   : > { %v6584_v4 = vpack.c.bf16 %v5688_v61, %v5687_v54 }
 0xaad   : > { %v7694_v3 = vadd.f32 %v5626_v10, %v3065_v11  ;;  %v6587_v10 = vpack.c.bf16 %v5690_v9, %v5689_v8  ;;  %v5695_v11 = vld [vmem:[%s8266_s6 + $0xe0] sm:$0xff] }
 0xaae   : > { %v6772_v9 = vld [vmem:[%s7337_s0] ss:$0 sm:$0xff]  ;;  %s5478_s0 = sshll.u32 %s618_s2, 4  ;;  %s8219_s0 = int_to_ptr.vmem [resolvable:$true] %s5478_s0 }
 0xaaf   : > { %6234 = vmatmul.mubr.msk.f32.vlgmr.msra.gmra.mrb[30].mxu0 %vm630_vm0, %v7694_v3  ;;  %6278 = vmatmul.mubr.msk.f32.vlgmr.msra.gmra.mrb[22].mxu1 %vm630_vm0, %v7694_v3  ;;  %s6788_s29 = scalar_lea.vmem %s8219_s0, 128  ;;  %p6795_p13 = scmp.lt.s32.totalorder %s8219_s0, %s6793_s18 }
 0xab0   : > { %6537 = vmatpush3.bf16.msra.mxu0 %v6536_v14  ;;  %6567 = vmatpush3.bf16.msra.mxu1 %v6566_v15  ;;  %v5696_v14 = vld [vmem:[%s8266_s6 + $0xe8] sm:$0xff]  ;;  %p6789_p9 = scmp.ne.s32.totalorder %s8219_s0, %s6788_s29  ;;  %p6796_p0 = scmp.lt.s32.totalorder %s6794_s20, %s6788_s29 }
 0xab1   : > { %6538 = vmatprep.subr.bf16.mxu0 %v6857_v12  ;;  %6568 = vmatprep.subr.bf16.mxu1 %v6857_v12  ;;  %v6596_v15 = vpack.c.bf16 %v5696_v14, %v5695_v11 }
 0xab2   : > { %6244 = vmatprep.mubr.msk.f32.mxu0 %vm6858_vm1, %v6859_v20  ;;  %6299 = vmatprep.mubr.msk.f32.mxu1 %vm6858_vm1, %v6859_v20  ;;  %p6790_p10 = pnand %p6789_p9, %p7005_p5  ;;  %p6797_p1 = por %p6796_p0, %p6795_p13 }
 0xab4   : > { %6540 = vmatpush3.bf16.msra.mxu0 %v6539_v25  ;;  %6570 = vmatpush3.bf16.msra.mxu1 %v6569_v27  ;;  %p6791_p12 = pneg %p6790_p10 }
 0xab5   : > { %6541 = vmatprep.subr.bf16.mxu0 %v6857_v12  ;;  %6577 = vmatprep.subr.bf16.mxu1 %v6857_v12 }
 0xab6   : > { %p6798_p2 = pnand %p6797_p1, %p6791_p12 }
 0xab7   : > { %6245 = vmatmul.mubr.msk.f32.vlgmr.msra.gmra.mrb[32].mxu0 %vm630_vm0, %v7694_v3  ;;  %6300 = vmatmul.mubr.msk.f32.vlgmr.msra.gmra.mrb[24].mxu1 %vm630_vm0, %v7694_v3 }
 0xab8   : > { %6543 = vmatpush3.bf16.msra.mxu0 %v6542_v35  ;;  %6579 = vmatpush3.bf16.msra.mxu1 %v6578_v17 }
 0xab9   : > { %6544 = vmatprep.subr.bf16.mxu0 %v6857_v12  ;;  %6580 = vmatprep.subr.bf16.mxu1 %v6857_v12 }
 0xaba   : > { %6255 = vmatprep.mubr.msk.f32.mxu0 %vm6858_vm1, %v6859_v20  ;;  %6321 = vmatprep.mubr.msk.f32.mxu1 %vm6858_vm1, %v6859_v20 }
 0xabc   : > { %6546 = vmatpush3.bf16.msra.mxu0 %v6545_v40  ;;  %6582 = vmatpush3.bf16.msra.mxu1 %v6581_v36  ;;  %v5703_v40 = vld [vmem:[%s8269_s9 + $0x4] ss:$0 sm:$0xff] }
 0xabd   : > { %6547 = vmatprep.subr.bf16.mxu0 %v6857_v12  ;;  %6589 = vmatprep.subr.bf16.mxu1 %v6857_v12 }
 0xabf   : > { %6256 = vmatmul.mubr.msk.f32.vlgmr.msra.gmra.mrb[34].mxu0 %vm630_vm0, %v7694_v3  ;;  %6322 = vmatmul.mubr.msk.f32.vlgmr.msra.gmra.mrb[26].mxu1 %vm630_vm0, %v7694_v3 }
 0xac0   : > { %6549 = vmatpush3.bf16.msra.mxu0 %v6548_v41  ;;  %6591 = vmatpush3.bf16.msra.mxu1 %v6590_v42 }
 0xac1   : > { %6550 = vmatprep.subr.bf16.mxu0 %v6857_v12  ;;  %6592 = vmatprep.subr.bf16.mxu1 %v6857_v12 }
 0xac2   : > { %6266 = vmatprep.mubr.msk.f32.mxu0 %vm6858_vm1, %v6859_v20  ;;  %6343 = vmatprep.mubr.msk.f32.mxu1 %vm6858_vm1, %v6859_v20 }
 0xac4   : > { %6552 = vmatpush3.bf16.msra.mxu0 %v6551_v46  ;;  %6594 = vmatpush3.bf16.msra.mxu1 %v6593_v50  ;;  %v5648_v50 = vld [vmem:[%s8267_s7 + $0x5] ss:$0 sm:$0xff] }
 0xac5   : > { %6559 = vmatprep.subr.bf16.mxu0 %v6857_v12  ;;  %6357 = vmatprep.subr.mxu1 %v6859_v20 }
 0xac7   : > { %6267 = vmatmul.mubr.msk.f32.vlgmr.msra.gmra.mrb[36].mxu0 %vm630_vm0, %v7694_v3  ;;  %6344 = vmatmul.mubr.msk.f32.vlgmr.msra.gmra.mrb[28].mxu1 %vm630_vm0, %v7694_v3 }
 0xac8   : > { %6561 = vmatpush3.bf16.msra.mxu0 %v6560_v47  ;;  %6288 = vmatprep.mubr.msk.f32.mxu0 %vm6858_vm1, %v6859_v20 }
 0xac9   : > { %6562 = vmatprep.subr.bf16.mxu0 %v6857_v12  ;;  %6359 = vmatprep.mubr.msk.f32.mxu1 %vm6858_vm1, %v6859_v20 }
 0xacc   : > { %6564 = vmatpush3.bf16.msra.mxu0 %v6563_v57  ;;  %v5650_v57 = vld [vmem:[%s8267_s7 + $0x7] ss:$0 sm:$0xff] }
 0xacd   : > { %6571 = vmatprep.subr.bf16.mxu0 %v6857_v12 }
 0xacf   : > { %6289 = vmatmul.mubr.msk.f32.vlgmr.msra.gmra.mrb[38].mxu0 %vm630_vm0, %v7694_v3 }
 0xad0   : > { %6573 = vmatpush3.bf16.msra.mxu0 %v6572_v63  ;;  %6310 = vmatprep.mubr.msk.f32.mxu0 %vm6858_vm1, %v6859_v20 }
 0xad1   : > { %6574 = vmatprep.subr.bf16.mxu0 %v6857_v12 }
 0xad4   : > { %6576 = vmatpush3.bf16.msra.mxu0 %v6575_v62 }
 0xad5   : > { %6583 = vmatprep.subr.bf16.mxu0 %v6857_v12 }
 0xad7   : > { %6311 = vmatmul.mubr.msk.f32.vlgmr.msra.gmra.mrb[40].mxu0 %vm630_vm0, %v7694_v3 }
 0xad8   : > { %6585 = vmatpush3.bf16.msra.mxu0 %v6584_v4  ;;  %6332 = vmatprep.mubr.msk.f32.mxu0 %vm6858_vm1, %v6859_v20 }
 0xad9   : > { %6586 = vmatprep.subr.bf16.mxu0 %v6857_v12 }
 0xadc   : > { %6588 = vmatpush3.bf16.msra.mxu0 %v6587_v10 }
 0xadd   : > { %6595 = vmatprep.subr.bf16.mxu0 %v6857_v12 }
 0xadf   : > { %6333 = vmatmul.mubr.msk.f32.vlgmr.msra.gmra.mrb[42].mxu0 %vm630_vm0, %v7694_v3 }
 0xae0   : > { %6597 = vmatpush3.bf16.msra.mxu0 %v6596_v15  ;;  %6354 = vmatprep.mubr.msk.f32.mxu0 %vm6858_vm1, %v6859_v20 }
 0xae1   : > { %6598 = vmatprep.subr.bf16.mxu0 %v6857_v12 }
 0xae4   : > { %6600 = vmatpush3.bf16.msra.mxu0 %v6599_v18 }
 0xae5   : > { %6367 = vmatprep.subr.mxu0 %v6859_v20 }
 0xae7   : > { %6355 = vmatmul.mubr.msk.f32.vlgmr.msra.gmra.mrb[44].mxu0 %vm630_vm0, %v7694_v3  ;;  %v5677_v3 = vld [vmem:[%s8268_s8 + $0x6] ss:$0 sm:$0xff] }
 0xae8   : > { %6369 = vmatprep.mubr.msk.f32.mxu0 %vm6858_vm1, %v6859_v20 }
 0xb82   : > { %v3188_v25 = vpop.f32.mrb[30].mxu0  ;;  %v3514_v27 = vpop.f32.mrb[22].mxu1 }
 0xb83   : > { %v3515_v12 = vadd.f32 %v5675_v21, %v3514_v27  ;;  %v6235_v31 = vpop.f32.mrb[31].mxu0  ;;  %v6279_v32 = vpop.f32.mrb[23].mxu1  ;;  %v3189_v34 = vadd.f32 %v5647_v29, %v3188_v25 }
 0xb85   : > { %6358 = vmatpush3.xpose.msk.msra.mxu1 %vm1640_vm2, %v3515_v12 }
 0xb86   : > { %6362 = vmatprep.subr.mxu1 %v6859_v20 }
 0xb88   : > { %6360 = vmatmul.mubr.msk.f32.vlgmr.msra.gmra.mrb[30].mxu1 %vm1640_vm2, %v3189_v34 }
 0xb89   : > { %6364 = vmatprep.mubr.msk.f32.mxu1 %vm6858_vm1, %v6859_v20 }
 0xb8a   : > { %v3258_v35 = vpop.f32.mrb[32].mxu0  ;;  %v3654_v17 = vpop.f32.mrb[24].mxu1 }
 0xb8b   : > { %v3655_v16 = vadd.f32 %v5677_v3, %v3654_v17  ;;  %v6246_v37 = vpop.f32.mrb[33].mxu0  ;;  %v6301_v59 = vpop.f32.mrb[25].mxu1  ;;  %v3259_v47 = vadd.f32 %v5648_v50, %v3258_v35 }
 0xb8d   : > { %6368 = vmatpush3.xpose.msk.msra.mxu0 %vm1640_vm2, %v3655_v16 }
 0xb8e   : > { %6377 = vmatprep.subr.mxu0 %v6859_v20 }
 0xb92   : > { %v3328_v36 = vpop.f32.mrb[34].mxu0  ;;  %v3840_v23 = vpop.f32.mrb[26].mxu1 }
 0xb93   : > { %v3329_v60 = vadd.f32 %v5649_v38, %v3328_v36  ;;  %v3841_v6 = vadd.f32 %v5703_v40, %v3840_v23  ;;  %v6257_v7 = vpop.f32.mrb[35].mxu0  ;;  %v6323_v41 = vpop.f32.mrb[27].mxu1 }
 0xb95   : > { %6370 = vmatmul.mubr.msk.f32.vlgmr.msra.gmra.mrb[46].mxu0 %vm1640_vm2, %v3329_v60 }
 0xb96   : > { %6378 = vmatpush3.msra.mxu0 %v3841_v6  ;;  %6379 = vmatprep.mubr.msk.f32.mxu0 %vm6858_vm1, %v6859_v20 }
 0xb97   : > { %6387 = vmatprep.subr.mxu0 %v6859_v20 }
 0xb9a   : > { %v3398_v42 = vpop.f32.mrb[36].mxu0  ;;  %v7895_v43 = vpop.f32.mrb[28].mxu1 }
 0xb9b   : > { %v6268_v44 = vpop.f32.mrb[37].mxu0  ;;  %v6345_v33 = vpop.f32.mrb[29].mxu1  ;;  %v3399_v63 = vadd.f32 %v5650_v57, %v3398_v42 }
 0xba2   : > { %v3584_v46 = vpop.f32.mrb[38].mxu0 }
 0xba3   : > { %v3585_v52 = vadd.f32 %v5676_v45, %v3584_v46  ;;  %v6290_v55 = vpop.f32.mrb[39].mxu0 }
 0xba4   : > { %v5705_v55 = vld [vmem:[%s8269_s9 + $0x6] ss:$0 sm:$0xff] }
 0xba5   : > { %6363 = vmatpush3.xpose.msk.msra.mxu1 %vm1640_vm2, %v3585_v52 }
 0xba6   : > { %6372 = vmatprep.subr.mxu1 %v6859_v20 }
 0xba8   : > { %6365 = vmatmul.mubr.msk.f32.vlgmr.msra.gmra.mrb[32].mxu1 %vm1640_vm2, %v3259_v47 }
 0xba9   : > { %6374 = vmatprep.mubr.msk.f32.mxu1 %vm6858_vm1, %v6859_v20 }
 0xbaa   : > { %v3724_v56 = vpop.f32.mrb[40].mxu0 }
 0xbab   : > { %v3725_v22 = vadd.f32 %v5678_v53, %v3724_v56  ;;  %v6312_v58 = vpop.f32.mrb[41].mxu0  ;;  %v3981_v56 = vadd.f32 %v5705_v55, %v7895_v43  ;;  %v5739_v55 = vld [vmem:[%s8274_s14 + $0x50] sm:$0xff] }
 0xbad   : > { %6373 = vmatpush3.xpose.msk.msra.mxu1 %vm1640_vm2, %v3725_v22 }
 0xbae   : > { %6382 = vmatprep.subr.mxu1 %v6859_v20 }
 0xbb0   : > { %6375 = vmatmul.mubr.msk.f32.vlgmr.msra.gmra.mrb[34].mxu1 %vm1640_vm2, %v3399_v63 }
 0xbb1   : > { %6384 = vmatprep.mubr.msk.f32.mxu1 %vm6858_vm1, %v6859_v20 }
 0xbb2   : > { %v3910_v2 = vpop.f32.mrb[42].mxu0 }
 0xbb3   : > { %v3911_v62 = vadd.f32 %v5704_v1, %v3910_v2  ;;  %v6334_v54 = vpop.f32.mrb[43].mxu0  ;;  %v5706_v1 = vld [vmem:[%s8269_s9 + $0x7] ss:$0 sm:$0xff] }
 0xbb5   : > { %6383 = vmatpush3.msra.mxu1 %v3911_v62 }
 0xbb6   : > { %6392 = vmatprep.subr.mxu1 %v6859_v20 }
 0xbba   : > { %v7923_v61 = vpop.f32.mrb[44].mxu0 }
 0xbbb   : > { %v6356_v4 = vpop.f32.mrb[45].mxu0  ;;  %v4051_v54 = vadd.f32 %v5706_v1, %v7923_v61  ;;  %v5724_v61 = vld [vmem:[%s8270_s10 + $0x28] sm:$0xff] }
 0xc5b   : > { %v4126_v8 = vpop.f32.mrb[30].mxu1 }
 0xc5c   : > { %v4127_v10 = vadd.f32 %v6772_v9, %v4126_v8  ;;  %v6361_v11 = vpop.f32.mrb[31].mxu1 }
 0xc5e   : > { %v4358_v14 = vsel %vm1640_vm2, %v4127_v10, -inf }
 0xc5f   : > { %4359 = vmax.xlane.f32.xlu0 %v4358_v14 }
 0xc68   : > { %v4278_v15 = vpop.f32.mrb[46].mxu0 }
 0xc69   : > { %v4279_v13 = vadd.f32 %v6772_v9, %v4278_v15  ;;  %v6371_v5 = vpop.f32.mrb[47].mxu0 }
 0xc6a   : > { %v5726_v5 = vld [vmem:[%s8270_s10 + $0x38] sm:$0xff] }
 0xc6b   : > { %v4364_v18 = vsel %vm1640_vm2, %v4279_v13, -inf }
 0xc6c   : > { %4365 = vmax.xlane.f32.xlu0 %v4364_v18 }
 0xc7b   : > { %v4202_v21 = vpop.f32.mrb[32].mxu1 }
 0xc7c   : > { %v4203_v25 = vadd.f32 %v6772_v9, %v4202_v21  ;;  %v6366_v27 = vpop.f32.mrb[33].mxu1 }
 0xc7e   : > { %v4361_v29 = vsel %vm1640_vm2, %v4203_v25, -inf }
 0xc7f   : > { %4362 = vmax.xlane.f32.xlu1 %v4361_v29 }
 0xc83   : > { %v4354_v12 = vpop.f32.mrb[34].mxu1 }
 0xc84   : > { %v4355_v31 = vadd.f32 %v6772_v9, %v4354_v12  ;;  %v6376_v32 = vpop.f32.mrb[35].mxu1  ;;  %v5723_v9 = vld [vmem:[%s8270_s10 + $0x20] sm:$0xff] }
 0xc86   : > { %v4367_v34 = vsel %vm1640_vm2, %v4355_v31, -inf }
 0xc87   : > { %4368 = vmax.xlane.f32.xlu1 %v4367_v34 }
 0xcec   : > { %v4360_v3 = vpop.xlane.xlu0 %4359 }
 0xced   : > { %v4370_v35 = vsub.f32 %v4127_v10, %v4360_v3  ;;  %v5725_v10 = vld [vmem:[%s8270_s10 + $0x30] sm:$0xff] }
 0xcef   : > { %v4374_v17 = vmul.f32 1.442695, %v4370_v35 }
 0xcf1   : > { %6746 = vpow2.f32 %v4374_v17 }
 0xcf9   : > { %v4366_v16 = vpop.xlane.xlu0 %4365 }
 0xcfa   : > { %v4372_v37 = vsub.f32 %v4279_v13, %v4366_v16 }
 0xcfb   : > { %v6747_v59 = vpop.eup %6746 }
 0xcfc   : > { %v4378_v38 = vmul.f32 1.442695, %v4372_v37  ;;  %v4382_v40 = vsel %vm1640_vm2, %v6747_v59, 0.0 }
 0xcfd   : > { %4383 = vadd.xlane.f32.xlu0 %v4382_v40 }
 0xcfe   : > { %6748 = vpow2.f32 %v4378_v38 }
 0xd08   : > { %v6749_v36 = vpop.eup %6748 }
 0xd09   : > { %v4388_v23 = vsel %vm1640_vm2, %v6749_v36, 0.0 }
 0xd0a   : > { %4389 = vadd.xlane.f32.xlu0 %v4388_v23  ;;  %v5732_v23 = vld [vmem:[%s8271_s11 + $0x1] ss:$0 sm:$0xff] }
 0xd0c   : > { %v4363_v60 = vpop.xlane.xlu1 %4362 }
 0xd0d   : > { %v4371_v6 = vsub.f32 %v4203_v25, %v4363_v60 }
 0xd0f   : > { %v4376_v7 = vmul.f32 1.442695, %v4371_v6 }
 0xd11   : > { %6750 = vpow2.f32 %v4376_v7 }
 0xd14   : > { %v4369_v41 = vpop.xlane.xlu1 %4368 }
 0xd15   : > { %v4373_v42 = vsub.f32 %v4355_v31, %v4369_v41 }
 0xd17   : > { %v4380_v44 = vmul.f32 1.442695, %v4373_v42 }
 0xd19   : > { %6752 = vpow2.f32 %v4380_v44 }
 0xd1b   : > { %v6751_v33 = vpop.eup %6750 }
 0xd1c   : > { %v4385_v45 = vsel %vm1640_vm2, %v6751_v33, 0.0 }
 0xd1d   : > { %4386 = vadd.xlane.f32.xlu1 %v4385_v45 }
 0xd23   : > { %v6753_v46 = vpop.eup %6752 }
 0xd24   : > { %v4391_v50 = vsel %vm1640_vm2, %v6753_v46, 0.0 }
 0xd25   : > { %4392 = vadd.xlane.f32.xlu1 %v4391_v50 }
 0xd8a   : > { %v4384_v52 = vpop.xlane.xlu0 %4383 }
 0xd8b   : > { %6754 = vrcp.f32 %v4384_v52  ;;  %v5737_v52 = vld [vmem:[%s8274_s14 + $0x40] sm:$0xff] }
 0xd95   : > { %v6755_v47 = vpop.eup %6754 }
 0xd96   : > { %v4395_v53 = vmul.f32 %v6755_v47, %v6747_v59  ;;  %v6603_v47 = vpack.c.bf16 %v5739_v55, %v5737_v52  ;;  %v5786_v52 = vld [vmem:[%s8276_s16 + $0x1e8] sm:$0xff] }
 0xd97   : > { %v4390_v57 = vpop.xlane.xlu0 %4389 }
 0xd98   : > { %6756 = vrcp.f32 %v4390_v57  ;;  %6380 = vmatmul.mubr.msk.f32.vlgmr.msra.gmra.mrb[48].mxu0 %vm1640_vm2, %v4395_v53  ;;  %v5742_v53 = vld [vmem:[%s8274_s14 + $0x68] sm:$0xff]  ;;  %v5741_v57 = vld [vmem:[%s8274_s14 + $0x60] sm:$0xff] }
 0xd99   : > { %6388 = vmatpush3.msra.mxu0 %v3981_v56  ;;  %6389 = vmatprep.mubr.msk.f32.mxu0 %vm6858_vm1, %v6859_v20  ;;  %v5744_v56 = vld [vmem:[%s8274_s14 + $0x78] sm:$0xff] }
 0xd9a   : > { %6397 = vmatprep.subr.mxu0 %v6859_v20 }
 0xda2   : > { %v6757_v22 = vpop.eup %6756 }
 0xda3   : > { %v4399_v58 = vmul.f32 %v6757_v22, %v6749_v36  ;;  %v6605_v22 = vpack.c.bf16 %v5744_v56, %v5742_v53  ;;  %v5769_v53 = vld [vmem:[%s8276_s16 + $0x160] sm:$0xff]  ;;  %v5770_v56 = vld [vmem:[%s8276_s16 + $0x168] sm:$0xff] }
 0xda5   : > { %6390 = vmatmul.mubr.msk.f32.vlgmr.msra.gmra.mrb[50].mxu0 %vm1640_vm2, %v4399_v58  ;;  %v5743_v58 = vld [vmem:[%s8274_s14 + $0x70] sm:$0xff] }
 0xda6   : > { %6399 = vmatprep.mubr.msk.f32.mxu0 %vm6858_vm1, %v6859_v20  ;;  %6398 = vmatpush3.msra.mxu0 %v5723_v9 }
 0xda7   : > { %6407 = vmatprep.subr.mxu0 %v6859_v20 }
 0xdaa   : > { %v4387_v63 = vpop.xlane.xlu1 %4386 }
 0xdab   : > { %6758 = vrcp.f32 %v4387_v63  ;;  %v6607_v63 = vpack.c.bf16 %v5743_v58, %v5741_v57  ;;  %v5787_v57 = vld [vmem:[%s8276_s16 + $0x1f0] sm:$0xff]  ;;  %v6635_v58 = vpack.c.bf16 %v5770_v56, %v5769_v53 }
 0xdb2   : > { %v4393_v43 = vpop.xlane.xlu1 %4392 }
 0xdb3   : > { %6760 = vrcp.f32 %v4393_v43 }
 0xdb5   : > { %v6759_v2 = vpop.eup %6758 }
 0xdb6   : > { %v4397_v62 = vmul.f32 %v6759_v2, %v6751_v33 }
 0xdb8   : > { %6385 = vmatmul.mubr.msk.f32.vlgmr.msra.gmra.mrb[36].mxu1 %vm1640_vm2, %v4397_v62 }
 0xdb9   : > { %6393 = vmatpush3.msra.mxu1 %v4051_v54  ;;  %6394 = vmatprep.mubr.msk.f32.mxu1 %vm6858_vm1, %v6859_v20  ;;  %v5735_v54 = vld [vmem:[%s8272_s12 + $0x1] ss:$0 sm:$0xff] }
 0xdba   : > { %6402 = vmatprep.subr.mxu1 %v6859_v20 }
 0xdbd   : > { %v6761_v4 = vpop.eup %6760 }
 0xdbe   : > { %v4401_v8 = vmul.f32 %v6761_v4, %v6753_v46  ;;  %v5738_v46 = vld [vmem:[%s8274_s14 + $0x48] sm:$0xff] }
 0xdc0   : > { %6395 = vmatmul.mubr.msk.f32.vlgmr.msra.gmra.mrb[38].mxu1 %vm1640_vm2, %v4401_v8  ;;  %v5736_v8 = vld [vmem:[%s8273_s13 + $0x1] ss:$0 sm:$0xff] }
 0xdc1   : > { %6404 = vmatprep.mubr.msk.f32.mxu1 %vm6858_vm1, %v6859_v20  ;;  %6403 = vmatpush3.msra.mxu1 %v5724_v61 }
 0xdc2   : > { %6412 = vmatprep.subr.mxu1 %v6859_v20 }
 0xe6b   : > { %v4471_v11 = vpop.f32.mrb[48].mxu0 }
 0xe6c   : > { %v6381_v14 = vpop.f32.mrb[49].mxu0  ;;  %6400 = vmatmul.mubr.msk.f32.vlgmr.msra.gmra.mrb[52].mxu0 %vm1640_vm2, %v4471_v11  ;;  %v5774_v11 = vld [vmem:[%s8276_s16 + $0x188] sm:$0xff] }
 0xe6d   : > { %6408 = vmatpush3.msra.mxu0 %v5725_v10  ;;  %6409 = vmatprep.mubr.msk.f32.mxu0 %vm6858_vm1, %v6859_v20  ;;  %v5773_v10 = vld [vmem:[%s8276_s16 + $0x180] sm:$0xff] }
 0xe6e   : > { %v6609_v14 = vpack.c.bf16 %v5774_v11, %v5773_v10 }
 0xe78   : > { %v4617_v15 = vpop.f32.mrb[50].mxu0 }
 0xe79   : > { %v6391_v13 = vpop.f32.mrb[51].mxu0  ;;  %6410 = vmatmul.mubr.msk.f32.vlgmr.msra.gmra.mrb[54].mxu0 %vm1640_vm2, %v4617_v15  ;;  %v5757_v15 = vld [vmem:[%s8276_s16 + $0x100] sm:$0xff] }
 0xe7a   : > { %5128 = vmatprep.mubr.f32.mxu0 %v6859_v20  ;;  %v5758_v13 = vld [vmem:[%s8276_s16 + $0x108] sm:$0xff] }
 0xe8b   : > { %v4544_v18 = vpop.f32.mrb[36].mxu1 }
 0xe8c   : > { %v6386_v21 = vpop.f32.mrb[37].mxu1  ;;  %6405 = vmatmul.mubr.msk.f32.vlgmr.msra.gmra.mrb[40].mxu1 %vm1640_vm2, %v4544_v18  ;;  %v5775_v18 = vld [vmem:[%s8276_s16 + $0x190] sm:$0xff] }
 0xe8d   : > { %6413 = vmatpush3.msra.mxu1 %v5726_v5  ;;  %6414 = vmatprep.mubr.msk.f32.mxu1 %vm6858_vm1, %v6859_v20  ;;  %v6611_v5 = vpack.c.bf16 %v5758_v13, %v5757_v15  ;;  %v5776_v21 = vld [vmem:[%s8276_s16 + $0x198] sm:$0xff] }
 0xe8e   : > { %6610 = vmatprep.subr.bf16.mxu1 %v6609_v14 }
 0xe93   : > { %v4690_v25 = vpop.f32.mrb[38].mxu1 }
 0xe94   : > { %v6396_v27 = vpop.f32.mrb[39].mxu1  ;;  %6415 = vmatmul.mubr.msk.f32.vlgmr.msra.gmra.mrb[42].mxu1 %vm1640_vm2, %v4690_v25  ;;  %v6613_v25 = vpack.c.bf16 %v5776_v21, %v5775_v18 }
 0xe95   : > { %6612 = vmatpush3.bf16.msra.mxu1 %v6611_v5  ;;  %v5759_v27 = vld [vmem:[%s8276_s16 + $0x110] sm:$0xff] }
 0xe96   : > { %6614 = vmatprep.subr.bf16.mxu1 %v6613_v25 }
 0xf3f   : > { %v4768_v29 = vpop.f32.mrb[52].mxu0 }
 0xf40   : > { %v6401_v12 = vpop.f32.mrb[53].mxu0  ;;  %v4991_v3 = vsel %vm630_vm0, %v4768_v29, 0.0  ;;  %v5760_v29 = vld [vmem:[%s8276_s16 + $0x118] sm:$0xff] }
 0xf41   : > { %v6615_v12 = vpack.c.bf16 %v5760_v29, %v5759_v27 }
 0xf43   : > { %6616 = vmatpush3.bf16.msra.mxu1 %v6615_v12 }
 0xf4c   : > { %v4914_v31 = vpop.f32.mrb[54].mxu0 }
 0xf4d   : > { %v6411_v32 = vpop.f32.mrb[55].mxu0  ;;  %v4994_v37 = vsel %vm630_vm0, %v4914_v31, 0.0  ;;  %v5777_v31 = vld [vmem:[%s8276_s16 + $0x1a0] sm:$0xff] }
 0xf4e   : > { %v5778_v32 = vld [vmem:[%s8276_s16 + $0x1a8] sm:$0xff] }
 0xf5f   : > { %v4841_v34 = vpop.f32.mrb[40].mxu1 }
 0xf60   : > { %v4992_v35 = vsel %vm630_vm0, %v4841_v34, 0.0  ;;  %v6406_v17 = vpop.f32.mrb[41].mxu1  ;;  %v6617_v34 = vpack.c.bf16 %v5778_v32, %v5777_v31 }
 0xf61   : > { %v4993_v16 = vadd.f32 %v4992_v35, %v4991_v3  ;;  %v5761_v3 = vld [vmem:[%s8276_s16 + $0x120] sm:$0xff]  ;;  %v5762_v35 = vld [vmem:[%s8276_s16 + $0x128] sm:$0xff]  ;;  %v5779_v17 = vld [vmem:[%s8276_s16 + $0x1b0] sm:$0xff] }
 0xf62   : > { %6618 = vmatprep.subr.bf16.mxu1 %v6617_v34 }
 0xf63   : > { %v4995_v59 = vadd.f32 %v4994_v37, %v4993_v16  ;;  %v6619_v16 = vpack.c.bf16 %v5762_v35, %v5761_v3  ;;  %v5780_v37 = vld [vmem:[%s8276_s16 + $0x1b8] sm:$0xff] }
 0xf65   : > { %6620 = vmatpush3.bf16.msra.mxu1 %v6619_v16 }
 0xf67   : > { %v4987_v38 = vpop.f32.mrb[42].mxu1 }
 0xf68   : > { %v4996_v20 = vsel %vm630_vm0, %v4987_v38, 0.0  ;;  %v6416_v40 = vpop.f32.mrb[43].mxu1  ;;  %v5764_v38 = vld [vmem:[%s8276_s16 + $0x138] sm:$0xff] }
 0xf69   : > { %v4997_v36 = vadd.f32 %v4996_v20, %v4995_v59  ;;  %v5763_v59 = vld [vmem:[%s8276_s16 + $0x130] sm:$0xff]  ;;  %v6621_v20 = vpack.c.bf16 %v5780_v37, %v5779_v17  ;;  %v5781_v40 = vld [vmem:[%s8276_s16 + $0x1c0] sm:$0xff] }
 0xf6b   : > { %v4998_v60 = vadd.f32 %v4997_v36, %v7639_v0  ;;  %v5740_v0 = vld [vmem:[%s8274_s14 + $0x58] sm:$0xff]  ;;  %v5782_v36 = vld [vmem:[%s8276_s16 + $0x1c8] sm:$0xff]  ;;  %6622 = vmatprep.subr.bf16.mxu1 %v6621_v20 }
 0xf6c   : > { %v6601_v50 = vpack.c.bf16 %v5740_v0, %v5738_v46  ;;  %v5767_v46 = vld [vmem:[%s8276_s16 + $0x150] sm:$0xff]  ;;  %v5768_v0 = vld [vmem:[%s8276_s16 + $0x158] sm:$0xff] }
 0xf6d   : > { %v7987_v6 = vadd.f32 %v5732_v23, %v4998_v60  ;;  %v6623_v23 = vpack.c.bf16 %v5764_v38, %v5763_v59  ;;  %v6625_v60 = vpack.c.bf16 %v5782_v36, %v5781_v40  ;;  %v6631_v55 = vpack.c.bf16 %v5768_v0, %v5767_v46 }
 0xf6e   : > { %6602 = vmatprep.subr.bf16.mxu0 %v6601_v50  ;;  %v5785_v50 = vld [vmem:[%s8276_s16 + $0x1e0] sm:$0xff] }
 0xf6f   : > { %v5012_v7 = vsel %vm630_vm0, %v7987_v6, 0.0  ;;  %6604 = vmatpush1.bf16.msra.mxu0 %v6603_v47  ;;  %6624 = vmatpush3.bf16.msra.mxu1 %v6623_v23  ;;  %v6633_v47 = vpack.c.bf16 %v5786_v52, %v5785_v50 }
 0xf70   : > { %5013 = vadd.xlane.f32.xlu0 %v5012_v7  ;;  %6606 = vmatprep.subr.bf16.mxu0 %v6605_v22  ;;  %v5765_v7 = vld [vmem:[%s8276_s16 + $0x140] sm:$0xff]  ;;  %v5788_v22 = vld [vmem:[%s8276_s16 + $0x1f8] sm:$0xff] }
 0xf71   : > { %6626 = vmatprep.subr.bf16.mxu1 %v6625_v60 }
 0xf73   : > { %6608 = vmatpush1.bf16.msra.mxu0 %v6607_v63  ;;  %v6637_v63 = vpack.c.bf16 %v5788_v22, %v5787_v57 }
 0xffd   : > { %v5014_v41 = vpop.xlane.xlu0 %5013 }
 0xffe   : > { %v5015_v42 = vmul.f32 0.03125, %v5014_v41  ;;  %v5766_v41 = vld [vmem:[%s8276_s16 + $0x148] sm:$0xff] }
0x1000   : > { %v5016_v44 = vsub.f32 %v7987_v6, %v5015_v42  ;;  %v5783_v42 = vld [vmem:[%s8276_s16 + $0x1d0] sm:$0xff] }
0x1002   : > { %v5017_v33 = vmul.f32 %v5016_v44, %v5016_v44 }
0x1004   : > { %v5018_v45 = vsel %vm630_vm0, %v5017_v33, 0.0  ;;  %v6627_v33 = vpack.c.bf16 %v5766_v41, %v5765_v7 }
0x1005   : > { %5019 = vadd.xlane.f32.xlu1 %v5018_v45 }
0x1006   : > { %6628 = vmatpush3.bf16.msra.mxu1 %v6627_v33 }
0x1092   : > { %v5020_v43 = vpop.xlane.xlu1 %5019 }
0x1093   : > { %v5021_v1 = vmul.f32 0.03125, %v5020_v43  ;;  %v5771_v43 = vld [vmem:[%s8276_s16 + $0x170] sm:$0xff] }
0x1095   : > { %v5022_v2 = vadd.f32 1e-05, %v5021_v1  ;;  %v5772_v1 = vld [vmem:[%s8276_s16 + $0x178] sm:$0xff] }
0x1097   : > { %6762 = vrsqrt.f32 %v5022_v2  ;;  %v6639_v2 = vpack.c.bf16 %v5772_v1, %v5771_v43 }
0x10a1   : > { %v6763_v62 = vpop.eup %6762 }
0x10a2   : > { %v5024_v4 = vmul.f32 %v6763_v62, %v5016_v44  ;;  %v5784_v44 = vld [vmem:[%s8276_s16 + $0x1d8] sm:$0xff]  ;;  %v5745_v62 = vld [vmem:[%s8275_s15 + $0x2] sm:$0x3] }
0x10a3   : > { %v6629_v45 = vpack.c.bf16 %v5784_v44, %v5783_v42 }
0x10a4   : > { %v5031_v9 = vmul.f32 %v5735_v54, %v5024_v4  ;;  %v5054_v54 = vrot.slane %v5745_v62, %v2634_v49  ;;  %v5058_v4 = vrot.slane %v5745_v62, %v2638_v51 }
0x10a5   : > { %6630 = vmatprep.subr.bf16.mxu1 %v6629_v45 }
0x10a6   : > { %v5038_v61 = vadd.f32 %v5736_v8, %v5031_v9  ;;  %6632 = vmatpush3.bf16.msra.mxu1 %v6631_v55  ;;  %v5137_v9 = vstv %s5748_s28 }
0x10a7   : > { %6634 = vmatprep.subr.bf16.mxu1 %v6633_v47 }
0x10a8   : > { %5746 = vmatmul.mubr.msk.f32.vlgmr.msra.gmra.mrb[56].mxu0 %vm630_vm0, %v5038_v61 }
0x10aa   : > { %6636 = vmatpush3.bf16.msra.mxu1 %v6635_v58 }
0x10ab   : > { %6638 = vmatprep.subr.bf16.mxu1 %v6637_v63 }
0x10ae   : > { %6640 = vmatpush3.bf16.msra.mxu1 %v6639_v2 }
0x117b   : > { %v5130_v8 = vpop.f32.mrb[56].mxu0 }
0x117c   : > { %v5131_v61 = vadd.f32 %v5130_v8, %v5054_v54  ;;  %v5132_v10 = vpop.f32.mrb[57].mxu0 }
0x117d   : > { %v5133_v11 = vadd.f32 %v5132_v10, %v5058_v4 }
0x117e   : > { %v8127_v14 = vadd.f32 %v5137_v9, %v5131_v61 }
0x117f   : > { %v8129_v15 = vadd.f32 %v5137_v9, %v5133_v11 }
0x1180   : > { %v5140_v13 = vand.u32 2147483647, %v8127_v14  ;;  %v5143_v5 = vand.u32 2139095040, %v8127_v14  ;;  %vm5142_vm15 = vcmp.lt.s32.totalorder %v8127_v14, 0 }
0x1181   : > { %v5247_v18 = vand.u32 2139095040, %v8129_v15  ;;  %v5244_v49 = vand.u32 2147483647, %v8129_v15 }
0x1182   : > { %v5144_v21 = vshrl.u32 %v5143_v5, 23  ;;  %v5147_v48 = vand.u32 8388607, %v5140_v13 }
0x1183   : > { %v5248_v51 = vshrl.u32 %v5247_v18, 23  ;;  %v5251_v31 = vand.u32 8388607, %v5244_v49 }
0x1184   : > { %v5749_v25 = vadd.s32 4294967169, %v5144_v21  ;;  %v5148_v12 = vor.u32 8388608, %v5147_v48 }
0x1185   : > { %v5753_v27 = vadd.s32 4294967169, %v5248_v51  ;;  %v5252_v37 = vor.u32 8388608, %v5251_v31 }
0x1186   : > { %v5150_v29 = vadd.s32 1, %v5749_v25  ;;  %v8139_v16 = vshll.u32 %v5148_v12, 8 }
0x1187   : > { %v5254_v32 = vadd.s32 1, %v5753_v27 }
0x1188   : > { %vm5151_vm1 = vcmp.gt.s32.totalorder %v5150_v29, 0 }
0x1189   : > { %v5152_v34 = vsel %vm5151_vm1, %v5150_v29, 0  ;;  %vm5255_vm2 = vcmp.gt.s32.totalorder %v5254_v32, 0  ;;  %vm5141_vm1 = vcmp.le.f32.partialorder %v5140_v13, 0.7853982 }
0x118a   : > { %v5153_v3 = vshrl.u32 %v5152_v34, 5  ;;  %v5154_v35 = vand.u32 31, %v5152_v34  ;;  %v5256_v17 = vsel %vm5255_vm2, %v5254_v32, 0  ;;  %v5292_v32 = vshll.u32 %v5252_v37, 8 }
0x118b   : > { %v8142_v20 = vshrl.u32 %v5256_v17, 5  ;;  %v5258_v40 = vand.u32 31, %v5256_v17  ;;  %vm5246_vm2 = vcmp.lt.s32.totalorder %v8129_v15, 0 }
0x118c   : > { %v5155_v59 = vsub.s32 32, %v5154_v35  ;;  %v5157_v38 = vshll.u32 %v6860_v19, %v5154_v35  ;;  %v5160_v36 = vshll.u32 %v6861_v24, %v5154_v35  ;;  %v5163_v23 = vshll.u32 %v6862_v26, %v5154_v35 }
0x118d   : > { %v5166_v60 = vshll.u32 %v6863_v28, %v5154_v35  ;;  %v5169_v7 = vshll.u32 %v6864_v30, %v5154_v35  ;;  %vm5172_vm3 = vcmp.lt.s32.totalorder %v5153_v3, 1  ;;  %vm5173_vm4 = vcmp.lt.s32.totalorder %v5153_v3, 2 }
0x118e   : > { %v5158_v41 = vshrl.u32 %v6861_v24, %v5155_v59  ;;  %v5161_v42 = vshrl.u32 %v6862_v26, %v5155_v59  ;;  %v5164_v44 = vshrl.u32 %v6863_v28, %v5155_v59  ;;  %v5156_v33 = vshrl.u32 %v6860_v19, %v5155_v59 }
0x118f   : > { %v5167_v45 = vshrl.u32 %v6864_v30, %v5155_v59  ;;  %v5170_v46 = vshrl.u32 %v6865_v39, %v5155_v59  ;;  %v5259_v55 = vsub.s32 32, %v5258_v40  ;;  %vm5174_vm5 = vcmp.lt.s32.totalorder %v5153_v3, 3 }
0x1190   : > { %v5159_v0 = vor.u32 %v5158_v41, %v5157_v38  ;;  %v5162_v50 = vor.u32 %v5161_v42, %v5160_v36  ;;  %v5165_v52 = vor.u32 %v5164_v44, %v5163_v23  ;;  %vm5175_vm6 = vcmp.lt.s32.totalorder %v5153_v3, 4 }
0x1191   : > { %v5168_v47 = vor.u32 %v5167_v45, %v5166_v60  ;;  %v5171_v53 = vor.u32 %v5170_v46, %v5169_v7  ;;  %v5261_v2 = vshll.u32 %v6860_v19, %v5258_v40  ;;  %v5262_v4 = vshrl.u32 %v6861_v24, %v5259_v55 }
0x1192   : > { %v5176_v56 = vsel %vm5172_vm3, %v5156_v33, %v5159_v0  ;;  %v5177_v57 = vsel %vm5175_vm6, %v5165_v52, 2102212464  ;;  %v5180_v22 = vsel %vm5172_vm3, %v5159_v0, %v5162_v50  ;;  %v5184_v58 = vsel %vm5172_vm3, %v5162_v50, %v5165_v52 }
0x1193   : > { %v5178_v63 = vsel %vm5174_vm5, %v5162_v50, %v5177_v57  ;;  %v5181_v43 = vsel %vm5175_vm6, %v5168_v47, 920167782  ;;  %v5185_v1 = vsel %vm5175_vm6, %v5171_v53, 1326507024  ;;  %v5264_v8 = vshll.u32 %v6861_v24, %v5258_v40 }
0x1194   : > { %v5182_v62 = vsel %vm5174_vm5, %v5165_v52, %v5181_v43  ;;  %v5186_v54 = vsel %vm5174_vm5, %v5168_v47, %v5185_v1  ;;  %v5179_v9 = vsel %vm5173_vm4, %v5176_v56, %v5178_v63  ;;  %v5265_v11 = vshrl.u32 %v6862_v26, %v5259_v55 }
0x1195   : > { %v5183_v61 = vsel %vm5173_vm4, %v5180_v22, %v5182_v62  ;;  %v5187_v10 = vsel %vm5173_vm4, %v5184_v58, %v5186_v54  ;;  %v5263_v51 = vor.u32 %v5262_v4, %v5261_v2  ;;  %v5267_v24 = vshll.u32 %v6862_v26, %v5258_v40 }
0x1196   : > { %v8165_v5 = vmul.u32.u64.low %v8139_v16, %v5187_v10  ;;  %v8166_v18 = vmul.u32.u64.high %v8139_v16, %v5187_v10, %v8165_v5  ;;  %v8169_v21 = vmul.u32.u64.low %v8139_v16, %v5183_v61  ;;  %v8170_v48 = vmul.u32.u64.high %v8139_v16, %v5183_v61, %v8169_v21 }
0x1197   : > { %v5266_v25 = vor.u32 %v5265_v11, %v5264_v8  ;;  %v5268_v27 = vshrl.u32 %v6863_v28, %v5259_v55  ;;  %v5270_v29 = vshll.u32 %v6863_v28, %v5258_v40  ;;  %v5271_v12 = vshrl.u32 %v6864_v30, %v5259_v55 }
0x1198   : > { %v5274_v31 = vshrl.u32 %v6865_v39, %v5259_v55  ;;  %v5195_v34 = vmul.u32 %v8139_v16, %v5179_v9  ;;  %v5260_v3 = vshrl.u32 %v6860_v19, %v5259_v55  ;;  %v5273_v17 = vshll.u32 %v6864_v30, %v5258_v40 }
0x1199   : > { %v5269_v35 = vor.u32 %v5268_v27, %v5267_v24  ;;  %vm5197_vm7 = vc.u32 %v8166_v18, %v8169_v21  ;;  %v5198_v26 = vadd.s32 1, %v8170_v48  ;;  %v5272_v59 = vor.u32 %v5271_v12, %v5270_v29 }
0x119a   : > { %vm5276_vm8 = vcmp.lt.s32.totalorder %v8142_v20, 1  ;;  %v5275_v28 = vor.u32 %v5274_v31, %v5273_v17  ;;  %vm5278_vm9 = vcmp.lt.s32.totalorder %v8142_v20, 3  ;;  %vm5279_vm10 = vcmp.lt.s32.totalorder %v8142_v20, 4 }
0x119b   : > { %v5284_v39 = vsel %vm5276_vm8, %v5263_v51, %v5266_v25  ;;  %v5199_v16 = vsel %vm5197_vm7, %v5198_v26, %v8170_v48  ;;  %v5281_v37 = vsel %vm5279_vm10, %v5269_v35, 2102212464  ;;  %v5285_v19 = vsel %vm5279_vm10, %v5272_v59, 920167782 }
0x119c   : > { %v5288_v38 = vsel %vm5276_vm8, %v5266_v25, %v5269_v35  ;;  %v5200_v36 = vadd.s32 %v5199_v16, %v5195_v34  ;;  %vm5277_vm11 = vcmp.lt.s32.totalorder %v8142_v20, 2  ;;  %v5286_v30 = vsel %vm5278_vm9, %v5269_v35, %v5285_v19 }
0x119d   : > { %v5289_v40 = vsel %vm5279_vm10, %v5275_v28, 1326507024  ;;  %v5280_v23 = vsel %vm5276_vm8, %v5260_v3, %v5263_v51  ;;  %v5282_v60 = vsel %vm5278_vm9, %v5266_v25, %v5281_v37  ;;  %v5287_v7 = vsel %vm5277_vm11, %v5284_v39, %v5286_v30 }
0x119e   : > { %v5290_v41 = vsel %vm5278_vm9, %v5272_v59, %v5289_v40  ;;  %v5201_v42 = vadd.s32 536870912, %v5200_v36  ;;  %v8187_v33 = vmul.u32.u64.low %v5292_v32, %v5287_v7  ;;  %v8188_v45 = vmul.u32.u64.high %v5292_v32, %v5287_v7, %v8187_v33 }
0x119f   : > { %v5291_v44 = vsel %vm5277_vm11, %v5288_v38, %v5290_v41  ;;  %v5283_v52 = vsel %vm5277_vm11, %v5280_v23, %v5282_v60  ;;  %v5196_v9 = vadd.s32 %v8169_v21, %v8166_v18  ;;  %vm5245_vm3 = vcmp.le.f32.partialorder %v5244_v49, 0.7853982 }
0x11a0   : > { %v8190_v46 = vmul.u32.u64.low %v5292_v32, %v5291_v44  ;;  %v8191_v0 = vmul.u32.u64.high %v5292_v32, %v5291_v44, %v8190_v46  ;;  %v5202_v50 = vshrl.u32 %v5201_v42, 30  ;;  %v5302_v47 = vadd.s32 1, %v8188_v45 }
0x11a1   : > { %v5299_v20 = vmul.u32 %v5292_v32, %v5283_v52  ;;  %vm5232_vm7 = vweird.f32 %v8127_v14  ;;  %vm5336_vm11 = vweird.f32 %v8129_v15 }
0x11a2   : > { %v5203_v55 = vshll.u32 %v5202_v50, 30  ;;  %vm5301_vm12 = vc.u32 %v8191_v0, %v8187_v33  ;;  %v5300_v3 = vadd.s32 %v8187_v33, %v8191_v0  ;;  %v5226_v21 = vsub.s32 4, %v5202_v50 }
0x11a3   : > { %v5303_v56 = vsel %vm5301_vm12, %v5302_v47, %v8188_v45 }
0x11a4   : > { %v5204_v53 = vsub.s32 %v5200_v36, %v5203_v55  ;;  %v5304_v57 = vadd.s32 %v5303_v56, %v5299_v20  ;;  %v5227_v38 = vsel %vm5142_vm15, %v5226_v21, %v5202_v50 }
0x11a5   : > { %v5229_v60 = vsel %vm5141_vm1, 0, %v5227_v38 }
0x11a6   : > { %v5206_v22 = vsub.s32 0, %v5204_v53  ;;  %v5305_v58 = vadd.s32 536870912, %v5304_v57  ;;  %v5233_v42 = vadd.s32 3, %v5229_v60 }
0x11a8   : > { %v5750_v63 = vmin.u32 %v5206_v22, %v5204_v53  ;;  %v5306_v43 = vshrl.u32 %v5305_v58, 30  ;;  %v5234_v45 = vand.u32 3, %v5233_v42 }
0x11aa   : > { %v5208_v1 = vclz %v5750_v63  ;;  %v5307_v2 = vshll.u32 %v5306_v43, 30  ;;  %v5330_v41 = vsub.s32 4, %v5306_v43  ;;  %vm5239_vm4 = vcmp.eq.s32.totalorder %v5234_v45, 2 }
0x11ab   : > { %vm5236_vm5 = vcmp.eq.s32.totalorder %v5234_v45, 0  ;;  %vm5235_vm6 = vcmp.lt.s32.totalorder %v5234_v45, 2 }
0x11ac   : > { %v5751_v62 = vadd.s32 4294967294, %v5208_v1  ;;  %v5308_v54 = vsub.s32 %v5304_v57, %v5307_v2  ;;  %v5331_v13 = vsel %vm5246_vm2, %v5330_v41, %v5306_v43 }
0x11ad   : > { %v5333_v50 = vsel %vm5245_vm3, 0, %v5331_v13 }
0x11ae   : > { %vm5752_vm13 = vcmp.lt.s32.totalorder %v5751_v62, 0  ;;  %v5310_v8 = vsub.s32 0, %v5308_v54 }
0x11af   : > { %v5211_v4 = vsel %vm5752_vm13, 0, %v5751_v62 }
0x11b0   : > { %v5212_v61 = vsub.s32 32, %v5211_v4  ;;  %v5216_v10 = vsub.s32 4294967266, %v5211_v4  ;;  %v5754_v11 = vmin.u32 %v5310_v8, %v5308_v54  ;;  %v5213_v5 = vshll.u32 %v5204_v53, %v5211_v4 }
0x11b1   : > { %v5337_v53 = vadd.s32 3, %v5333_v50 }
0x11b2   : > { %v5214_v48 = vshrl.u32 %v5196_v9, %v5212_v61  ;;  %v5217_v51 = vadd.s32 127, %v5216_v10  ;;  %v5312_v25 = vclz %v5754_v11  ;;  %v5790_v10 = vld [vmem:[%s8277_s17 + $0x1] ss:$0 sm:$0xff] }
0x11b3   : > { %v5338_v22 = vand.u32 3, %v5337_v53 }
0x11b4   : > { %v5215_v24 = vor.u32 %v5214_v48, %v5213_v5  ;;  %v5218_v27 = vshll.u32 %v5217_v51, 23  ;;  %v5755_v29 = vadd.s32 4294967294, %v5312_v25 }
0x11b5   : > { %vm5343_vm8 = vcmp.eq.s32.totalorder %v5338_v22, 2  ;;  %vm5340_vm9 = vcmp.eq.s32.totalorder %v5338_v22, 0  ;;  %vm5339_vm10 = vcmp.lt.s32.totalorder %v5338_v22, 2 }
0x11b6   : > { %v5219_v12 = vor.u32 4788187, %v5218_v27  ;;  %vm5756_vm14 = vcmp.lt.s32.totalorder %v5755_v29, 0  ;;  %v5222_v32 = vcvt.s32.f32 %v5215_v24 }
0x11b7   : > { %v5315_v34 = vsel %vm5756_vm14, 0, %v5755_v29 }
0x11b8   : > { %v5220_v31 = vand.u32 2147483647, %v5219_v12  ;;  %v5316_v35 = vsub.s32 32, %v5315_v34  ;;  %v5320_v17 = vsub.s32 4294967266, %v5315_v34  ;;  %v5317_v26 = vshll.u32 %v5308_v54, %v5315_v34 }
0x11b9   : > { %v5348_v54 = vstv %s5747_s21  ;;  %s5465_s21 = scalar_lea.sflag [#allocation3], %s616_s27 }
0x11ba   : > { %v5223_v18 = vmul.f32 %v5222_v32, %v5220_v31  ;;  %v5318_v59 = vshrl.u32 %v5300_v3, %v5316_v35  ;;  %v5321_v28 = vadd.s32 127, %v5320_v17 }
0x11bc   : > { %v5224_v39 = vxor.u32 2147483648, %v5223_v18  ;;  %v5319_v16 = vor.u32 %v5318_v59, %v5317_v26  ;;  %v5322_v37 = vshll.u32 %v5321_v28, 23 }
0x11be   : > { %v5225_v19 = vsel %vm5142_vm15, %v5224_v39, %v5223_v18  ;;  %v5323_v30 = vor.u32 4788187, %v5322_v37  ;;  %v5326_v23 = vcvt.s32.f32 %v5319_v16 }
0x11bf   : > { %v5228_v36 = vsel %vm5141_vm1, %v8127_v14, %v5225_v19 }
0x11c0   : > { %6764 = vcosq.f32 %v5228_v36  ;;  %v5324_v40 = vand.u32 2147483647, %v5323_v30 }
0x11c1   : > { %6766 = vsinq.f32 %v5228_v36 }
0x11c2   : > { %v5327_v7 = vmul.f32 %v5326_v23, %v5324_v40 }
0x11c4   : > { %v5328_v44 = vxor.u32 2147483648, %v5327_v7 }
0x11c6   : > { %v5329_v33 = vsel %vm5246_vm2, %v5328_v44, %v5327_v7 }
0x11c7   : > { %v5332_v46 = vsel %vm5245_vm3, %v8129_v15, %v5329_v33 }
0x11c8   : > { %6768 = vcosq.f32 %v5332_v46 }
0x11c9   : > { %6770 = vsinq.f32 %v5332_v46 }
0x11ca   : > { %v6765_v0 = vpop.eup %6764 }
0x11cb   : > { %v6767_v52 = vpop.eup %6766  ;;  %v5240_v55 = vxor.u32 2147483648, %v6765_v0 }
0x11cc   : > { %v5237_v47 = vxor.u32 2147483648, %v6767_v52 }
0x11cd   : > { %v5241_v20 = vsel %vm5239_vm4, %v5240_v55, %v6767_v52 }
0x11ce   : > { %v5238_v56 = vsel %vm5236_vm5, %v6765_v0, %v5237_v47 }
0x11cf   : > { %v5242_v49 = vsel %vm5235_vm6, %v5238_v56, %v5241_v20 }
0x11d0   : > { %v5243_v57 = vsel %vm5232_vm7, nan, %v5242_v49 }
0x11d1   : > { %v5349_v9 = vmul.f32 %v5348_v54, %v5243_v57 }
0x11d2   : > { %v6769_v58 = vpop.eup %6768 }
0x11d3   : > { %v6771_v63 = vpop.eup %6770  ;;  %v5344_v43 = vxor.u32 2147483648, %v6769_v58 }
0x11d4   : > { %v5341_v1 = vxor.u32 2147483648, %v6771_v63 }
0x11d5   : > { %v5345_v2 = vsel %vm5343_vm8, %v5344_v43, %v6771_v63 }
0x11d6   : > { %v5342_v62 = vsel %vm5340_vm9, %v6769_v58, %v5341_v1 }
0x11d7   : > { %v5346_v4 = vsel %vm5339_vm10, %v5342_v62, %v5345_v2 }
0x11d8   : > { %v5347_v8 = vsel %vm5336_vm11, nan, %v5346_v4 }
0x11d9   : > { %v5350_v14 = vmul.f32 %v5348_v54, %v5347_v8 }
0x11db   : > { %5456 = vmatprep.mubr.f32.mxu1 %v5350_v14 }
0x11dc   : > { %5457 = vmatmul.mubr.f32.vlgmr.msra.gmra.mrb[44].mxu1 %v5349_v9 }
0x12af   : > { %v6030_v61 = vpop.f32.mrb[44].mxu1 }
0x12b0   : > { %v6031_v11 = vpop.f32.mrb[45].mxu1 }
0x12b1   : > { %v6032_v5 = vadd.f32 %v6031_v11, %v6030_v61 }
0x12b3   : > { %v5459_v15 = vadd.f32 %v6032_v5, %v5790_v10 }
0x12b5   : > { %v5462_v48 = vadd.f32 %v5459_v15, %v7987_v6 }
0x12b7   : > { %5463 = vst.msk [vmem:[%s618_s2] sm:$0xff] %vm630_vm0, %v5462_v48 }
0x12b8   : > { %6801 = shalt.err (!%p6798_p2)
}
0x12b9   : > { %s6802_s27 = scalar_lea.hbm %s8217_s26, 128  ;;  %s6806_s24 = scalar_lea.hbm %s8309_s19, 256 }
0x12ba   : > { %p6803_p3 = scmp.ne.s32.totalorder %s8217_s26, %s6802_s27  ;;  %p6807_p8 = scmp.lt.u32.totalorder %s8217_s26, %s8309_s19 }
0x12bb   : > { %p6808_p11 = scmp.lt.u32.totalorder %s6806_s24, %s6802_s27  ;;  %p6810_p10 = scmp.lt.u32.totalorder %s6802_s27, %s8217_s26 }
0x12bc   : > { %p6804_p4 = pnand %p6803_p3, %p7005_p5 }
0x12bd   : > { %p6809_p9 = por %p6808_p11, %p6807_p8 }
0x12be   : > { %p6805_p7 = pneg %p6804_p4 }
0x12bf   : > { %p6811_p12 = por %p6810_p10, %p6809_p9 }
0x12c1   : > { %p6812_p13 = pnand %p6811_p12, %p6805_p7 }
0x12c3   : > { %6815 = shalt.err (!%p6812_p13)
}
0x12c4   : > { %6661 = dma.vmem_to_hbm [thread:$0]  (%p7005_p5), %s8219_s0, 128, %s8217_s26, %s5465_s21  }
0x12c5 PF: > { %s8310_s29 = sld [smem:[#allocation10_spill]]  ;;  %s8311_s18 = sld [smem:[#allocation8_spill]] }
0x12cb   : > { %p6673_p0 = scmp.ge.s32.totalorder %s8310_s29, 2  ;;  %s5490_s22 = sand.u32 1, %s8311_s18  }
0x12cc   : > { %s5491_s2 = scalar_lea.sflag [#allocation3], %s5490_s22 }
0x12cd   : > { %p6668_p1 = pnand %p6673_p0, %p7009_p6 }
0x12cf   : > { %6837 = dma.done.wait (!%p6668_p1), %s5491_s2, 128  }
0x12d0   : > { %6839 = vsyncadd (!%p6668_p1), %s5491_s2, 4294967168  ;;  %s8313_s21 = sld [smem:[#allocation11_spill]]  ;;  %s8314_s27 = sld [smem:[#allocation9_spill]] }
0x12d1   : > { %s8315_s20 = sld [smem:[#allocation12_spill]]  ;;  %s8316_s0 = smov %s6846_s30 }
0x12d6   : > { %p30_p2 = scmp.ge.s32.totalorder %s8313_s21, 4   ;;  %s8317_s30 = smov %s8314_s27 }
0x12d8   :  { %32 = sbr.rel (!%p30_p2) target bundleno = 11 (0xb), region = 155 }
0x12df   :  { %5496 = vsyncpa [#allocation3], 1 }
0x12e0   :  { %5498 = vsyncpa [#allocation3 + $0x1], 1 }
0x12e1   :  { %5499 = vsyncpa [#allocation4], 1 }
0x12e2   :  { %5501 = vsyncpa [#allocation4 + $0x1], 1 }

</bundles_post_ra>
